<compile_context>
chip_gen: v7x
topology: tpu7x:2x2x1
jax: 0.10.0
libtpu: 0.0.40
codegen_flags: <defaults>
</compile_context>

<pallas_src>
import functools
import math

import jax
import jax.numpy as jnp
from jax.experimental import pallas as pl
from jax.experimental.pallas import tpu as pltpu


def _round_up(x, m):
    return (x + m - 1) // m * m


def _vmem_limit_bytes():
    """Generation-aware scoped-VMEM budget: 3/4 of physical, capped at 64 MiB.

    v5e/v6e (128 MiB physical) -> 64 MiB; v7x (64 MiB physical) -> 48 MiB.
    """
    try:
        cap = int(pltpu.get_tpu_info().vmem_capacity_bytes)
    except Exception:
        cap = 64 * 1024 * 1024
    return int(min(64 * 1024 * 1024, cap * 3 // 4))


# ---------------------------------------------------------------------------
# Kernels
# ---------------------------------------------------------------------------
def _feat_transform_kernel(x_ref, w_ref, o_ref):
    """h = x @ W  (row tile of nodes, full weight resident)."""
    o_ref[...] = jnp.dot(
        x_ref[...], w_ref[...], preferred_element_type=jnp.float32
    ).astype(o_ref.dtype)


def _gcn_block_kernel(has_tail, a_ref, h_ref, b_agg_ref, wl_ref, bl_ref, *rest):
    """One GCN block: tiled A_hat @ h reduction + fused epilogue.

    h_ref is the FULL (n_pad, h_pad) feature matrix, VMEM-resident (constant
    index_map); the K-slab is sliced in-kernel, so no h re-fetch per row tile.

    Epilogue (on the last K tile):
        acc = relu(acc + b_agg)        # finish GCNConv (written back into scratch)
        t   = acc @ W_lin + b_lin      # following nn.Linear
        if has_tail:
            t = t @ W_next             # next GCNConv's feature transform
            (dropout between lin_1 and gc2 is identity in eval mode)
    """
    if has_tail:
        w_tail_ref, out_ref, acc_ref = rest
    else:
        out_ref, acc_ref = rest

    k = pl.program_id(1)
    tile_k = a_ref.shape[1]

    @pl.when(k == 0)
    def _():
        acc_ref[...] = jnp.zeros_like(acc_ref)

    start = pl.multiple_of(k * tile_k, tile_k)
    h_slab = h_ref[pl.ds(start, tile_k), :]
    acc_ref[...] += jnp.dot(a_ref[...], h_slab, preferred_element_type=jnp.float32)

    @pl.when(k == pl.num_programs(1) - 1)
    def _():
        # Reuse the accumulator scratch for the relu result: bounds register /
        # VMEM pressure when tile_m is large.
        acc_ref[...] = jnp.maximum(acc_ref[...] + b_agg_ref[...], 0.0)
        t = (
            jnp.dot(
                acc_ref[...].astype(jnp.bfloat16), wl_ref[...],
                preferred_element_type=jnp.float32,
            )
            + bl_ref[...]
        )
        if has_tail:
            t = jnp.dot(
                t.astype(jnp.bfloat16), w_tail_ref[...],
                preferred_element_type=jnp.float32,
            )
        out_ref[...] = t.astype(out_ref.dtype)


def _gin_fused_kernel(a_ref, x_ref, wg1_ref, bg1_ref, wl1_ref, bl1_ref,
                      wg2_ref, bg2_ref, wl2_ref, bl2_ref, out_ref):
    """Whole GIN forward in one kernel (small graphs: everything VMEM-resident)."""

    def mm(a, b):
        return jnp.dot(
            a.astype(jnp.bfloat16), b.astype(jnp.bfloat16),
            preferred_element_type=jnp.float32,
        )

    h = mm(x_ref[...], wg1_ref[...])              # gc1 feature transform
    h = mm(a_ref[...], h)                         # A_hat @ h1
    h = jnp.maximum(h + bg1_ref[...], 0.0)        # + b_gc1, relu
    h = mm(h, wl1_ref[...]) + bl1_ref[...]        # lin_1
    # dropout: identity (eval mode)
    h = mm(h, wg2_ref[...])                       # gc2 feature transform
    h = mm(a_ref[...], h)                         # A_hat @ h2
    h = jnp.maximum(h + bg2_ref[...], 0.0)        # + b_gc2, relu
    h = mm(h, wl2_ref[...]) + bl2_ref[...]        # lin_2
    out_ref[...] = h.astype(out_ref.dtype)


# ---------------------------------------------------------------------------
# Glue: GCN-normalized dense adjacency (PyG gcn_norm semantics), built padded.
# ---------------------------------------------------------------------------
def build_gcn_adjacency(edge_index, num_nodes, n_pad=None, dtype=jnp.float32):
    if n_pad is None:
        n_pad = num_nodes
    src, dst = edge_index[0], edge_index[1]
    # All edges accumulate (duplicates and existing self-loops kept, weight 1 each).
    a = jnp.zeros((n_pad, n_pad), jnp.float32).at[dst, src].add(1.0)
    # add_remaining_self_loops: weight-1 loop only for nodes without one.
    idx = jnp.arange(num_nodes)
    diag = a[idx, idx]
    a = a.at[idx, idx].add(jnp.where(diag > 0.0, 0.0, 1.0))
    deg = a.sum(axis=1)                                  # in-degree incl. self-loop
    dinv = jnp.where(deg > 0, jax.lax.rsqrt(deg), 0.0)
    return (a * dinv[:, None] * dinv[None, :]).astype(dtype)


# ---------------------------------------------------------------------------
# Forward wrapper
# ---------------------------------------------------------------------------
def gin_forward(x, params, edge_index, num_nodes, *, tile_m=256, tile_k=256,
                force_tiled=False, fused_max_nodes=1024):
    N = num_nodes
    nfeat = x.shape[1]
    nhid = params["w_lin2"].shape[1]

    f_pad = _round_up(nfeat, 128)
    h_pad = _round_up(nhid, 128)

    use_fused = (not force_tiled) and _round_up(N, 128) <= fused_max_nodes
    if use_fused:
        n_pad = _round_up(N, 128)
    else:
        # lcm so both tile sizes divide the padded node count exactly.
        n_pad = _round_up(N, math.lcm(tile_m, tile_k))

    # Dense normalized adjacency built directly at padded shape, cast once to bf16.
    a_pad = build_gcn_adjacency(edge_index, N, n_pad, dtype=jnp.bfloat16)
    x_pad = jnp.zeros((n_pad, f_pad), jnp.bfloat16).at[:N, :nfeat].set(
        x.astype(jnp.bfloat16)
    )

    def pad_w(w, rows, cols):
        return jnp.zeros((rows, cols), jnp.bfloat16).at[: w.shape[0], : w.shape[1]].set(
            w.astype(jnp.bfloat16)
        )

    def pad_b(b, cols):
        return jnp.zeros((1, cols), jnp.float32).at[0, : b.shape[0]].set(
            b.astype(jnp.float32)
        )

    w_gc1 = pad_w(params["w_gc1"], f_pad, h_pad)
    w_lin1 = pad_w(params["w_lin1"], h_pad, h_pad)
    w_gc2 = pad_w(params["w_gc2"], h_pad, h_pad)
    w_lin2 = pad_w(params["w_lin2"], h_pad, h_pad)
    b_gc1 = pad_b(params["b_gc1"], h_pad)
    b_lin1 = pad_b(params["b_lin1"], h_pad)
    b_gc2 = pad_b(params["b_gc2"], h_pad)
    b_lin2 = pad_b(params["b_lin2"], h_pad)

    vmem_limit = _vmem_limit_bytes()

    # ---------------- Fused single-kernel path (small graphs) ----------------
    if use_fused:
        def full(shape):
            return pl.BlockSpec(shape, lambda i, _n=len(shape): (0,) * _n)

        out = pl.pallas_call(
            _gin_fused_kernel,
            out_shape=jax.ShapeDtypeStruct((n_pad, h_pad), jnp.float32),
            grid=(1,),
            in_specs=[
                full((n_pad, n_pad)),                       # A_hat
                full((n_pad, f_pad)),                       # x
                full((f_pad, h_pad)), full((1, h_pad)),     # W_gc1, b_gc1
                full((h_pad, h_pad)), full((1, h_pad)),     # W_lin1, b_lin1
                full((h_pad, h_pad)), full((1, h_pad)),     # W_gc2, b_gc2
                full((h_pad, h_pad)), full((1, h_pad)),     # W_lin2, b_lin2
            ],
            out_specs=full((n_pad, h_pad)),
            compiler_params=pltpu.CompilerParams(
                dimension_semantics=("arbitrary",),
                vmem_limit_bytes=vmem_limit,
            ),
        )(a_pad, x_pad, w_gc1, b_gc1, w_lin1, b_lin1, w_gc2, b_gc2, w_lin2, b_lin2)
        return out[:N, :nhid]

    # ---------------- Tiled multi-pass path (large graphs) -------------------
    cparams_1d = pltpu.CompilerParams(
        dimension_semantics=("parallel",), vmem_limit_bytes=vmem_limit)
    cparams_2d = pltpu.CompilerParams(
        dimension_semantics=("parallel", "arbitrary"), vmem_limit_bytes=vmem_limit)

    # Pass 1: h1 = x @ W_gc1 (computed once; never recomputed per A-row tile).
    h1 = pl.pallas_call(
        _feat_transform_kernel,
        out_shape=jax.ShapeDtypeStruct((n_pad, h_pad), jnp.bfloat16),
        grid=(n_pad // tile_m,),
        in_specs=[
            pl.BlockSpec((tile_m, f_pad), lambda i: (i, 0)),
            pl.BlockSpec((f_pad, h_pad), lambda i: (0, 0)),
        ],
        out_specs=pl.BlockSpec((tile_m, h_pad), lambda i: (i, 0)),
        compiler_params=cparams_1d,
    )(x_pad, w_gc1)

    grid = (n_pad // tile_m, n_pad // tile_k)

    def agg_specs(has_tail):
        specs = [
            pl.BlockSpec((tile_m, tile_k), lambda i, k: (i, k)),  # A_hat tile
            pl.BlockSpec((n_pad, h_pad), lambda i, k: (0, 0)),    # h, VMEM-resident
            pl.BlockSpec((1, h_pad), lambda i, k: (0, 0)),        # b_agg
            pl.BlockSpec((h_pad, h_pad), lambda i, k: (0, 0)),    # W_lin
            pl.BlockSpec((1, h_pad), lambda i, k: (0, 0)),        # b_lin
        ]
        if has_tail:
            specs.append(pl.BlockSpec((h_pad, h_pad), lambda i, k: (0, 0)))  # W_gc2
        return specs

    # Pass 2: gc1 aggregation + b_gc1, relu, lin_1, (dropout=id), @W_gc2.
    h2 = pl.pallas_call(
        functools.partial(_gcn_block_kernel, True),
        out_shape=jax.ShapeDtypeStruct((n_pad, h_pad), jnp.bfloat16),
        grid=grid,
        in_specs=agg_specs(True),
        out_specs=pl.BlockSpec((tile_m, h_pad), lambda i, k: (i, 0)),
        scratch_shapes=[pltpu.VMEM((tile_m, h_pad), jnp.float32)],
        compiler_params=cparams_2d,
    )(a_pad, h1, b_gc1, w_lin1, b_lin1, w_gc2)

    # Pass 3: gc2 aggregation + b_gc2, relu, lin_2.
    out = pl.pallas_call(
        functools.partial(_gcn_block_kernel, False),
        out_shape=jax.ShapeDtypeStruct((n_pad, h_pad), jnp.float32),
        grid=grid,
        in_specs=agg_specs(False),
        out_specs=pl.BlockSpec((tile_m, h_pad), lambda i, k: (i, 0)),
        scratch_shapes=[pltpu.VMEM((tile_m, h_pad), jnp.float32)],
        compiler_params=cparams_2d,
    )(a_pad, h2, b_gc2, w_lin2, b_lin2)

    return out[:N, :nhid]


# ---------------------------------------------------------------------------
# Pure-JAX reference (mirrors the kernel's bf16 matmul-operand precision)
# ---------------------------------------------------------------------------
def gin_reference(x, p, a_norm):
    def mm(a, b):  # bf16 operands, exact f32 products/accumulation
        return jnp.dot(
            a.astype(jnp.bfloat16).astype(jnp.float32),
            b.astype(jnp.bfloat16).astype(jnp.float32),
            precision=jax.lax.Precision.HIGHEST,
        )

    h = mm(x, p["w_gc1"]).astype(jnp.bfloat16).astype(jnp.float32)   # gc1 transform (bf16)
    h = jnp.maximum(mm(a_norm, h) + p["b_gc1"], 0.0)                 # gc1 agg + relu
    h = mm(h, p["w_lin1"]) + p["b_lin1"]                             # lin_1
    # dropout: identity (eval mode)
    h = mm(h, p["w_gc2"]).astype(jnp.bfloat16).astype(jnp.float32)   # gc2 transform (bf16)
    h = jnp.maximum(mm(a_norm, h) + p["b_gc2"], 0.0)                 # gc2 agg + relu
    return mm(h, p["w_lin2"]) + p["b_lin2"]                          # lin_2


if __name__ == "__main__":
    # Small deterministic problem: N=300 pads to 384 on the fused path and to 512
    # on the tiled path (2x2 grid of 256-wide tiles), so both paths are exercised.
    N, nfeat, nhid, E = 300, 48, 32, 1200

    key = jax.random.PRNGKey(0)
    kx, ke, *kp = jax.random.split(key, 10)

    x = jax.random.normal(kx, (N, nfeat), jnp.float32)
    edge_index = jax.random.randint(ke, (2, E), 0, N, dtype=jnp.int32)

    # Synthetic parameters stored as [in, out] (transpose of nn.Linear's [out, in]).
    def init_linear(kw, kb, fan_in, fan_out, scale=0.1):
        w = scale * jax.random.normal(kw, (fan_in, fan_out), jnp.float32)
        b = scale * jax.random.normal(kb, (fan_out,), jnp.float32)
        return w, b

    w_gc1, b_gc1 = init_linear(kp[0], kp[1], nfeat, nhid)
    w_lin1, b_lin1 = init_linear(kp[2], kp[3], nhid, nhid)
    w_gc2, b_gc2 = init_linear(kp[4], kp[5], nhid, nhid)
    w_lin2, b_lin2 = init_linear(kp[6], kp[7], nhid, nhid)

    params = dict(
        w_gc1=w_gc1, b_gc1=b_gc1, w_lin1=w_lin1, b_lin1=b_lin1,
        w_gc2=w_gc2, b_gc2=b_gc2, w_lin2=w_lin2, b_lin2=b_lin2,
    )

    ref = gin_reference(x, params, build_gcn_adjacency(edge_index, N))

    # Fused single-kernel path (auto-selected for small graphs).
    out_fused = jax.block_until_ready(gin_forward(x, params, edge_index, N))
    # Tiled multi-pass path (what large graphs use).
    out_tiled = jax.block_until_ready(
        gin_forward(x, params, edge_index, N, force_tiled=True))

    assert out_fused.shape == (N, nhid)
    assert out_tiled.shape == (N, nhid)
    for name, out in (("fused", out_fused), ("tiled", out_tiled)):
        max_err = float(jnp.max(jnp.abs(out - ref)))
        assert jnp.allclose(out, ref, rtol=5e-3, atol=5e-3), (
            f"{name} mismatch vs reference (max abs err {max_err})")

    print("KERNEL_OK")
</pallas_src>

<mosaic_0001>
module attributes {stable_mosaic.version = 11 : i64} {
  func.func @_gin_fused_kernel(%arg0: i32, %arg1: memref<384x384xbf16, #tpu.memory_space<vmem>>, %arg2: memref<384x128xbf16, #tpu.memory_space<vmem>>, %arg3: memref<128x128xbf16, #tpu.memory_space<vmem>>, %arg4: memref<1x128xf32, #tpu.memory_space<vmem>>, %arg5: memref<128x128xbf16, #tpu.memory_space<vmem>>, %arg6: memref<1x128xf32, #tpu.memory_space<vmem>>, %arg7: memref<128x128xbf16, #tpu.memory_space<vmem>>, %arg8: memref<1x128xf32, #tpu.memory_space<vmem>>, %arg9: memref<128x128xbf16, #tpu.memory_space<vmem>>, %arg10: memref<1x128xf32, #tpu.memory_space<vmem>>, %arg11: memref<384x128xf32, #tpu.memory_space<vmem>>) attributes {dimension_semantics = [#tpu.dimension_semantics<arbitrary>], iteration_bounds = array<i64: 1>, scalar_prefetch = 0 : i64, scratch_operands = 0 : i64, tpu.core_type = #tpu.core_type<tc>, window_params = [{pipeline_mode = #tpu.pipeline_mode<synchronous>, transform_indices = @transform_0, window_bounds = array<i64: 384, 384>}, {pipeline_mode = #tpu.pipeline_mode<synchronous>, transform_indices = @transform_1, window_bounds = array<i64: 384, 128>}, {pipeline_mode = #tpu.pipeline_mode<synchronous>, transform_indices = @transform_2, window_bounds = array<i64: 128, 128>}, {pipeline_mode = #tpu.pipeline_mode<synchronous>, transform_indices = @transform_3, window_bounds = array<i64: 1, 128>}, {pipeline_mode = #tpu.pipeline_mode<synchronous>, transform_indices = @transform_4, window_bounds = array<i64: 128, 128>}, {pipeline_mode = #tpu.pipeline_mode<synchronous>, transform_indices = @transform_5, window_bounds = array<i64: 1, 128>}, {pipeline_mode = #tpu.pipeline_mode<synchronous>, transform_indices = @transform_6, window_bounds = array<i64: 128, 128>}, {pipeline_mode = #tpu.pipeline_mode<synchronous>, transform_indices = @transform_7, window_bounds = array<i64: 1, 128>}, {pipeline_mode = #tpu.pipeline_mode<synchronous>, transform_indices = @transform_8, window_bounds = array<i64: 128, 128>}, {pipeline_mode = #tpu.pipeline_mode<synchronous>, transform_indices = @transform_9, window_bounds = array<i64: 1, 128>}, {pipeline_mode = #tpu.pipeline_mode<synchronous>, transform_indices = @transform_10, window_bounds = array<i64: 384, 128>}]} {
    %c0 = arith.constant 0 : index
    %c0_0 = arith.constant 0 : index
    %0 = vector.load %arg2[%c0, %c0_0] : memref<384x128xbf16, #tpu.memory_space<vmem>>, vector<384x128xbf16>
    %c0_1 = arith.constant 0 : index
    %c0_2 = arith.constant 0 : index
    %1 = vector.load %arg3[%c0_1, %c0_2] : memref<128x128xbf16, #tpu.memory_space<vmem>>, vector<128x128xbf16>
    %cst = arith.constant dense<0.000000e+00> : vector<384x128xf32>
    %2 = tpu.matmul %0, %1, %cst {dimension_numbers = #tpu.dot_dimension_numbers<[1], [0], [0], [1], [0, 0, 1, 1], [], []>} : vector<384x128xbf16>, vector<128x128xbf16>, vector<384x128xf32> -> vector<384x128xf32>
    %c0_3 = arith.constant 0 : index
    %c0_4 = arith.constant 0 : index
    %3 = vector.load %arg1[%c0_3, %c0_4] : memref<384x384xbf16, #tpu.memory_space<vmem>>, vector<384x384xbf16>
    %4 = arith.truncf %2 : vector<384x128xf32> to vector<384x128xbf16>
    %cst_5 = arith.constant dense<0.000000e+00> : vector<384x128xf32>
    %5 = tpu.matmul %3, %4, %cst_5 {dimension_numbers = #tpu.dot_dimension_numbers<[1], [0], [0], [1], [0, 0, 1, 1], [], []>} : vector<384x384xbf16>, vector<384x128xbf16>, vector<384x128xf32> -> vector<384x128xf32>
    %c0_6 = arith.constant 0 : index
    %c0_7 = arith.constant 0 : index
    %6 = vector.load %arg4[%c0_6, %c0_7] : memref<1x128xf32, #tpu.memory_space<vmem>>, vector<1x128xf32>
    %7 = vector.broadcast %6 : vector<1x128xf32> to vector<384x128xf32>
    %8 = arith.addf %5, %7 : vector<384x128xf32>
    %cst_8 = arith.constant 0.000000e+00 : f32
    %9 = vector.broadcast %cst_8 : f32 to vector<384x128xf32>
    %10 = arith.maximumf %8, %9 : vector<384x128xf32>
    %c0_9 = arith.constant 0 : index
    %c0_10 = arith.constant 0 : index
    %11 = vector.load %arg5[%c0_9, %c0_10] : memref<128x128xbf16, #tpu.memory_space<vmem>>, vector<128x128xbf16>
    %12 = arith.truncf %10 : vector<384x128xf32> to vector<384x128xbf16>
    %cst_11 = arith.constant dense<0.000000e+00> : vector<384x128xf32>
    %13 = tpu.matmul %12, %11, %cst_11 {dimension_numbers = #tpu.dot_dimension_numbers<[1], [0], [0], [1], [0, 0, 1, 1], [], []>} : vector<384x128xbf16>, vector<128x128xbf16>, vector<384x128xf32> -> vector<384x128xf32>
    %c0_12 = arith.constant 0 : index
    %c0_13 = arith.constant 0 : index
    %14 = vector.load %arg6[%c0_12, %c0_13] : memref<1x128xf32, #tpu.memory_space<vmem>>, vector<1x128xf32>
    %15 = vector.broadcast %14 : vector<1x128xf32> to vector<384x128xf32>
    %16 = arith.addf %13, %15 : vector<384x128xf32>
    %c0_14 = arith.constant 0 : index
    %c0_15 = arith.constant 0 : index
    %17 = vector.load %arg7[%c0_14, %c0_15] : memref<128x128xbf16, #tpu.memory_space<vmem>>, vector<128x128xbf16>
    %18 = arith.truncf %16 : vector<384x128xf32> to vector<384x128xbf16>
    %cst_16 = arith.constant dense<0.000000e+00> : vector<384x128xf32>
    %19 = tpu.matmul %18, %17, %cst_16 {dimension_numbers = #tpu.dot_dimension_numbers<[1], [0], [0], [1], [0, 0, 1, 1], [], []>} : vector<384x128xbf16>, vector<128x128xbf16>, vector<384x128xf32> -> vector<384x128xf32>
    %c0_17 = arith.constant 0 : index
    %c0_18 = arith.constant 0 : index
    %20 = vector.load %arg1[%c0_17, %c0_18] : memref<384x384xbf16, #tpu.memory_space<vmem>>, vector<384x384xbf16>
    %21 = arith.truncf %19 : vector<384x128xf32> to vector<384x128xbf16>
    %cst_19 = arith.constant dense<0.000000e+00> : vector<384x128xf32>
    %22 = tpu.matmul %20, %21, %cst_19 {dimension_numbers = #tpu.dot_dimension_numbers<[1], [0], [0], [1], [0, 0, 1, 1], [], []>} : vector<384x384xbf16>, vector<384x128xbf16>, vector<384x128xf32> -> vector<384x128xf32>
    %c0_20 = arith.constant 0 : index
    %c0_21 = arith.constant 0 : index
    %23 = vector.load %arg8[%c0_20, %c0_21] : memref<1x128xf32, #tpu.memory_space<vmem>>, vector<1x128xf32>
    %24 = vector.broadcast %23 : vector<1x128xf32> to vector<384x128xf32>
    %25 = arith.addf %22, %24 : vector<384x128xf32>
    %cst_22 = arith.constant 0.000000e+00 : f32
    %26 = vector.broadcast %cst_22 : f32 to vector<384x128xf32>
    %27 = arith.maximumf %25, %26 : vector<384x128xf32>
    %c0_23 = arith.constant 0 : index
    %c0_24 = arith.constant 0 : index
    %28 = vector.load %arg9[%c0_23, %c0_24] : memref<128x128xbf16, #tpu.memory_space<vmem>>, vector<128x128xbf16>
    %29 = arith.truncf %27 : vector<384x128xf32> to vector<384x128xbf16>
    %cst_25 = arith.constant dense<0.000000e+00> : vector<384x128xf32>
    %30 = tpu.matmul %29, %28, %cst_25 {dimension_numbers = #tpu.dot_dimension_numbers<[1], [0], [0], [1], [0, 0, 1, 1], [], []>} : vector<384x128xbf16>, vector<128x128xbf16>, vector<384x128xf32> -> vector<384x128xf32>
    %c0_26 = arith.constant 0 : index
    %c0_27 = arith.constant 0 : index
    %31 = vector.load %arg10[%c0_26, %c0_27] : memref<1x128xf32, #tpu.memory_space<vmem>>, vector<1x128xf32>
    %32 = vector.broadcast %31 : vector<1x128xf32> to vector<384x128xf32>
    %33 = arith.addf %30, %32 : vector<384x128xf32>
    %c0_28 = arith.constant 0 : index
    %c0_29 = arith.constant 0 : index
    %34 = vector.load %arg11[%c0_28, %c0_29] : memref<384x128xf32, #tpu.memory_space<vmem>>, vector<384x128xf32>
    tpu.vector_store %arg11[%c0_28, %c0_29], %33 {strides = array<i32>} : memref<384x128xf32, #tpu.memory_space<vmem>>, vector<384x128xf32>,
    return
  }
  func.func @transform_0(%arg0: i32) -> (i32, i32) {
    %c0_i32 = arith.constant 0 : i32
    %c0_i32_0 = arith.constant 0 : i32
    %c0_i32_1 = arith.constant 0 : i32
    return %c0_i32, %c0_i32_0 : i32, i32
  }
  func.func @transform_1(%arg0: i32) -> (i32, i32) {
    %c0_i32 = arith.constant 0 : i32
    %c0_i32_0 = arith.constant 0 : i32
    %c0_i32_1 = arith.constant 0 : i32
    return %c0_i32, %c0_i32_0 : i32, i32
  }
  func.func @transform_2(%arg0: i32) -> (i32, i32) {
    %c0_i32 = arith.constant 0 : i32
    %c0_i32_0 = arith.constant 0 : i32
    %c0_i32_1 = arith.constant 0 : i32
    return %c0_i32, %c0_i32_0 : i32, i32
  }
  func.func @transform_3(%arg0: i32) -> (i32, i32) {
    %c0_i32 = arith.constant 0 : i32
    %c0_i32_0 = arith.constant 0 : i32
    %c0_i32_1 = arith.constant 0 : i32
    return %c0_i32, %c0_i32_0 : i32, i32
  }
  func.func @transform_4(%arg0: i32) -> (i32, i32) {
    %c0_i32 = arith.constant 0 : i32
    %c0_i32_0 = arith.constant 0 : i32
    %c0_i32_1 = arith.constant 0 : i32
    return %c0_i32, %c0_i32_0 : i32, i32
  }
  func.func @transform_5(%arg0: i32) -> (i32, i32) {
    %c0_i32 = arith.constant 0 : i32
    %c0_i32_0 = arith.constant 0 : i32
    %c0_i32_1 = arith.constant 0 : i32
    return %c0_i32, %c0_i32_0 : i32, i32
  }
  func.func @transform_6(%arg0: i32) -> (i32, i32) {
    %c0_i32 = arith.constant 0 : i32
    %c0_i32_0 = arith.constant 0 : i32
    %c0_i32_1 = arith.constant 0 : i32
    return %c0_i32, %c0_i32_0 : i32, i32
  }
  func.func @transform_7(%arg0: i32) -> (i32, i32) {
    %c0_i32 = arith.constant 0 : i32
    %c0_i32_0 = arith.constant 0 : i32
    %c0_i32_1 = arith.constant 0 : i32
    return %c0_i32, %c0_i32_0 : i32, i32
  }
  func.func @transform_8(%arg0: i32) -> (i32, i32) {
    %c0_i32 = arith.constant 0 : i32
    %c0_i32_0 = arith.constant 0 : i32
    %c0_i32_1 = arith.constant 0 : i32
    return %c0_i32, %c0_i32_0 : i32, i32
  }
  func.func @transform_9(%arg0: i32) -> (i32, i32) {
    %c0_i32 = arith.constant 0 : i32
    %c0_i32_0 = arith.constant 0 : i32
    %c0_i32_1 = arith.constant 0 : i32
    return %c0_i32, %c0_i32_0 : i32, i32
  }
  func.func @transform_10(%arg0: i32) -> (i32, i32) {
    %c0_i32 = arith.constant 0 : i32
    %c0_i32_0 = arith.constant 0 : i32
    %c0_i32_1 = arith.constant 0 : i32
    return %c0_i32, %c0_i32_0 : i32, i32
  }
}

</mosaic_0001>

<bundles_post_ra>
// kernel: tpu_custom_call.1
= control target key start
LH: loop header
LB: loop body
LE: loop exit
PB: predicated region body
PF: predicated region fallthrough
CT: control target
= control target key end

     0   :  { %15 = vsyncpa [#allocation3], 0  ;;  %s4841_s0 = inlined_call_operand.hbm [shape: bf16[384,384], index: 0, kind: input, shape index: {}]   ;;  %s4842_s1 = inlined_call_operand.hbm [shape: bf16[384,128], index: 1, kind: input, shape index: {}]   ;;  %s4843_s2 = inlined_call_operand.hbm [shape: bf16[128,128], index: 2, kind: input, shape index: {}]   ;;  %s4844_s3 = inlined_call_operand.vmem [shape: f32[1,128], index: 3, kind: input, shape index: {}]   ;;  %s4845_s4 = inlined_call_operand.hbm [shape: bf16[128,128], index: 4, kind: input, shape index: {}]   ;;  %s4846_s5 = inlined_call_operand.vmem [shape: f32[1,128], index: 5, kind: input, shape index: {}]   ;;  %s4847_s6 = inlined_call_operand.hbm [shape: bf16[128,128], index: 6, kind: input, shape index: {}]   ;;  %s4848_s7 = inlined_call_operand.vmem [shape: f32[1,128], index: 7, kind: input, shape index: {}]   ;;  %s4849_s8 = inlined_call_operand.hbm [shape: bf16[128,128], index: 8, kind: input, shape index: {}]   ;;  %s4850_s9 = inlined_call_operand.vmem [shape: f32[1,128], index: 9, kind: input, shape index: {}]   ;;  %s4851_s10 = inlined_call_operand.hbm [shape: f32[384,128], index: 10, kind: output, shape index: {}]  }
   0x1   :  { %16 = vsyncpa [#allocation6], 0 }
   0x2   :  { %17 = vsyncpa [#allocation9], 0 }
   0x3   :  { %18 = vsyncpa [#allocation12], 0 }
   0x4   :  { %19 = vsyncpa [#allocation4], 0  ;;  %s4285_s13 = smov [#allocation5]   ;;  %s4121_s17 = scalar_lea.hbm %s4842_s1, 3072 }
   0x5   :  { %s37_s14 = sshll.u32 %s4285_s13, 4  ;;  %p4122_p0 = scmp.ne.s32.totalorder %s4842_s1, %s4121_s17  ;;  %s38_s14 = int_to_ptr.vmem [resolvable:$true] %s37_s14 }
   0x6   :  { %p4125_p1 = scmp.lt.u32.totalorder %s4121_s17, %s4842_s1 }
   0x8   :  { %p4127_p2 = pnand %p4125_p1, %p4122_p0 }
   0xa   :  { %4130 = shalt.err (!%p4127_p2)
}
   0xb   :  { %s4131_s22 = scalar_lea.vmem %s38_s14, 3072  ;;  %p4136_p4 = scmp.lt.s32.totalorder %s38_s14, %s38_s14 }
   0xc   :  { %p4132_p3 = scmp.ne.s32.totalorder %s38_s14, %s4131_s22  ;;  %p4137_p5 = scmp.lt.s32.totalorder %s4131_s22, %s4131_s22 }
   0xe   :  { %p4138_p6 = por %p4137_p5, %p4136_p4 }
  0x10   :  { %p4139_p7 = pnand %p4138_p6, %p4132_p3 }
  0x12   :  { %4142 = shalt.err (!%p4139_p7)
}
  0x13   :  { %s4286_s23 = smov 64   ;;  %s4287_s24 = smov 4  }
  0x14   :  { %43 = dma.hbm_to_vmem [thread:$0]  %s4842_s1, 3072, %s38_s14, [#allocation6], %s4286_s23, %s4286_s23, %s4287_s24  }
  0x15   :  { %s4288_s27 = smov [#allocation8]   ;;  %s4289_s29 = smov [#allocation2]  }
  0x16   :  { %s63_s28 = sshll.u32 %s4288_s27, 4  ;;  %s25_s30 = sshll.u32 %s4289_s29, 4  ;;  %s64_s28 = int_to_ptr.vmem [resolvable:$true] %s63_s28  ;;  %s26_s30 = int_to_ptr.vmem [resolvable:$true] %s25_s30 }
  0x17   :  { %s4143_s13 = scalar_lea.hbm %s4845_s4, 1024 }
  0x18   :  { %p4144_p8 = scmp.ne.s32.totalorder %s4845_s4, %s4143_s13  ;;  %p4147_p9 = scmp.lt.u32.totalorder %s4143_s13, %s4845_s4 }
  0x1a   :  { %p4149_p10 = pnand %p4147_p9, %p4144_p8 }
  0x1c   :  { %4152 = shalt.err (!%p4149_p10)
}
  0x1d   :  { %s4153_s1 = scalar_lea.vmem %s64_s28, 1024  ;;  %p4158_p12 = scmp.lt.s32.totalorder %s64_s28, %s64_s28 }
  0x1e   :  { %p4154_p11 = scmp.ne.s32.totalorder %s64_s28, %s4153_s1  ;;  %p4159_p13 = scmp.lt.s32.totalorder %s4153_s1, %s4153_s1 }
  0x20   :  { %p4160_p0 = por %p4159_p13, %p4158_p12 }
  0x22   :  { %p4161_p1 = pnand %p4160_p0, %p4154_p11 }
  0x24   :  { %4164 = shalt.err (!%p4161_p1)
}
  0x25   :  { %69 = dma.hbm_to_vmem [thread:$0]  %s4845_s4, 1024, %s64_s28, [#allocation9], %s4286_s23, %s4286_s23, %s4287_s24  }
  0x26   :  { %s4165_s22 = scalar_lea.hbm %s4841_s0, 9216 }
  0x27   :  { %p4166_p2 = scmp.ne.s32.totalorder %s4841_s0, %s4165_s22  ;;  %p4169_p3 = scmp.lt.u32.totalorder %s4165_s22, %s4841_s0 }
  0x29   :  { %p4171_p4 = pnand %p4169_p3, %p4166_p2 }
  0x2b   :  { %4174 = shalt.err (!%p4171_p4)
}
  0x2c   :  { %s4175_s11 = scalar_lea.vmem %s26_s30, 9216  ;;  %p4180_p6 = scmp.lt.s32.totalorder %s26_s30, %s26_s30 }
  0x2d   :  { %p4176_p5 = scmp.ne.s32.totalorder %s26_s30, %s4175_s11  ;;  %p4181_p7 = scmp.lt.s32.totalorder %s4175_s11, %s4175_s11 }
  0x2f   :  { %p4182_p8 = por %p4181_p7, %p4180_p6 }
  0x31   :  { %p4183_p9 = pnand %p4182_p8, %p4176_p5 }
  0x33   :  { %4186 = shalt.err (!%p4183_p9)
}
  0x34   :  { %s4290_s4 = smov 192   ;;  %s4291_s28 = smov 12  }
  0x35   :  { %31 = dma.hbm_to_vmem [thread:$0]  %s4841_s0, 9216, %s26_s30, [#allocation3], %s4290_s4, %s4290_s4, %s4291_s28  }
  0x36   :  { %s4292_s15 = smov [#allocation7]   ;;  %s4293_s17 = smov [#allocation10]  }
  0x37   :  { %s49_s16 = sshll.u32 %s4292_s15, 4  ;;  %s77_s18 = sshll.u32 %s4293_s17, 4  ;;  %s50_s16 = int_to_ptr.vmem [resolvable:$true] %s49_s16  ;;  %s78_s18 = int_to_ptr.vmem [resolvable:$true] %s77_s18 }
  0x38   :  { %s4187_s19 = scalar_lea.hbm %s4843_s2, 1024 }
  0x39   :  { %p4188_p10 = scmp.ne.s32.totalorder %s4843_s2, %s4187_s19  ;;  %p4191_p11 = scmp.lt.u32.totalorder %s4187_s19, %s4843_s2 }
  0x3b   :  { %p4193_p12 = pnand %p4191_p11, %p4188_p10 }
  0x3d   :  { %4196 = shalt.err (!%p4193_p12)
}
  0x3e   :  { %s4197_s0 = scalar_lea.vmem %s50_s16, 1024  ;;  %p4202_p0 = scmp.lt.s32.totalorder %s50_s16, %s50_s16 }
  0x3f   :  { %p4198_p13 = scmp.ne.s32.totalorder %s50_s16, %s4197_s0  ;;  %p4203_p1 = scmp.lt.s32.totalorder %s4197_s0, %s4197_s0 }
  0x41   :  { %p4204_p2 = por %p4203_p1, %p4202_p0 }
  0x43   :  { %p4205_p3 = pnand %p4204_p2, %p4198_p13 }
  0x45   :  { %4208 = shalt.err (!%p4205_p3)
}
  0x46   :  { %55 = dma.hbm_to_vmem [thread:$0]  %s4843_s2, 1024, %s50_s16, [#allocation6], %s4286_s23, %s4286_s23, %s4287_s24  }
  0x47   :  { %s4209_s11 = scalar_lea.hbm %s4847_s6, 1024 }
  0x48   :  { %p4210_p4 = scmp.ne.s32.totalorder %s4847_s6, %s4209_s11  ;;  %p4213_p5 = scmp.lt.u32.totalorder %s4209_s11, %s4847_s6 }
  0x4a   :  { %p4215_p6 = pnand %p4213_p5, %p4210_p4 }
  0x4c   :  { %4218 = shalt.err (!%p4215_p6)
}
  0x4d   :  { %s4219_s15 = scalar_lea.vmem %s78_s18, 1024  ;;  %p4224_p8 = scmp.lt.s32.totalorder %s78_s18, %s78_s18 }
  0x4e   :  { %p4220_p7 = scmp.ne.s32.totalorder %s78_s18, %s4219_s15  ;;  %p4225_p9 = scmp.lt.s32.totalorder %s4219_s15, %s4219_s15 }
  0x50   :  { %p4226_p10 = por %p4225_p9, %p4224_p8 }
  0x52   :  { %p4227_p11 = pnand %p4226_p10, %p4220_p7 }
  0x54   :  { %4230 = shalt.err (!%p4227_p11)
}
  0x55   :  { %83 = dma.hbm_to_vmem [thread:$0]  %s4847_s6, 1024, %s78_s18, [#allocation9], %s4286_s23, %s4286_s23, %s4287_s24  }
  0x56   :  { %s4294_s17 = smov [#allocation11]   ;;  %s4231_s20 = scalar_lea.hbm %s4849_s8, 1024 }
  0x57   :  { %s91_s1 = sshll.u32 %s4294_s17, 4  ;;  %p4232_p12 = scmp.ne.s32.totalorder %s4849_s8, %s4231_s20  ;;  %s92_s1 = int_to_ptr.vmem [resolvable:$true] %s91_s1 }
  0x58   :  { %p4235_p13 = scmp.lt.u32.totalorder %s4231_s20, %s4849_s8 }
  0x5a   :  { %p4237_p0 = pnand %p4235_p13, %p4232_p12 }
  0x5c   :  { %4240 = shalt.err (!%p4237_p0)
}
  0x5d   :  { %s4241_s30 = scalar_lea.vmem %s92_s1, 1024  ;;  %p4246_p2 = scmp.lt.s32.totalorder %s92_s1, %s92_s1 }
  0x5e   :  { %p4242_p1 = scmp.ne.s32.totalorder %s92_s1, %s4241_s30  ;;  %p4247_p3 = scmp.lt.s32.totalorder %s4241_s30, %s4241_s30 }
  0x60   :  { %p4248_p4 = por %p4247_p3, %p4246_p2 }
  0x62   :  { %p4249_p5 = pnand %p4248_p4, %p4242_p1 }
  0x64   :  { %4252 = shalt.err (!%p4249_p5)
}
  0x65   :  { %97 = dma.hbm_to_vmem [thread:$0]  %s4849_s8, 1024, %s92_s1, [#allocation12], %s4286_s23, %s4286_s23, %s4287_s24  }
  0x66   :  { %4275 = dma.done.wait [#allocation3], 9216  }
  0x67   :  { %4276 = vsyncadd [#allocation3], 4294958080 }
  0x68   :  { %4277 = dma.done.wait [#allocation6], 4096  }
  0x69   :  { %4278 = vsyncadd [#allocation6], 4294963200 }
  0x6a   :  { %4279 = dma.done.wait [#allocation9], 2048  }
  0x6b   :  { %4280 = vsyncadd [#allocation9], 4294965248 }
  0x6c   :  { %4281 = dma.done.wait [#allocation12], 1024  }
  0x6d   :  { %4282 = vsyncadd [#allocation12], 4294966272  ;;  %v3897_v0 = vld [vmem:[#allocation7] sm:$0xff]   ;;  %v3898_v1 = vld [vmem:[#allocation7 + $0x8] sm:$0xff]   ;;  %v4295_v32 = vmov 0  }
  0x6e   :  { %3483 = vmatprep.subr.bf16.mxu0 %v3897_v0  ;;  %v3899_v2 = vld [vmem:[#allocation7 + $0x10] sm:$0xff]   ;;  %v3900_v3 = vld [vmem:[#allocation7 + $0x18] sm:$0xff]   ;;  %v3905_v4 = vld [vmem:[#allocation5] sm:$0xff]   ;;  %1111 = vmatprep.subr.bf16.mxu1 %v4295_v32 }
  0x6f   :  { %3484 = vmatpush3.bf16.msra.mxu0 %v3897_v0  ;;  %3499 = vmatprep.mubr.bf16.mxu0 %v3905_v4  ;;  %v3901_v5 = vld [vmem:[#allocation7 + $0x20] sm:$0xff]   ;;  %v3902_v6 = vld [vmem:[#allocation7 + $0x28] sm:$0xff]   ;;  %v3903_v7 = vld [vmem:[#allocation7 + $0x30] sm:$0xff]  }
  0x70   :  { %3485 = vmatprep.subr.bf16.mxu0 %v3898_v1  ;;  %v3904_v8 = vld [vmem:[#allocation7 + $0x38] sm:$0xff]   ;;  %v3906_v9 = vld [vmem:[#allocation5 + $0x8] sm:$0xff]   ;;  %v3907_v10 = vld [vmem:[#allocation5 + $0x10] sm:$0xff]  }
  0x71   :  { %v3908_v11 = vld [vmem:[#allocation5 + $0x18] sm:$0xff]   ;;  %v3909_v12 = vld [vmem:[#allocation5 + $0x20] sm:$0xff]   ;;  %v3910_v13 = vld [vmem:[#allocation5 + $0x28] sm:$0xff]  }
  0x72   :  { %v3911_v14 = vld [vmem:[#allocation5 + $0x30] sm:$0xff]   ;;  %v3912_v15 = vld [vmem:[#allocation5 + $0x38] sm:$0xff]   ;;  %v3913_v16 = vld [vmem:[#allocation5 + $0x40] sm:$0xff]  }
  0x73   :  { %3486 = vmatpush3.bf16.msra.mxu0 %v3898_v1  ;;  %v3914_v17 = vld [vmem:[#allocation5 + $0x48] sm:$0xff]   ;;  %v3915_v18 = vld [vmem:[#allocation5 + $0x50] sm:$0xff]   ;;  %v3916_v19 = vld [vmem:[#allocation5 + $0x58] sm:$0xff]  }
  0x74   :  { %3487 = vmatprep.subr.bf16.mxu0 %v3899_v2  ;;  %v3917_v20 = vld [vmem:[#allocation5 + $0x60] sm:$0xff]   ;;  %v3918_v21 = vld [vmem:[#allocation5 + $0x68] sm:$0xff]   ;;  %v3919_v22 = vld [vmem:[#allocation5 + $0x70] sm:$0xff]  }
  0x75   :  { %v3920_v23 = vld [vmem:[#allocation5 + $0x78] sm:$0xff]   ;;  %v3921_v24 = vld [vmem:[#allocation5 + $0x80] sm:$0xff]   ;;  %v3922_v25 = vld [vmem:[#allocation5 + $0x88] sm:$0xff]  }
  0x76   :  { %v3923_v26 = vld [vmem:[#allocation5 + $0x90] sm:$0xff]   ;;  %v3924_v27 = vld [vmem:[#allocation5 + $0x98] sm:$0xff]   ;;  %v3925_v28 = vld [vmem:[#allocation5 + $0xa0] sm:$0xff]  }
  0x77   :  { %3488 = vmatpush3.bf16.msra.mxu0 %v3899_v2  ;;  %v3926_v29 = vld [vmem:[#allocation5 + $0xa8] sm:$0xff]   ;;  %v3927_v30 = vld [vmem:[#allocation5 + $0xb0] sm:$0xff]   ;;  %v3928_v31 = vld [vmem:[#allocation5 + $0xb8] sm:$0xff]  }
  0x78   :  { %3489 = vmatprep.subr.bf16.mxu0 %v3900_v3  ;;  %v3931_v33 = vld [vmem:[#allocation2 + $0x4] ss:$12 sps:$4 sm:$0xff]   ;;  %v3944_v34 = vld [vmem:[#allocation2 + $0x8] ss:$12 sps:$4 sm:$0xff]  }
  0x79   :  { %1143 = vmatprep.mubr.bf16.mxu1 %v3931_v33 }
  0x7b   :  { %3490 = vmatpush3.bf16.msra.mxu0 %v3900_v3 }
  0x7c   :  { %3491 = vmatprep.subr.bf16.mxu0 %v3901_v5 }
  0x7f   :  { %3492 = vmatpush3.bf16.msra.mxu0 %v3901_v5 }
  0x80   :  { %3493 = vmatprep.subr.bf16.mxu0 %v3902_v6 }
  0x83   :  { %3494 = vmatpush3.bf16.msra.mxu0 %v3902_v6 }
  0x84   :  { %3495 = vmatprep.subr.bf16.mxu0 %v3903_v7 }
  0x87   :  { %3496 = vmatpush3.bf16.msra.mxu0 %v3903_v7 }
  0x88   :  { %3497 = vmatprep.subr.bf16.mxu0 %v3904_v8 }
  0x8b   :  { %3498 = vmatpush3.bf16.msra.mxu0 %v3904_v8 }
  0x8e   :  { %3500 = vmatmul.mubr.bf16.vlgmr.msra.gmra.mrb[0].mxu0 %v3906_v9 }
  0x8f   :  { %3503 = vmatprep.mubr.bf16.mxu0 %v3907_v10 }
  0x96   :  { %3504 = vmatmul.mubr.bf16.gmra.mrb[4].mxu0 %v3908_v11 }
  0x97   :  { %3507 = vmatprep.mubr.bf16.mxu0 %v3909_v12 }
  0x9e   :  { %3508 = vmatmul.mubr.bf16.gmra.mrb[8].mxu0 %v3910_v13 }
  0x9f   :  { %3511 = vmatprep.mubr.bf16.mxu0 %v3911_v14 }
  0xa6   :  { %3512 = vmatmul.mubr.bf16.gmra.mrb[12].mxu0 %v3912_v15 }
  0xa7   :  { %3515 = vmatprep.mubr.bf16.mxu0 %v3913_v16 }
  0xae   :  { %3516 = vmatmul.mubr.bf16.gmra.mrb[16].mxu0 %v3914_v17 }
  0xaf   :  { %3519 = vmatprep.mubr.bf16.mxu0 %v3915_v18 }
  0xb6   :  { %3520 = vmatmul.mubr.bf16.gmra.mrb[20].mxu0 %v3916_v19 }
  0xb7   :  { %3523 = vmatprep.mubr.bf16.mxu0 %v3917_v20 }
  0xbe   :  { %3524 = vmatmul.mubr.bf16.gmra.mrb[24].mxu0 %v3918_v21  ;;  %v3929_v21 = vld [vmem:[#allocation2] ss:$12 sps:$4 sm:$0xff]  }
  0xbf   :  { %3527 = vmatprep.mubr.bf16.mxu0 %v3919_v22 }
  0xc6   :  { %3528 = vmatmul.mubr.bf16.gmra.mrb[28].mxu0 %v3920_v23  ;;  %v3932_v23 = vld [vmem:[#allocation2 + $0x1c] ss:$12 sps:$4 sm:$0xff]  }
  0xc7   :  { %3531 = vmatprep.mubr.bf16.mxu0 %v3921_v24 }
  0xce   :  { %3532 = vmatmul.mubr.bf16.gmra.mrb[32].mxu0 %v3922_v25 }
  0xcf   :  { %3535 = vmatprep.mubr.bf16.mxu0 %v3923_v26 }
  0xd6   :  { %3536 = vmatmul.mubr.bf16.gmra.mrb[36].mxu0 %v3924_v27 }
  0xd7   :  { %3539 = vmatprep.mubr.bf16.mxu0 %v3925_v28 }
  0xde   :  { %3540 = vmatmul.mubr.bf16.gmra.mrb[40].mxu0 %v3926_v29  ;;  %v3934_v29 = vld [vmem:[#allocation2 + $0x18] ss:$12 sps:$4 sm:$0xff]  }
  0xdf   :  { %3543 = vmatprep.mubr.bf16.mxu0 %v3927_v30 }
  0xe6   :  { %3544 = vmatmul.mubr.bf16.gmra.mrb[44].mxu0 %v3928_v31  ;;  %v3935_v31 = vld [vmem:[#allocation2 + $0x34] ss:$12 sps:$4 sm:$0xff]  }
  0xe7   :  { %3563 = vmatprep.mubr.bf16.mxu0 %v3944_v34 }
 0x161   :  { %v3501_v35 = vpop.f32.mrb[0].mxu0 }
 0x162   :  { %v409_v36 = vpop.f32.mrb[1].mxu0 }
 0x163   :  { %v3502_v37 = vpop.f32.mrb[2].mxu0 }
 0x164   :  { %v697_v38 = vpack.c.bf16 %v3502_v37, %v3501_v35  ;;  %v412_v39 = vpop.f32.mrb[3].mxu0 }
 0x165   :  { %v696_v40 = vpack.c.bf16 %v412_v39, %v409_v36 }
 0x167   :  { %1112 = vmatpush1.bf16.msra.mxu1 %v696_v40  ;;  %v3938_v40 = vld [vmem:[#allocation2 + $0x4c] ss:$12 sps:$4 sm:$0xff]  }
 0x168   :  { %1113 = vmatprep.subr.bf16.mxu1 %v4295_v32 }
 0x169   :  { %v3505_v41 = vpop.f32.mrb[4].mxu0 }
 0x16a   :  { %v425_v42 = vpop.f32.mrb[5].mxu0 }
 0x16b   :  { %v3506_v43 = vpop.f32.mrb[6].mxu0  ;;  %1114 = vmatpush1.bf16.msra.mxu1 %v697_v38  ;;  %v3937_v38 = vld [vmem:[#allocation2 + $0x30] ss:$12 sps:$4 sm:$0xff]  }
 0x16c   :  { %v699_v44 = vpack.c.bf16 %v3506_v43, %v3505_v41  ;;  %v428_v45 = vpop.f32.mrb[7].mxu0  ;;  %1115 = vmatprep.subr.bf16.mxu1 %v4295_v32 }
 0x16d   :  { %v698_v46 = vpack.c.bf16 %v428_v45, %v425_v42 }
 0x16f   :  { %1116 = vmatpush1.bf16.msra.mxu1 %v698_v46  ;;  %v3940_v46 = vld [vmem:[#allocation2 + $0x48] ss:$12 sps:$4 sm:$0xff]  }
 0x170   :  { %1117 = vmatprep.subr.bf16.mxu1 %v4295_v32 }
 0x171   :  { %v3509_v47 = vpop.f32.mrb[8].mxu0 }
 0x172   :  { %v441_v48 = vpop.f32.mrb[9].mxu0 }
 0x173   :  { %v3510_v49 = vpop.f32.mrb[10].mxu0  ;;  %1118 = vmatpush1.bf16.msra.mxu1 %v699_v44 }
 0x174   :  { %v701_v50 = vpack.c.bf16 %v3510_v49, %v3509_v47  ;;  %v444_v51 = vpop.f32.mrb[11].mxu0  ;;  %1119 = vmatprep.subr.bf16.mxu1 %v4295_v32 }
 0x175   :  { %v700_v52 = vpack.c.bf16 %v444_v51, %v441_v48  ;;  %v3941_v48 = vld [vmem:[#allocation2 + $0x64] ss:$12 sps:$4 sm:$0xff]  }
 0x177   :  { %1120 = vmatpush1.bf16.msra.mxu1 %v700_v52  ;;  %v3943_v52 = vld [vmem:[#allocation2 + $0x60] ss:$12 sps:$4 sm:$0xff]  }
 0x178   :  { %1121 = vmatprep.subr.bf16.mxu1 %v4295_v32 }
 0x179   :  { %v3513_v53 = vpop.f32.mrb[12].mxu0 }
 0x17a   :  { %v457_v54 = vpop.f32.mrb[13].mxu0 }
 0x17b   :  { %v3514_v55 = vpop.f32.mrb[14].mxu0  ;;  %1122 = vmatpush1.bf16.msra.mxu1 %v701_v50 }
 0x17c   :  { %v703_v56 = vpack.c.bf16 %v3514_v55, %v3513_v53  ;;  %v460_v57 = vpop.f32.mrb[15].mxu0  ;;  %1123 = vmatprep.subr.bf16.mxu1 %v4295_v32  ;;  %v3945_v53 = vld [vmem:[#allocation2 + $0x20] ss:$12 sps:$4 sm:$0xff]   ;;  %v3949_v55 = vld [vmem:[#allocation2 + $0x38] ss:$12 sps:$4 sm:$0xff]  }
 0x17d   :  { %v702_v58 = vpack.c.bf16 %v460_v57, %v457_v54  ;;  %v3946_v54 = vld [vmem:[#allocation2 + $0x7c] ss:$12 sps:$4 sm:$0xff]  }
 0x17e   :  { %v3950_v57 = vld [vmem:[#allocation2 + $0x50] ss:$12 sps:$4 sm:$0xff]  }
 0x17f   :  { %1124 = vmatpush1.bf16.msra.mxu1 %v702_v58  ;;  %v3951_v58 = vld [vmem:[#allocation2 + $0x94] ss:$12 sps:$4 sm:$0xff]  }
 0x180   :  { %1125 = vmatprep.subr.bf16.mxu1 %v4295_v32 }
 0x181   :  { %v3517_v59 = vpop.f32.mrb[16].mxu0 }
 0x182   :  { %v473_v60 = vpop.f32.mrb[17].mxu0 }
 0x183   :  { %v3518_v61 = vpop.f32.mrb[18].mxu0  ;;  %1126 = vmatpush1.bf16.msra.mxu1 %v703_v56  ;;  %v3948_v56 = vld [vmem:[#allocation2 + $0x78] ss:$12 sps:$4 sm:$0xff]  }
 0x184   :  { %v705_v62 = vpack.c.bf16 %v3518_v61, %v3517_v59  ;;  %v476_v63 = vpop.f32.mrb[19].mxu0  ;;  %1127 = vmatprep.subr.bf16.mxu1 %v4295_v32  ;;  %v3954_v59 = vld [vmem:[#allocation2 + $0x68] ss:$12 sps:$4 sm:$0xff]   ;;  %v3955_v61 = vld [vmem:[#allocation2 + $0x80] ss:$12 sps:$4 sm:$0xff]  }
 0x185   :  { %v704_v0 = vpack.c.bf16 %v476_v63, %v473_v60  ;;  %v3953_v60 = vld [vmem:[#allocation2 + $0x90] ss:$12 sps:$4 sm:$0xff]   ;;  %v3962_v63 = vld [vmem:[#allocation2 + $0x98] ss:$12 sps:$4 sm:$0xff]  }
 0x187   :  { %1128 = vmatpush1.bf16.msra.mxu1 %v704_v0  ;;  %v3958_v0 = vld [vmem:[#allocation2 + $0xa8] ss:$12 sps:$4 sm:$0xff]  }
 0x188   :  { %1129 = vmatprep.subr.bf16.mxu1 %v4295_v32 }
 0x189   :  { %v3521_v1 = vpop.f32.mrb[20].mxu0 }
 0x18a   :  { %v489_v2 = vpop.f32.mrb[21].mxu0 }
 0x18b   :  { %v3522_v3 = vpop.f32.mrb[22].mxu0  ;;  %1130 = vmatpush1.bf16.msra.mxu1 %v705_v62  ;;  %v3956_v62 = vld [vmem:[#allocation2 + $0xac] ss:$12 sps:$4 sm:$0xff]  }
 0x18c   :  { %v707_v4 = vpack.c.bf16 %v3522_v3, %v3521_v1  ;;  %v492_v5 = vpop.f32.mrb[23].mxu0  ;;  %1131 = vmatprep.subr.bf16.mxu1 %v4295_v32  ;;  %v3959_v1 = vld [vmem:[#allocation2 + $0xc4] ss:$12 sps:$4 sm:$0xff]   ;;  %v3970_v3 = vld [vmem:[#allocation2 + $0xc8] ss:$12 sps:$4 sm:$0xff]  }
 0x18d   :  { %v706_v6 = vpack.c.bf16 %v492_v5, %v489_v2  ;;  %v3963_v2 = vld [vmem:[#allocation2 + $0xb0] ss:$12 sps:$4 sm:$0xff]   ;;  %v4026_v5 = vld [vmem:[#allocation8 + $0x8] sm:$0xff]  }
 0x18f   :  { %1132 = vmatpush1.bf16.msra.mxu1 %v706_v6  ;;  %v3961_v6 = vld [vmem:[#allocation2 + $0xc0] ss:$12 sps:$4 sm:$0xff]  }
 0x190   :  { %1133 = vmatprep.subr.bf16.mxu1 %v4295_v32 }
 0x191   :  { %v3525_v7 = vpop.f32.mrb[24].mxu0 }
 0x192   :  { %v505_v8 = vpop.f32.mrb[25].mxu0 }
 0x193   :  { %v3526_v9 = vpop.f32.mrb[26].mxu0  ;;  %1134 = vmatpush1.bf16.msra.mxu1 %v707_v4  ;;  %v4025_v4 = vld [vmem:[#allocation8] sm:$0xff]  }
 0x194   :  { %v709_v10 = vpack.c.bf16 %v3526_v9, %v3525_v7  ;;  %v508_v11 = vpop.f32.mrb[27].mxu0  ;;  %1135 = vmatprep.subr.bf16.mxu1 %v4295_v32  ;;  %v4027_v7 = vld [vmem:[#allocation8 + $0x10] sm:$0xff]   ;;  %v3971_v9 = vld [vmem:[#allocation2 + $0xe0] ss:$12 sps:$4 sm:$0xff]  }
 0x195   :  { %v708_v12 = vpack.c.bf16 %v508_v11, %v505_v8  ;;  %v3964_v8 = vld [vmem:[#allocation2 + $0xdc] ss:$12 sps:$4 sm:$0xff]   ;;  %v3966_v11 = vld [vmem:[#allocation2 + $0xd8] ss:$12 sps:$4 sm:$0xff]  }
 0x197   :  { %1136 = vmatpush1.bf16.msra.mxu1 %v708_v12  ;;  %v3967_v12 = vld [vmem:[#allocation2 + $0xf4] ss:$12 sps:$4 sm:$0xff]  }
 0x198   :  { %1137 = vmatprep.subr.bf16.mxu1 %v4295_v32 }
 0x199   :  { %v3529_v13 = vpop.f32.mrb[28].mxu0 }
 0x19a   :  { %v521_v14 = vpop.f32.mrb[29].mxu0 }
 0x19b   :  { %v3530_v15 = vpop.f32.mrb[30].mxu0  ;;  %1138 = vmatpush1.bf16.msra.mxu1 %v709_v10  ;;  %v3978_v10 = vld [vmem:[#allocation2 + $0xf8] ss:$12 sps:$4 sm:$0xff]  }
 0x19c   :  { %v711_v16 = vpack.c.bf16 %v3530_v15, %v3529_v13  ;;  %v524_v17 = vpop.f32.mrb[31].mxu0  ;;  %1139 = vmatprep.subr.bf16.mxu1 %v4295_v32  ;;  %v3979_v13 = vld [vmem:[#allocation2 + $0x110] ss:$12 sps:$4 sm:$0xff]  }
 0x19d   :  { %v710_v18 = vpack.c.bf16 %v524_v17, %v521_v14  ;;  %v3985_v14 = vld [vmem:[#allocation2 + $0x128] ss:$12 sps:$4 sm:$0xff]   ;;  %v3969_v15 = vld [vmem:[#allocation2 + $0xf0] ss:$12 sps:$4 sm:$0xff]   ;;  %v3987_v17 = vld [vmem:[#allocation2 + $0x140] ss:$12 sps:$4 sm:$0xff]  }
 0x19f   :  { %1140 = vmatpush1.bf16.msra.mxu1 %v710_v18  ;;  %v3990_v18 = vld [vmem:[#allocation2 + $0x158] ss:$12 sps:$4 sm:$0xff]  }
 0x1a0   :  { %1141 = vmatprep.subr.bf16.mxu1 %v4295_v32 }
 0x1a1   :  { %v3533_v19 = vpop.f32.mrb[32].mxu0 }
 0x1a2   :  { %v537_v20 = vpop.f32.mrb[33].mxu0 }
 0x1a3   :  { %v3534_v22 = vpop.f32.mrb[34].mxu0  ;;  %1142 = vmatpush1.bf16.msra.mxu1 %v711_v16  ;;  %v3972_v16 = vld [vmem:[#allocation2 + $0x10c] ss:$12 sps:$4 sm:$0xff]  }
 0x1a4   :  { %v713_v24 = vpack.c.bf16 %v3534_v22, %v3533_v19  ;;  %v540_v25 = vpop.f32.mrb[35].mxu0  ;;  %v3974_v19 = vld [vmem:[#allocation2 + $0x108] ss:$12 sps:$4 sm:$0xff]  }
 0x1a5   :  { %v712_v26 = vpack.c.bf16 %v540_v25, %v537_v20  ;;  %v3975_v20 = vld [vmem:[#allocation2 + $0x124] ss:$12 sps:$4 sm:$0xff]   ;;  %v4001_v22 = vld [vmem:[#allocation2 + $0x188] ss:$12 sps:$4 sm:$0xff]   ;;  %v3977_v25 = vld [vmem:[#allocation2 + $0x120] ss:$12 sps:$4 sm:$0xff]  }
 0x1a6   :  { %1144 = vmatmul.mubr.bf16.vlgmr.msra.gmra.mrb[0].mxu1 %v3929_v21  ;;  %v3992_v21 = vld [vmem:[#allocation2 + $0x170] ss:$12 sps:$4 sm:$0xff]  }
 0x1a7   :  { %3547 = vmatprep.subr.bf16.mxu0 %v712_v26  ;;  %1151 = vmatprep.mubr.bf16.mxu1 %v3932_v23  ;;  %v4028_v23 = vld [vmem:[#allocation8 + $0x18] sm:$0xff]  }
 0x1a8   :  { %3548 = vmatpush3.bf16.msra.mxu0 %v712_v26  ;;  %v3980_v26 = vld [vmem:[#allocation2 + $0x13c] ss:$12 sps:$4 sm:$0xff]  }
 0x1a9   :  { %v3537_v27 = vpop.f32.mrb[36].mxu0  ;;  %3549 = vmatprep.subr.bf16.mxu0 %v713_v24 }
 0x1aa   :  { %v553_v28 = vpop.f32.mrb[37].mxu0 }
 0x1ab   :  { %v3538_v30 = vpop.f32.mrb[38].mxu0 }
 0x1ac   :  { %v715_v33 = vpack.c.bf16 %v3538_v30, %v3537_v27  ;;  %v556_v34 = vpop.f32.mrb[39].mxu0  ;;  %3550 = vmatpush3.bf16.msra.mxu0 %v713_v24  ;;  %v4029_v24 = vld [vmem:[#allocation8 + $0x20] sm:$0xff]  }
 0x1ad   :  { %v714_v35 = vpack.c.bf16 %v556_v34, %v553_v28  ;;  %v4003_v27 = vld [vmem:[#allocation2 + $0x1a0] ss:$12 sps:$4 sm:$0xff]   ;;  %v4012_v28 = vld [vmem:[#allocation2 + $0x1b8] ss:$12 sps:$4 sm:$0xff]   ;;  %v4017_v34 = vld [vmem:[#allocation2 + $0x1e8] ss:$12 sps:$4 sm:$0xff]  }
 0x1ae   :  { %1152 = vmatmul.mubr.bf16.gmra.mrb[4].mxu1 %v3934_v29  ;;  %v4030_v29 = vld [vmem:[#allocation8 + $0x28] sm:$0xff]   ;;  %v3982_v30 = vld [vmem:[#allocation2 + $0x138] ss:$12 sps:$4 sm:$0xff]  }
 0x1af   :  { %3551 = vmatprep.subr.bf16.mxu0 %v714_v35  ;;  %1159 = vmatprep.mubr.bf16.mxu1 %v3935_v31  ;;  %v3983_v31 = vld [vmem:[#allocation2 + $0x154] ss:$12 sps:$4 sm:$0xff]  }
 0x1b0   :  { %3552 = vmatpush3.bf16.msra.mxu0 %v714_v35  ;;  %v3986_v35 = vld [vmem:[#allocation2 + $0x150] ss:$12 sps:$4 sm:$0xff]  }
 0x1b1   :  { %v3541_v36 = vpop.f32.mrb[40].mxu0  ;;  %3553 = vmatprep.subr.bf16.mxu0 %v715_v33 }
 0x1b2   :  { %v569_v37 = vpop.f32.mrb[41].mxu0 }
 0x1b3   :  { %v3542_v39 = vpop.f32.mrb[42].mxu0 }
 0x1b4   :  { %v717_v41 = vpack.c.bf16 %v3542_v39, %v3541_v36  ;;  %v572_v42 = vpop.f32.mrb[43].mxu0  ;;  %3554 = vmatpush3.bf16.msra.mxu0 %v715_v33  ;;  %v4014_v33 = vld [vmem:[#allocation2 + $0x1d0] ss:$12 sps:$4 sm:$0xff]   ;;  %v3988_v36 = vld [vmem:[#allocation2 + $0x16c] ss:$12 sps:$4 sm:$0xff]  }
 0x1b5   :  { %v716_v43 = vpack.c.bf16 %v572_v42, %v569_v37  ;;  %v4019_v37 = vld [vmem:[#allocation2 + $0x200] ss:$12 sps:$4 sm:$0xff]   ;;  %v3991_v39 = vld [vmem:[#allocation2 + $0x168] ss:$12 sps:$4 sm:$0xff]  }
 0x1b6   :  { %1160 = vmatmul.mubr.bf16.gmra.mrb[8].mxu1 %v3937_v38  ;;  %v4022_v38 = vld [vmem:[#allocation2 + $0x218] ss:$12 sps:$4 sm:$0xff]   ;;  %v4031_v42 = vld [vmem:[#allocation8 + $0x30] sm:$0xff]  }
 0x1b7   :  { %3555 = vmatprep.subr.bf16.mxu0 %v716_v43  ;;  %1167 = vmatprep.mubr.bf16.mxu1 %v3938_v40  ;;  %v3993_v40 = vld [vmem:[#allocation2 + $0x184] ss:$12 sps:$4 sm:$0xff]  }
 0x1b8   :  { %3556 = vmatpush3.bf16.msra.mxu0 %v716_v43  ;;  %v4032_v43 = vld [vmem:[#allocation8 + $0x38] sm:$0xff]  }
 0x1b9   :  { %v3545_v44 = vpop.f32.mrb[44].mxu0  ;;  %3557 = vmatprep.subr.bf16.mxu0 %v717_v41 }
 0x1ba   :  { %v585_v45 = vpop.f32.mrb[45].mxu0 }
 0x1bb   :  { %v3546_v47 = vpop.f32.mrb[46].mxu0 }
 0x1bc   :  { %v719_v49 = vpack.c.bf16 %v3546_v47, %v3545_v44  ;;  %v588_v50 = vpop.f32.mrb[47].mxu0  ;;  %3558 = vmatpush3.bf16.msra.mxu0 %v717_v41  ;;  %v4024_v41 = vld [vmem:[#allocation2 + $0x230] ss:$12 sps:$4 sm:$0xff]   ;;  %v3995_v44 = vld [vmem:[#allocation2 + $0x180] ss:$12 sps:$4 sm:$0xff]  }
 0x1bd   :  { %v718_v51 = vpack.c.bf16 %v588_v50, %v585_v45  ;;  %v3996_v45 = vld [vmem:[#allocation2 + $0x19c] ss:$12 sps:$4 sm:$0xff]   ;;  %v3999_v47 = vld [vmem:[#allocation2 + $0x1b4] ss:$12 sps:$4 sm:$0xff]  }
 0x1be   :  { %1168 = vmatmul.mubr.bf16.gmra.mrb[12].mxu1 %v3940_v46  ;;  %v3998_v46 = vld [vmem:[#allocation2 + $0x198] ss:$12 sps:$4 sm:$0xff]   ;;  %v4006_v50 = vld [vmem:[#allocation2 + $0x1c8] ss:$12 sps:$4 sm:$0xff]  }
 0x1bf   :  { %3559 = vmatprep.subr.bf16.mxu0 %v718_v51  ;;  %1175 = vmatprep.mubr.bf16.mxu1 %v3941_v48  ;;  %v4002_v48 = vld [vmem:[#allocation2 + $0x1b0] ss:$12 sps:$4 sm:$0xff]  }
 0x1c0   :  { %3560 = vmatpush3.bf16.msra.mxu0 %v718_v51  ;;  %v4007_v51 = vld [vmem:[#allocation2 + $0x1e4] ss:$12 sps:$4 sm:$0xff]  }
 0x1c1   :  { %3561 = vmatprep.subr.bf16.mxu0 %v719_v49 }
 0x1c4   :  { %3562 = vmatpush3.bf16.msra.mxu0 %v719_v49  ;;  %v4004_v49 = vld [vmem:[#allocation2 + $0x1cc] ss:$12 sps:$4 sm:$0xff]  }
 0x1c5   :  { %3611 = vmatprep.subr.bf16.mxu0 %v4025_v4 }
 0x1c6   :  { %1176 = vmatmul.mubr.bf16.gmra.mrb[16].mxu1 %v3943_v52  ;;  %v4009_v52 = vld [vmem:[#allocation2 + $0x1e0] ss:$12 sps:$4 sm:$0xff]  }
 0x1c7   :  { %3564 = vmatmul.mubr.bf16.vlgmr.msra.gmra.mrb[48].mxu0 %v3945_v53  ;;  %1183 = vmatprep.mubr.bf16.mxu1 %v3946_v54  ;;  %v4010_v53 = vld [vmem:[#allocation2 + $0x1fc] ss:$12 sps:$4 sm:$0xff]   ;;  %v4013_v54 = vld [vmem:[#allocation2 + $0x1f8] ss:$12 sps:$4 sm:$0xff]  }
 0x1c8   :  { %3567 = vmatprep.mubr.bf16.mxu0 %v3949_v55  ;;  %3612 = vmatpush3.bf16.msra.mxu0 %v4025_v4  ;;  %v4015_v55 = vld [vmem:[#allocation2 + $0x214] ss:$12 sps:$4 sm:$0xff]  }
 0x1c9   :  { %3613 = vmatprep.subr.bf16.mxu0 %v4026_v5 }
 0x1cc   :  { %3614 = vmatpush3.bf16.msra.mxu0 %v4026_v5 }
 0x1cd   :  { %3615 = vmatprep.subr.bf16.mxu0 %v4027_v7 }
 0x1ce   :  { %1184 = vmatmul.mubr.bf16.gmra.mrb[20].mxu1 %v3948_v56  ;;  %v4018_v56 = vld [vmem:[#allocation2 + $0x210] ss:$12 sps:$4 sm:$0xff]  }
 0x1cf   :  { %3568 = vmatmul.mubr.bf16.gmra.mrb[52].mxu0 %v3950_v57  ;;  %1191 = vmatprep.mubr.bf16.mxu1 %v3951_v58  ;;  %v4020_v57 = vld [vmem:[#allocation2 + $0x22c] ss:$12 sps:$4 sm:$0xff]   ;;  %v4023_v58 = vld [vmem:[#allocation2 + $0x228] ss:$12 sps:$4 sm:$0xff]  }
 0x1d0   :  { %3571 = vmatprep.mubr.bf16.mxu0 %v3954_v59  ;;  %3616 = vmatpush3.bf16.msra.mxu0 %v4027_v7 }
 0x1d1   :  { %3617 = vmatprep.subr.bf16.mxu0 %v4028_v23 }
 0x1d4   :  { %3618 = vmatpush3.bf16.msra.mxu0 %v4028_v23 }
 0x1d5   :  { %3619 = vmatprep.subr.bf16.mxu0 %v4029_v24 }
 0x1d6   :  { %1192 = vmatmul.mubr.bf16.gmra.mrb[24].mxu1 %v3953_v60 }
 0x1d7   :  { %3572 = vmatmul.mubr.bf16.gmra.mrb[56].mxu0 %v3955_v61  ;;  %1199 = vmatprep.mubr.bf16.mxu1 %v3956_v62 }
 0x1d8   :  { %3575 = vmatprep.mubr.bf16.mxu0 %v3962_v63  ;;  %3620 = vmatpush3.bf16.msra.mxu0 %v4029_v24  ;;  %v4033_v63 = vld [vmem:[#allocation10] sm:$0xff]  }
 0x1d9   :  { %3621 = vmatprep.subr.bf16.mxu0 %v4030_v29  ;;  %3675 = vmatprep.subr.bf16.mxu1 %v4033_v63 }
 0x1da   :  { %3676 = vmatpush3.bf16.msra.mxu1 %v4033_v63 }
 0x1dc   :  { %3622 = vmatpush3.bf16.msra.mxu0 %v4030_v29 }
 0x1dd   :  { %3623 = vmatprep.subr.bf16.mxu0 %v4031_v42 }
 0x1de   :  { %1200 = vmatmul.mubr.bf16.gmra.mrb[28].mxu1 %v3958_v0 }
 0x1df   :  { %1207 = vmatprep.mubr.bf16.mxu1 %v3959_v1  ;;  %3576 = vmatmul.mubr.bf16.gmra.mrb[60].mxu0 %v3963_v2 }
 0x1e0   :  { %3579 = vmatprep.mubr.bf16.mxu0 %v3970_v3  ;;  %3624 = vmatpush3.bf16.msra.mxu0 %v4031_v42 }
 0x1e1   :  { %3625 = vmatprep.subr.bf16.mxu0 %v4032_v43 }
 0x1e4   :  { %3626 = vmatpush3.bf16.msra.mxu0 %v4032_v43 }
 0x1e5   :  { %2273 = vmatprep.subr.bf16.mxu0 %v4295_v32 }
 0x1e6   :  { %1208 = vmatmul.mubr.bf16.gmra.mrb[32].mxu1 %v3961_v6 }
 0x1e7   :  { %1215 = vmatprep.mubr.bf16.mxu1 %v3964_v8  ;;  %3580 = vmatmul.mubr.bf16.gmra.mrb[64].mxu0 %v3971_v9  ;;  %v4034_v8 = vld [vmem:[#allocation10 + $0x8] sm:$0xff]  }
 0x1e8   :  { %3583 = vmatprep.mubr.bf16.mxu0 %v3978_v10  ;;  %3677 = vmatprep.subr.bf16.mxu1 %v4034_v8 }
 0x1e9   :  { %3678 = vmatpush3.bf16.msra.mxu1 %v4034_v8 }
 0x1ee   :  { %1216 = vmatmul.mubr.bf16.gmra.mrb[36].mxu1 %v3966_v11 }
 0x1ef   :  { %1223 = vmatprep.mubr.bf16.mxu1 %v3967_v12  ;;  %3584 = vmatmul.mubr.bf16.gmra.mrb[68].mxu0 %v3979_v13  ;;  %v4461_v13 = vld [vmem:[%s4844_s3] ss:$0 sm:$0xff] }
 0x1f0   :  { %3587 = vmatprep.mubr.bf16.mxu0 %v3985_v14 }
 0x1f6   :  { %1224 = vmatmul.mubr.bf16.gmra.mrb[40].mxu1 %v3969_v15 }
 0x1f7   :  { %1231 = vmatprep.mubr.bf16.mxu1 %v3972_v16  ;;  %3588 = vmatmul.mubr.bf16.gmra.mrb[72].mxu0 %v3987_v17 }
 0x1f8   :  { %3591 = vmatprep.mubr.bf16.mxu0 %v3990_v18 }
 0x1fe   :  { %1232 = vmatmul.mubr.bf16.gmra.mrb[44].mxu1 %v3974_v19 }
 0x1ff   :  { %1239 = vmatprep.mubr.bf16.mxu1 %v3975_v20  ;;  %3592 = vmatmul.mubr.bf16.gmra.mrb[76].mxu0 %v3992_v21 }
 0x200   :  { %3595 = vmatprep.mubr.bf16.mxu0 %v4001_v22 }
 0x206   :  { %1240 = vmatmul.mubr.bf16.gmra.mrb[48].mxu1 %v3977_v25 }
 0x207   :  { %1247 = vmatprep.mubr.bf16.mxu1 %v3980_v26  ;;  %3596 = vmatmul.mubr.bf16.gmra.mrb[80].mxu0 %v4003_v27 }
 0x208   :  { %3599 = vmatprep.mubr.bf16.mxu0 %v4012_v28 }
 0x20e   :  { %1248 = vmatmul.mubr.bf16.gmra.mrb[52].mxu1 %v3982_v30 }
 0x20f   :  { %1255 = vmatprep.mubr.bf16.mxu1 %v3983_v31  ;;  %3600 = vmatmul.mubr.bf16.gmra.mrb[84].mxu0 %v4014_v33 }
 0x210   :  { %3603 = vmatprep.mubr.bf16.mxu0 %v4017_v34 }
 0x216   :  { %1256 = vmatmul.mubr.bf16.gmra.mrb[56].mxu1 %v3986_v35 }
 0x217   :  { %1263 = vmatprep.mubr.bf16.mxu1 %v3988_v36  ;;  %3604 = vmatmul.mubr.bf16.gmra.mrb[88].mxu0 %v4019_v37 }
 0x218   :  { %3607 = vmatprep.mubr.bf16.mxu0 %v4022_v38 }
 0x21e   :  { %1264 = vmatmul.mubr.bf16.gmra.mrb[60].mxu1 %v3991_v39 }
 0x21f   :  { %1271 = vmatprep.mubr.bf16.mxu1 %v3993_v40  ;;  %3608 = vmatmul.mubr.bf16.gmra.mrb[92].mxu0 %v4024_v41 }
 0x226   :  { %1272 = vmatmul.mubr.bf16.gmra.mrb[64].mxu1 %v3995_v44 }
 0x227   :  { %1279 = vmatprep.mubr.bf16.mxu1 %v3996_v45 }
 0x22e   :  { %1280 = vmatmul.mubr.bf16.gmra.mrb[68].mxu1 %v3998_v46 }
 0x22f   :  { %1287 = vmatprep.mubr.bf16.mxu1 %v3999_v47 }
 0x236   :  { %1288 = vmatmul.mubr.bf16.gmra.mrb[72].mxu1 %v4002_v48 }
 0x237   :  { %1295 = vmatprep.mubr.bf16.mxu1 %v4004_v49 }
 0x23e   :  { %1296 = vmatmul.mubr.bf16.gmra.mrb[76].mxu1 %v4006_v50 }
 0x23f   :  { %1303 = vmatprep.mubr.bf16.mxu1 %v4007_v51 }
 0x246   :  { %1304 = vmatmul.mubr.bf16.gmra.mrb[80].mxu1 %v4009_v52 }
 0x247   :  { %1311 = vmatprep.mubr.bf16.mxu1 %v4010_v53 }
 0x24e   :  { %1312 = vmatmul.mubr.bf16.gmra.mrb[84].mxu1 %v4013_v54 }
 0x24f   :  { %1319 = vmatprep.mubr.bf16.mxu1 %v4015_v55 }
 0x256   :  { %1320 = vmatmul.mubr.bf16.gmra.mrb[88].mxu1 %v4018_v56 }
 0x257   :  { %1327 = vmatprep.mubr.bf16.mxu1 %v4020_v57 }
 0x25e   :  { %1328 = vmatmul.mubr.bf16.gmra.mrb[92].mxu1 %v4023_v58 }
 0x279   :  { %v1145_v59 = vpop.f32.mrb[0].mxu1 }
 0x27a   :  { %v1147_v60 = vpop.f32.mrb[1].mxu1  ;;  %v1146_v16 = vadd.f32 %v4461_v13, %v1145_v59 }
 0x27b   :  { %v1148_v61 = vpop.f32.mrb[2].mxu1 }
 0x27c   :  { %v1150_v62 = vpop.f32.mrb[3].mxu1  ;;  %v1149_v23 = vadd.f32 %v4461_v13, %v1148_v61 }
 0x281   :  { %v1153_v0 = vpop.f32.mrb[4].mxu1 }
 0x282   :  { %v1155_v1 = vpop.f32.mrb[5].mxu1  ;;  %v1154_v14 = vadd.f32 %v4461_v13, %v1153_v0 }
 0x283   :  { %v1156_v2 = vpop.f32.mrb[6].mxu1 }
 0x284   :  { %v1158_v3 = vpop.f32.mrb[7].mxu1  ;;  %v1157_v19 = vadd.f32 %v4461_v13, %v1156_v2 }
 0x289   :  { %v1161_v4 = vpop.f32.mrb[8].mxu1 }
 0x28a   :  { %v1163_v5 = vpop.f32.mrb[9].mxu1  ;;  %v1162_v39 = vadd.f32 %v4461_v13, %v1161_v4 }
 0x28b   :  { %v1164_v6 = vpop.f32.mrb[10].mxu1 }
 0x28c   :  { %v1166_v7 = vpop.f32.mrb[11].mxu1  ;;  %v1165_v46 = vadd.f32 %v4461_v13, %v1164_v6 }
 0x291   :  { %v1169_v9 = vpop.f32.mrb[12].mxu1 }
 0x292   :  { %v1171_v10 = vpop.f32.mrb[13].mxu1  ;;  %v1170_v36 = vadd.f32 %v4461_v13, %v1169_v9 }
 0x293   :  { %v1172_v11 = vpop.f32.mrb[14].mxu1 }
 0x294   :  { %v1174_v12 = vpop.f32.mrb[15].mxu1  ;;  %v1173_v44 = vadd.f32 %v4461_v13, %v1172_v11 }
 0x299   :  { %v1177_v15 = vpop.f32.mrb[16].mxu1 }
 0x29a   :  { %v3565_v17 = vpop.f32.mrb[48].mxu0  ;;  %v1179_v18 = vpop.f32.mrb[17].mxu1  ;;  %v1178_v61 = vadd.f32 %v4461_v13, %v1177_v15 }
 0x29b   :  { %v1379_v20 = vadd.f32 %v3565_v17, %v1154_v14  ;;  %v1370_v21 = vpop.f32.mrb[49].mxu0  ;;  %v1180_v22 = vpop.f32.mrb[18].mxu1 }
 0x29c   :  { %v1371_v24 = vadd.f32 %v1370_v21, %v1146_v16  ;;  %v3566_v25 = vpop.f32.mrb[50].mxu0  ;;  %v1182_v26 = vpop.f32.mrb[19].mxu1  ;;  %v1181_v4 = vadd.f32 %v4461_v13, %v1180_v22 }
 0x29d   :  { %v1382_v27 = vadd.f32 %v3566_v25, %v1157_v19  ;;  %v1373_v28 = vpop.f32.mrb[51].mxu0  ;;  %v1563_v30 = vmax.f32 %v1379_v20, 0.0 }
 0x29e   :  { %v1374_v29 = vadd.f32 %v1373_v28, %v1149_v23  ;;  %v1561_v33 = vmax.f32 %v1371_v24, 0.0 }
 0x29f   :  { %v1564_v31 = vmax.f32 %v1382_v27, 0.0 }
 0x2a0   :  { %v1562_v34 = vmax.f32 %v1374_v29, 0.0 }
 0x2a1   :  { %v1626_v35 = vpack.c.bf16 %v1564_v31, %v1563_v30  ;;  %v1185_v37 = vpop.f32.mrb[20].mxu1 }
 0x2a2   :  { %v1625_v38 = vpack.c.bf16 %v1562_v34, %v1561_v33  ;;  %v3569_v40 = vpop.f32.mrb[52].mxu0  ;;  %v1187_v41 = vpop.f32.mrb[21].mxu1  ;;  %v1186_v58 = vadd.f32 %v4461_v13, %v1185_v37 }
 0x2a3   :  { %v1395_v42 = vadd.f32 %v3569_v40, %v1170_v36  ;;  %v1386_v43 = vpop.f32.mrb[53].mxu0  ;;  %v1188_v45 = vpop.f32.mrb[22].mxu1 }
 0x2a4   :  { %v1387_v47 = vadd.f32 %v1386_v43, %v1162_v39  ;;  %v3570_v48 = vpop.f32.mrb[54].mxu0  ;;  %3627 = vmatprep.mubr.bf16.mxu0 %v1625_v38  ;;  %v1190_v49 = vpop.f32.mrb[23].mxu1  ;;  %v1189_v2 = vadd.f32 %v4461_v13, %v1188_v45 }
 0x2a5   :  { %v1398_v50 = vadd.f32 %v3570_v48, %v1173_v44  ;;  %v1389_v51 = vpop.f32.mrb[55].mxu0  ;;  %3628 = vmatmul.mubr.bf16.vlgmr.msra.gmra.mrb[96].mxu0 %v1626_v35  ;;  %v1567_v53 = vmax.f32 %v1395_v42, 0.0  ;;  %v4035_v35 = vld [vmem:[#allocation10 + $0x10] sm:$0xff]  }
 0x2a6   :  { %v1390_v52 = vadd.f32 %v1389_v51, %v1165_v46  ;;  %v1565_v55 = vmax.f32 %v1387_v47, 0.0  ;;  %3679 = vmatprep.subr.bf16.mxu1 %v4035_v35 }
 0x2a7   :  { %v1568_v54 = vmax.f32 %v1398_v50, 0.0  ;;  %3680 = vmatpush3.bf16.msra.mxu1 %v4035_v35 }
 0x2a8   :  { %v1566_v56 = vmax.f32 %v1390_v52, 0.0  ;;  %v4036_v52 = vld [vmem:[#allocation10 + $0x18] sm:$0xff]  }
 0x2a9   :  { %v1628_v57 = vpack.c.bf16 %v1568_v54, %v1567_v53  ;;  %v1193_v59 = vpop.f32.mrb[24].mxu1  ;;  %v4037_v53 = vld [vmem:[#allocation10 + $0x20] sm:$0xff]   ;;  %3681 = vmatprep.subr.bf16.mxu1 %v4036_v52 }
 0x2aa   :  { %v1627_v60 = vpack.c.bf16 %v1566_v56, %v1565_v55  ;;  %v3573_v62 = vpop.f32.mrb[56].mxu0  ;;  %v1195_v63 = vpop.f32.mrb[25].mxu1  ;;  %v1194_v19 = vadd.f32 %v4461_v13, %v1193_v59 }
 0x2ab   :  { %v1411_v0 = vadd.f32 %v3573_v62, %v1186_v58  ;;  %v1402_v1 = vpop.f32.mrb[57].mxu0  ;;  %v1196_v3 = vpop.f32.mrb[26].mxu1  ;;  %3682 = vmatpush3.bf16.msra.mxu1 %v4036_v52  ;;  %v4038_v58 = vld [vmem:[#allocation10 + $0x28] sm:$0xff]  }
 0x2ac   :  { %3631 = vmatprep.mubr.bf16.mxu0 %v1627_v60  ;;  %v1403_v5 = vadd.f32 %v1402_v1, %v1178_v61  ;;  %v3574_v6 = vpop.f32.mrb[58].mxu0  ;;  %v1198_v7 = vpop.f32.mrb[27].mxu1  ;;  %v1197_v25 = vadd.f32 %v4461_v13, %v1196_v3  ;;  %3683 = vmatprep.subr.bf16.mxu1 %v4037_v53 }
 0x2ad   :  { %3632 = vmatmul.mubr.bf16.gmra.mrb[100].mxu0 %v1628_v57  ;;  %v1414_v8 = vadd.f32 %v3574_v6, %v1189_v2  ;;  %v1405_v9 = vpop.f32.mrb[59].mxu0  ;;  %v1571_v11 = vmax.f32 %v1411_v0, 0.0 }
 0x2ae   :  { %v1406_v10 = vadd.f32 %v1405_v9, %v1181_v4  ;;  %v1569_v14 = vmax.f32 %v1403_v5, 0.0 }
 0x2af   :  { %v1572_v12 = vmax.f32 %v1414_v8, 0.0  ;;  %3684 = vmatpush3.bf16.msra.mxu1 %v4037_v53 }
 0x2b0   :  { %v1570_v15 = vmax.f32 %v1406_v10, 0.0  ;;  %3685 = vmatprep.subr.bf16.mxu1 %v4038_v58 }
 0x2b1   :  { %v1630_v16 = vpack.c.bf16 %v1572_v12, %v1571_v11  ;;  %v1201_v17 = vpop.f32.mrb[28].mxu1 }
 0x2b2   :  { %v1629_v18 = vpack.c.bf16 %v1570_v15, %v1569_v14  ;;  %v1202_v20 = vadd.f32 %v4461_v13, %v1201_v17  ;;  %v3577_v21 = vpop.f32.mrb[60].mxu0  ;;  %v1203_v22 = vpop.f32.mrb[29].mxu1 }
 0x2b3   :  { %v1418_v23 = vpop.f32.mrb[61].mxu0  ;;  %v1204_v24 = vpop.f32.mrb[30].mxu1  ;;  %3686 = vmatpush3.bf16.msra.mxu1 %v4038_v58 }
 0x2b4   :  { %3635 = vmatprep.mubr.bf16.mxu0 %v1629_v18  ;;  %v1427_v26 = vadd.f32 %v3577_v21, %v1202_v20  ;;  %v1419_v27 = vadd.f32 %v1418_v23, %v1194_v19  ;;  %v1205_v28 = vadd.f32 %v4461_v13, %v1204_v24  ;;  %v3578_v29 = vpop.f32.mrb[62].mxu0  ;;  %v1206_v30 = vpop.f32.mrb[31].mxu1 }
 0x2b5   :  { %3636 = vmatmul.mubr.bf16.gmra.mrb[104].mxu0 %v1630_v16  ;;  %v1421_v31 = vpop.f32.mrb[63].mxu0 }
 0x2b6   :  { %v1430_v33 = vadd.f32 %v3578_v29, %v1205_v28  ;;  %v1422_v34 = vadd.f32 %v1421_v31, %v1197_v25  ;;  %v1575_v36 = vmax.f32 %v1427_v26, 0.0  ;;  %v1573_v37 = vmax.f32 %v1419_v27, 0.0 }
 0x2b8   :  { %v1576_v38 = vmax.f32 %v1430_v33, 0.0  ;;  %v1574_v39 = vmax.f32 %v1422_v34, 0.0 }
 0x2b9   :  { %v1209_v40 = vpop.f32.mrb[32].mxu1 }
 0x2ba   :  { %v1632_v41 = vpack.c.bf16 %v1576_v38, %v1575_v36  ;;  %v1631_v42 = vpack.c.bf16 %v1574_v39, %v1573_v37  ;;  %v1210_v43 = vadd.f32 %v4461_v13, %v1209_v40  ;;  %v1211_v44 = vpop.f32.mrb[33].mxu1  ;;  %v3581_v45 = vpop.f32.mrb[64].mxu0 }
 0x2bb   :  { %v1212_v46 = vpop.f32.mrb[34].mxu1  ;;  %v1434_v47 = vpop.f32.mrb[65].mxu0 }
 0x2bc   :  { %3639 = vmatprep.mubr.bf16.mxu0 %v1631_v42  ;;  %v1213_v48 = vadd.f32 %v4461_v13, %v1212_v46  ;;  %v1214_v49 = vpop.f32.mrb[35].mxu1  ;;  %v1435_v50 = vadd.f32 %v1434_v47, %v1210_v43  ;;  %v3582_v51 = vpop.f32.mrb[66].mxu0 }
 0x2bd   :  { %3640 = vmatmul.mubr.bf16.gmra.mrb[108].mxu0 %v1632_v41  ;;  %v1437_v54 = vpop.f32.mrb[67].mxu0 }
 0x2be   :  { %v1438_v55 = vadd.f32 %v1437_v54, %v1213_v48  ;;  %v1577_v56 = vmax.f32 %v1435_v50, 0.0 }
 0x2c0   :  { %v1578_v57 = vmax.f32 %v1438_v55, 0.0 }
 0x2c1   :  { %v1217_v59 = vpop.f32.mrb[36].mxu1 }
 0x2c2   :  { %v1218_v60 = vadd.f32 %v4461_v13, %v1217_v59  ;;  %v1219_v61 = vpop.f32.mrb[37].mxu1  ;;  %v1633_v62 = vpack.c.bf16 %v1578_v57, %v1577_v56  ;;  %v3585_v63 = vpop.f32.mrb[68].mxu0 }
 0x2c3   :  { %v1220_v0 = vpop.f32.mrb[38].mxu1  ;;  %v1450_v1 = vpop.f32.mrb[69].mxu0 }
 0x2c4   :  { %v1443_v2 = vadd.f32 %v3581_v45, %v1218_v60  ;;  %v1221_v3 = vadd.f32 %v4461_v13, %v1220_v0  ;;  %3643 = vmatprep.mubr.bf16.mxu0 %v1633_v62  ;;  %v1222_v4 = vpop.f32.mrb[39].mxu1  ;;  %v3586_v5 = vpop.f32.mrb[70].mxu0 }
 0x2c5   :  { %v1453_v6 = vpop.f32.mrb[71].mxu0 }
 0x2c6   :  { %v1446_v7 = vadd.f32 %v3582_v51, %v1221_v3  ;;  %v1579_v8 = vmax.f32 %v1443_v2, 0.0 }
 0x2c8   :  { %v1580_v9 = vmax.f32 %v1446_v7, 0.0 }
 0x2c9   :  { %v1225_v10 = vpop.f32.mrb[40].mxu1 }
 0x2ca   :  { %v1634_v11 = vpack.c.bf16 %v1580_v9, %v1579_v8  ;;  %v1226_v12 = vadd.f32 %v4461_v13, %v1225_v10  ;;  %v1227_v14 = vpop.f32.mrb[41].mxu1  ;;  %v3589_v15 = vpop.f32.mrb[72].mxu0 }
 0x2cb   :  { %v1228_v16 = vpop.f32.mrb[42].mxu1  ;;  %v1466_v17 = vpop.f32.mrb[73].mxu0 }
 0x2cc   :  { %3644 = vmatmul.mubr.bf16.gmra.mrb[112].mxu0 %v1634_v11  ;;  %v1229_v18 = vadd.f32 %v4461_v13, %v1228_v16  ;;  %v1230_v19 = vpop.f32.mrb[43].mxu1  ;;  %v1451_v20 = vadd.f32 %v1450_v1, %v1226_v12  ;;  %v3590_v21 = vpop.f32.mrb[74].mxu0 }
 0x2cd   :  { %v1469_v22 = vpop.f32.mrb[75].mxu0 }
 0x2ce   :  { %v1454_v23 = vadd.f32 %v1453_v6, %v1229_v18  ;;  %v1581_v24 = vmax.f32 %v1451_v20, 0.0 }
 0x2d0   :  { %v1582_v25 = vmax.f32 %v1454_v23, 0.0 }
 0x2d1   :  { %v1233_v26 = vpop.f32.mrb[44].mxu1 }
 0x2d2   :  { %v1234_v27 = vadd.f32 %v4461_v13, %v1233_v26  ;;  %v1235_v28 = vpop.f32.mrb[45].mxu1  ;;  %v1635_v29 = vpack.c.bf16 %v1582_v25, %v1581_v24  ;;  %v4486_v30 = vpop.f32.mrb[76].mxu0 }
 0x2d3   :  { %v1236_v31 = vpop.f32.mrb[46].mxu1  ;;  %v1482_v33 = vpop.f32.mrb[77].mxu0 }
 0x2d4   :  { %v1459_v34 = vadd.f32 %v3585_v63, %v1234_v27  ;;  %v1237_v35 = vadd.f32 %v4461_v13, %v1236_v31  ;;  %v1238_v36 = vpop.f32.mrb[47].mxu1  ;;  %3647 = vmatprep.mubr.bf16.mxu0 %v1635_v29  ;;  %v4489_v37 = vpop.f32.mrb[78].mxu0 }
 0x2d5   :  { %v1485_v38 = vpop.f32.mrb[79].mxu0 }
 0x2d6   :  { %v1462_v39 = vadd.f32 %v3586_v5, %v1237_v35  ;;  %v1583_v40 = vmax.f32 %v1459_v34, 0.0 }
 0x2d8   :  { %v1584_v41 = vmax.f32 %v1462_v39, 0.0 }
 0x2d9   :  { %v1241_v42 = vpop.f32.mrb[48].mxu1 }
 0x2da   :  { %v1636_v43 = vpack.c.bf16 %v1584_v41, %v1583_v40  ;;  %v1242_v44 = vadd.f32 %v4461_v13, %v1241_v42  ;;  %v1243_v45 = vpop.f32.mrb[49].mxu1  ;;  %v4492_v46 = vpop.f32.mrb[80].mxu0  ;;  %v4039_v40 = vld [vmem:[#allocation10 + $0x30] sm:$0xff]  }
 0x2db   :  { %v1244_v47 = vpop.f32.mrb[50].mxu1  ;;  %v4494_v48 = vpop.f32.mrb[81].mxu0  ;;  %3687 = vmatprep.subr.bf16.mxu1 %v4039_v40 }
 0x2dc   :  { %v1245_v49 = vadd.f32 %v4461_v13, %v1244_v47  ;;  %3648 = vmatmul.mubr.bf16.gmra.mrb[116].mxu0 %v1636_v43  ;;  %v1246_v50 = vpop.f32.mrb[51].mxu1  ;;  %v1467_v51 = vadd.f32 %v1466_v17, %v1242_v44  ;;  %v4497_v52 = vpop.f32.mrb[82].mxu0  ;;  %3688 = vmatpush3.bf16.msra.mxu1 %v4039_v40 }
 0x2dd   :  { %v4499_v53 = vpop.f32.mrb[83].mxu0 }
 0x2de   :  { %v1470_v54 = vadd.f32 %v1469_v22, %v1245_v49  ;;  %v1585_v55 = vmax.f32 %v1467_v51, 0.0  ;;  %v4040_v49 = vld [vmem:[#allocation10 + $0x38] sm:$0xff]  }
 0x2df   :  { %3689 = vmatprep.subr.bf16.mxu1 %v4040_v49 }
 0x2e0   :  { %v1586_v56 = vmax.f32 %v1470_v54, 0.0  ;;  %3690 = vmatpush3.bf16.msra.mxu1 %v4040_v49 }
 0x2e1   :  { %v1249_v57 = vpop.f32.mrb[52].mxu1 }
 0x2e2   :  { %v1250_v58 = vadd.f32 %v4461_v13, %v1249_v57  ;;  %v1251_v59 = vpop.f32.mrb[53].mxu1  ;;  %v1637_v60 = vpack.c.bf16 %v1586_v56, %v1585_v55  ;;  %v4502_v61 = vpop.f32.mrb[84].mxu0 }
 0x2e3   :  { %v1252_v62 = vpop.f32.mrb[54].mxu1  ;;  %v4504_v63 = vpop.f32.mrb[85].mxu0 }
 0x2e4   :  { %v1475_v0 = vadd.f32 %v3589_v15, %v1250_v58  ;;  %v1253_v1 = vadd.f32 %v4461_v13, %v1252_v62  ;;  %v1254_v2 = vpop.f32.mrb[55].mxu1  ;;  %3651 = vmatprep.mubr.bf16.mxu0 %v1637_v60  ;;  %v4507_v3 = vpop.f32.mrb[86].mxu0 }
 0x2e5   :  { %v4509_v4 = vpop.f32.mrb[87].mxu0 }
 0x2e6   :  { %v1478_v5 = vadd.f32 %v3590_v21, %v1253_v1  ;;  %v1587_v6 = vmax.f32 %v1475_v0, 0.0 }
 0x2e8   :  { %v1588_v7 = vmax.f32 %v1478_v5, 0.0 }
 0x2e9   :  { %v1257_v8 = vpop.f32.mrb[56].mxu1 }
 0x2ea   :  { %v1638_v9 = vpack.c.bf16 %v1588_v7, %v1587_v6  ;;  %v1258_v10 = vadd.f32 %v4461_v13, %v1257_v8  ;;  %v1259_v11 = vpop.f32.mrb[57].mxu1  ;;  %v4512_v12 = vpop.f32.mrb[88].mxu0 }
 0x2eb   :  { %v1260_v14 = vpop.f32.mrb[58].mxu1  ;;  %v4514_v15 = vpop.f32.mrb[89].mxu0 }
 0x2ec   :  { %v1261_v16 = vadd.f32 %v4461_v13, %v1260_v14  ;;  %v1262_v17 = vpop.f32.mrb[59].mxu1  ;;  %v1483_v18 = vadd.f32 %v1482_v33, %v1258_v10  ;;  %3652 = vmatmul.mubr.bf16.gmra.mrb[120].mxu0 %v1638_v9  ;;  %v4517_v19 = vpop.f32.mrb[90].mxu0 }
 0x2ed   :  { %v4519_v20 = vpop.f32.mrb[91].mxu0 }
 0x2ee   :  { %v1486_v21 = vadd.f32 %v1485_v38, %v1261_v16  ;;  %v1589_v22 = vmax.f32 %v1483_v18, 0.0 }
 0x2f0   :  { %v1590_v23 = vmax.f32 %v1486_v21, 0.0 }
 0x2f1   :  { %v1265_v24 = vpop.f32.mrb[60].mxu1 }
 0x2f2   :  { %v1266_v25 = vadd.f32 %v4461_v13, %v1265_v24  ;;  %v1267_v26 = vpop.f32.mrb[61].mxu1  ;;  %v1639_v27 = vpack.c.bf16 %v1590_v23, %v1589_v22  ;;  %v4522_v28 = vpop.f32.mrb[92].mxu0 }
 0x2f3   :  { %v1268_v29 = vpop.f32.mrb[62].mxu1  ;;  %v4524_v31 = vpop.f32.mrb[93].mxu0 }
 0x2f4   :  { %v1491_v33 = vadd.f32 %v4486_v30, %v1266_v25  ;;  %v1269_v34 = vadd.f32 %v4461_v13, %v1268_v29  ;;  %3655 = vmatprep.mubr.bf16.mxu0 %v1639_v27  ;;  %v1270_v35 = vpop.f32.mrb[63].mxu1  ;;  %v4528_v36 = vpop.f32.mrb[94].mxu0 }
 0x2f5   :  { %v4530_v38 = vpop.f32.mrb[95].mxu0 }
 0x2f6   :  { %v1494_v39 = vadd.f32 %v4489_v37, %v1269_v34  ;;  %v1591_v41 = vmax.f32 %v1491_v33, 0.0 }
 0x2f8   :  { %v1592_v42 = vmax.f32 %v1494_v39, 0.0 }
 0x2f9   :  { %v1273_v43 = vpop.f32.mrb[64].mxu1 }
 0x2fa   :  { %v1640_v44 = vpack.c.bf16 %v1592_v42, %v1591_v41  ;;  %v1274_v45 = vadd.f32 %v4461_v13, %v1273_v43  ;;  %v1275_v47 = vpop.f32.mrb[65].mxu1 }
 0x2fb   :  { %v1276_v30 = vpop.f32.mrb[66].mxu1 }
 0x2fc   :  { %3656 = vmatmul.mubr.bf16.gmra.mrb[124].mxu0 %v1640_v44  ;;  %v1277_v50 = vadd.f32 %v4461_v13, %v1276_v30  ;;  %v1278_v51 = vpop.f32.mrb[67].mxu1  ;;  %v1499_v54 = vadd.f32 %v4494_v48, %v1274_v45 }
 0x2fe   :  { %v1593_v37 = vmax.f32 %v1499_v54, 0.0  ;;  %v1502_v55 = vadd.f32 %v4499_v53, %v1277_v50 }
 0x300   :  { %v1594_v56 = vmax.f32 %v1502_v55, 0.0 }
 0x301   :  { %v1281_v57 = vpop.f32.mrb[68].mxu1 }
 0x302   :  { %v1282_v58 = vadd.f32 %v4461_v13, %v1281_v57  ;;  %v1283_v59 = vpop.f32.mrb[69].mxu1  ;;  %v1641_v60 = vpack.c.bf16 %v1594_v56, %v1593_v37 }
 0x303   :  { %v1284_v62 = vpop.f32.mrb[70].mxu1 }
 0x304   :  { %v1507_v0 = vadd.f32 %v4492_v46, %v1282_v58  ;;  %v1285_v1 = vadd.f32 %v4461_v13, %v1284_v62  ;;  %3659 = vmatprep.mubr.bf16.mxu0 %v1641_v60  ;;  %v1286_v2 = vpop.f32.mrb[71].mxu1 }
 0x306   :  { %v1595_v5 = vmax.f32 %v1507_v0, 0.0  ;;  %v1510_v48 = vadd.f32 %v4497_v52, %v1285_v1 }
 0x308   :  { %v1596_v6 = vmax.f32 %v1510_v48, 0.0 }
 0x309   :  { %v1289_v7 = vpop.f32.mrb[72].mxu1 }
 0x30a   :  { %v1642_v53 = vpack.c.bf16 %v1596_v6, %v1595_v5  ;;  %v1290_v8 = vadd.f32 %v4461_v13, %v1289_v7  ;;  %v1291_v9 = vpop.f32.mrb[73].mxu1 }
 0x30b   :  { %v1292_v10 = vpop.f32.mrb[74].mxu1 }
 0x30c   :  { %3660 = vmatmul.mubr.bf16.gmra.mrb[128].mxu0 %v1642_v53  ;;  %v1293_v11 = vadd.f32 %v4461_v13, %v1292_v10  ;;  %v1294_v14 = vpop.f32.mrb[75].mxu1  ;;  %v1515_v46 = vadd.f32 %v4504_v63, %v1290_v8 }
 0x30e   :  { %v1597_v16 = vmax.f32 %v1515_v46, 0.0  ;;  %v1518_v17 = vadd.f32 %v4509_v4, %v1293_v11 }
 0x310   :  { %v1598_v18 = vmax.f32 %v1518_v17, 0.0  ;;  %v4568_v17 = vld [vmem:[%s4846_s5] ss:$0 sm:$0xff] }
 0x311   :  { %v1297_v21 = vpop.f32.mrb[76].mxu1 }
 0x312   :  { %v1298_v52 = vadd.f32 %v4461_v13, %v1297_v21  ;;  %v1299_v22 = vpop.f32.mrb[77].mxu1  ;;  %v1643_v23 = vpack.c.bf16 %v1598_v18, %v1597_v16 }
 0x313   :  { %v1300_v24 = vpop.f32.mrb[78].mxu1 }
 0x314   :  { %v1523_v25 = vadd.f32 %v4502_v61, %v1298_v52  ;;  %v1301_v26 = vadd.f32 %v4461_v13, %v1300_v24  ;;  %v1302_v27 = vpop.f32.mrb[79].mxu1  ;;  %3663 = vmatprep.mubr.bf16.mxu0 %v1643_v23 }
 0x316   :  { %v1599_v29 = vmax.f32 %v1523_v25, 0.0  ;;  %v1526_v33 = vadd.f32 %v4507_v3, %v1301_v26 }
 0x318   :  { %v1600_v63 = vmax.f32 %v1526_v33, 0.0 }
 0x319   :  { %v1305_v34 = vpop.f32.mrb[80].mxu1 }
 0x31a   :  { %v1644_v35 = vpack.c.bf16 %v1600_v63, %v1599_v29  ;;  %v1306_v4 = vadd.f32 %v4461_v13, %v1305_v34  ;;  %v1307_v39 = vpop.f32.mrb[81].mxu1 }
 0x31b   :  { %v1308_v40 = vpop.f32.mrb[82].mxu1 }
 0x31c   :  { %v1309_v41 = vadd.f32 %v4461_v13, %v1308_v40  ;;  %v1310_v42 = vpop.f32.mrb[83].mxu1  ;;  %v1531_v43 = vadd.f32 %v4514_v15, %v1306_v4  ;;  %3664 = vmatmul.mubr.bf16.gmra.mrb[132].mxu0 %v1644_v35 }
 0x31e   :  { %v1601_v61 = vmax.f32 %v1531_v43, 0.0  ;;  %v1534_v44 = vadd.f32 %v4519_v20, %v1309_v41 }
 0x320   :  { %v1602_v45 = vmax.f32 %v1534_v44, 0.0 }
 0x321   :  { %v1313_v47 = vpop.f32.mrb[84].mxu1 }
 0x322   :  { %v1314_v3 = vadd.f32 %v4461_v13, %v1313_v47  ;;  %v1315_v30 = vpop.f32.mrb[85].mxu1  ;;  %v1645_v49 = vpack.c.bf16 %v1602_v45, %v1601_v61 }
 0x323   :  { %v1316_v50 = vpop.f32.mrb[86].mxu1 }
 0x324   :  { %v1539_v51 = vadd.f32 %v4512_v12, %v1314_v3  ;;  %v1317_v54 = vadd.f32 %v4461_v13, %v1316_v50  ;;  %v1318_v37 = vpop.f32.mrb[87].mxu1  ;;  %3667 = vmatprep.mubr.bf16.mxu0 %v1645_v49 }
 0x326   :  { %v1603_v55 = vmax.f32 %v1539_v51, 0.0  ;;  %v1542_v15 = vadd.f32 %v4517_v19, %v1317_v54 }
 0x328   :  { %v1604_v56 = vmax.f32 %v1542_v15, 0.0 }
 0x329   :  { %v1321_v57 = vpop.f32.mrb[88].mxu1 }
 0x32a   :  { %v1646_v58 = vpack.c.bf16 %v1604_v56, %v1603_v55  ;;  %v1322_v20 = vadd.f32 %v4461_v13, %v1321_v57  ;;  %v1323_v59 = vpop.f32.mrb[89].mxu1 }
 0x32b   :  { %v1324_v60 = vpop.f32.mrb[90].mxu1 }
 0x32c   :  { %v1325_v62 = vadd.f32 %v4461_v13, %v1324_v60  ;;  %v1326_v0 = vpop.f32.mrb[91].mxu1  ;;  %v1547_v1 = vadd.f32 %v4524_v31, %v1322_v20  ;;  %3668 = vmatmul.mubr.bf16.gmra.mrb[136].mxu0 %v1646_v58 }
 0x32e   :  { %v1605_v12 = vmax.f32 %v1547_v1, 0.0  ;;  %v1550_v2 = vadd.f32 %v4530_v38, %v1325_v62  ;;  %v4049_v38 = vld [vmem:[#allocation2 + $0x4] ss:$12 sps:$4 sm:$0xff]  }
 0x330   :  { %v1606_v5 = vmax.f32 %v1550_v2, 0.0 }
 0x331   :  { %v1329_v48 = vpop.f32.mrb[92].mxu1 }
 0x332   :  { %v1330_v19 = vadd.f32 %v4461_v13, %v1329_v48  ;;  %v1331_v6 = vpop.f32.mrb[93].mxu1  ;;  %v1647_v7 = vpack.c.bf16 %v1606_v5, %v1605_v12 }
 0x333   :  { %v1332_v53 = vpop.f32.mrb[94].mxu1 }
 0x334   :  { %v1555_v8 = vadd.f32 %v4522_v28, %v1330_v19  ;;  %v1333_v9 = vadd.f32 %v4461_v13, %v1332_v53  ;;  %3671 = vmatprep.mubr.bf16.mxu0 %v1647_v7  ;;  %v1334_v10 = vpop.f32.mrb[95].mxu1 }
 0x336   :  { %v1607_v11 = vmax.f32 %v1555_v8, 0.0  ;;  %v1558_v31 = vadd.f32 %v4528_v36, %v1333_v9 }
 0x338   :  { %v1608_v14 = vmax.f32 %v1558_v31, 0.0 }
 0x33a   :  { %v1648_v46 = vpack.c.bf16 %v1608_v14, %v1607_v11 }
 0x33c   :  { %3672 = vmatmul.mubr.bf16.gmra.mrb[140].mxu0 %v1648_v46 }
 0x33d   :  { %2305 = vmatprep.mubr.bf16.mxu0 %v4049_v38 }
 0x378   :  { %v3629_v16 = vpop.f32.mrb[96].mxu0 }
 0x379   :  { %v1738_v18 = vpop.f32.mrb[97].mxu0  ;;  %v1747_v13 = vadd.f32 %v3629_v16, %v4568_v17 }
 0x37a   :  { %v3630_v28 = vpop.f32.mrb[98].mxu0  ;;  %v1739_v36 = vadd.f32 %v4568_v17, %v1738_v18 }
 0x37b   :  { %v1750_v21 = vadd.f32 %v3630_v28, %v4568_v17  ;;  %v1741_v52 = vpop.f32.mrb[99].mxu0 }
 0x37c   :  { %v1742_v22 = vadd.f32 %v4568_v17, %v1741_v52 }
 0x37d   :  { %v1946_v23 = vpack.c.bf16 %v1750_v21, %v1747_v13 }
 0x37e   :  { %v1945_v24 = vpack.c.bf16 %v1742_v22, %v1739_v36 }
 0x380   :  { %v3633_v25 = vpop.f32.mrb[100].mxu0  ;;  %3691 = vmatprep.mubr.bf16.mxu1 %v1945_v24 }
 0x381   :  { %v1754_v26 = vpop.f32.mrb[101].mxu0  ;;  %3692 = vmatmul.mubr.bf16.vlgmr.msra.gmra.mrb[96].mxu1 %v1946_v23  ;;  %v1763_v29 = vadd.f32 %v3633_v25, %v4568_v17 }
 0x382   :  { %v3634_v27 = vpop.f32.mrb[102].mxu0  ;;  %v1755_v34 = vadd.f32 %v4568_v17, %v1754_v26 }
 0x383   :  { %v1766_v33 = vadd.f32 %v3634_v27, %v4568_v17  ;;  %v1757_v63 = vpop.f32.mrb[103].mxu0 }
 0x384   :  { %v1758_v35 = vadd.f32 %v4568_v17, %v1757_v63 }
 0x385   :  { %v1948_v4 = vpack.c.bf16 %v1766_v33, %v1763_v29 }
 0x386   :  { %v1947_v39 = vpack.c.bf16 %v1758_v35, %v1755_v34 }
 0x388   :  { %3695 = vmatprep.mubr.bf16.mxu1 %v1947_v39  ;;  %v3637_v40 = vpop.f32.mrb[104].mxu0 }
 0x389   :  { %3696 = vmatmul.mubr.bf16.gmra.mrb[100].mxu1 %v1948_v4  ;;  %v1770_v41 = vpop.f32.mrb[105].mxu0  ;;  %v1779_v43 = vadd.f32 %v3637_v40, %v4568_v17 }
 0x38a   :  { %v3638_v42 = vpop.f32.mrb[106].mxu0  ;;  %v1771_v45 = vadd.f32 %v4568_v17, %v1770_v41 }
 0x38b   :  { %v1782_v61 = vadd.f32 %v3638_v42, %v4568_v17  ;;  %v1773_v44 = vpop.f32.mrb[107].mxu0 }
 0x38c   :  { %v1774_v47 = vadd.f32 %v4568_v17, %v1773_v44 }
 0x38d   :  { %v1950_v3 = vpack.c.bf16 %v1782_v61, %v1779_v43 }
 0x38e   :  { %v1949_v30 = vpack.c.bf16 %v1774_v47, %v1771_v45 }
 0x390   :  { %3699 = vmatprep.mubr.bf16.mxu1 %v1949_v30  ;;  %v3641_v49 = vpop.f32.mrb[108].mxu0 }
 0x391   :  { %3700 = vmatmul.mubr.bf16.gmra.mrb[104].mxu1 %v1950_v3  ;;  %v1786_v50 = vpop.f32.mrb[109].mxu0  ;;  %v1795_v54 = vadd.f32 %v3641_v49, %v4568_v17 }
 0x392   :  { %v3642_v51 = vpop.f32.mrb[110].mxu0  ;;  %v1787_v15 = vadd.f32 %v4568_v17, %v1786_v50 }
 0x393   :  { %v1798_v37 = vadd.f32 %v3642_v51, %v4568_v17  ;;  %v1789_v55 = vpop.f32.mrb[111].mxu0 }
 0x394   :  { %v1790_v56 = vadd.f32 %v4568_v17, %v1789_v55 }
 0x395   :  { %v1952_v57 = vpack.c.bf16 %v1798_v37, %v1795_v54 }
 0x396   :  { %v1951_v58 = vpack.c.bf16 %v1790_v56, %v1787_v15 }
 0x398   :  { %3703 = vmatprep.mubr.bf16.mxu1 %v1951_v58 }
 0x399   :  { %3704 = vmatmul.mubr.bf16.gmra.mrb[108].mxu1 %v1952_v57 }
 0x39f   :  { %v3645_v20 = vpop.f32.mrb[112].mxu0 }
 0x3a0   :  { %v1802_v59 = vpop.f32.mrb[113].mxu0  ;;  %v1811_v62 = vadd.f32 %v3645_v20, %v4568_v17 }
 0x3a1   :  { %v3646_v60 = vpop.f32.mrb[114].mxu0  ;;  %v1803_v12 = vadd.f32 %v4568_v17, %v1802_v59 }
 0x3a2   :  { %v1814_v0 = vadd.f32 %v3646_v60, %v4568_v17  ;;  %v1805_v1 = vpop.f32.mrb[115].mxu0 }
 0x3a3   :  { %v1806_v2 = vadd.f32 %v4568_v17, %v1805_v1 }
 0x3a4   :  { %v1954_v5 = vpack.c.bf16 %v1814_v0, %v1811_v62 }
 0x3a5   :  { %v1953_v48 = vpack.c.bf16 %v1806_v2, %v1803_v12 }
 0x3a7   :  { %3707 = vmatprep.mubr.bf16.mxu1 %v1953_v48 }
 0x3a8   :  { %3708 = vmatmul.mubr.bf16.gmra.mrb[112].mxu1 %v1954_v5 }
 0x3af   :  { %v3649_v19 = vpop.f32.mrb[116].mxu0 }
 0x3b0   :  { %v1818_v6 = vpop.f32.mrb[117].mxu0  ;;  %v1827_v53 = vadd.f32 %v3649_v19, %v4568_v17 }
 0x3b1   :  { %v3650_v7 = vpop.f32.mrb[118].mxu0  ;;  %v1819_v10 = vadd.f32 %v4568_v17, %v1818_v6 }
 0x3b2   :  { %v1830_v8 = vadd.f32 %v3650_v7, %v4568_v17  ;;  %v1821_v9 = vpop.f32.mrb[119].mxu0 }
 0x3b3   :  { %v1822_v11 = vadd.f32 %v4568_v17, %v1821_v9 }
 0x3b4   :  { %v1956_v31 = vpack.c.bf16 %v1830_v8, %v1827_v53 }
 0x3b5   :  { %v1955_v14 = vpack.c.bf16 %v1822_v11, %v1819_v10 }
 0x3b7   :  { %3711 = vmatprep.mubr.bf16.mxu1 %v1955_v14 }
 0x3b8   :  { %3712 = vmatmul.mubr.bf16.gmra.mrb[116].mxu1 %v1956_v31  ;;  %v4050_v31 = vld [vmem:[#allocation2 + $0x68] ss:$12 sps:$4 sm:$0xff]  }
 0x3bf   :  { %v3653_v46 = vpop.f32.mrb[120].mxu0 }
 0x3c0   :  { %v1834_v38 = vpop.f32.mrb[121].mxu0  ;;  %v1843_v18 = vadd.f32 %v3653_v46, %v4568_v17 }
 0x3c1   :  { %v3654_v16 = vpop.f32.mrb[122].mxu0  ;;  %v1835_v21 = vadd.f32 %v4568_v17, %v1834_v38 }
 0x3c2   :  { %v1846_v28 = vadd.f32 %v3654_v16, %v4568_v17  ;;  %v1837_v13 = vpop.f32.mrb[123].mxu0 }
 0x3c3   :  { %v1838_v52 = vadd.f32 %v4568_v17, %v1837_v13 }
 0x3c4   :  { %v1958_v36 = vpack.c.bf16 %v1846_v28, %v1843_v18 }
 0x3c5   :  { %v1957_v22 = vpack.c.bf16 %v1838_v52, %v1835_v21 }
 0x3c7   :  { %3715 = vmatprep.mubr.bf16.mxu1 %v1957_v22 }
 0x3c8   :  { %3716 = vmatmul.mubr.bf16.gmra.mrb[120].mxu1 %v1958_v36 }
 0x3cf   :  { %v3657_v23 = vpop.f32.mrb[124].mxu0 }
 0x3d0   :  { %v1850_v24 = vpop.f32.mrb[125].mxu0  ;;  %v1859_v26 = vadd.f32 %v3657_v23, %v4568_v17 }
 0x3d1   :  { %v3658_v25 = vpop.f32.mrb[126].mxu0  ;;  %v1851_v33 = vadd.f32 %v4568_v17, %v1850_v24 }
 0x3d2   :  { %v1862_v27 = vadd.f32 %v3658_v25, %v4568_v17  ;;  %v1853_v29 = vpop.f32.mrb[127].mxu0 }
 0x3d3   :  { %v1854_v63 = vadd.f32 %v4568_v17, %v1853_v29 }
 0x3d4   :  { %v1960_v34 = vpack.c.bf16 %v1862_v27, %v1859_v26 }
 0x3d5   :  { %v1959_v35 = vpack.c.bf16 %v1854_v63, %v1851_v33 }
 0x3d7   :  { %3719 = vmatprep.mubr.bf16.mxu1 %v1959_v35 }
 0x3d8   :  { %3720 = vmatmul.mubr.bf16.gmra.mrb[124].mxu1 %v1960_v34 }
 0x3df   :  { %v3661_v4 = vpop.f32.mrb[128].mxu0 }
 0x3e0   :  { %v1875_v39 = vadd.f32 %v3661_v4, %v4568_v17  ;;  %v1866_v40 = vpop.f32.mrb[129].mxu0 }
 0x3e1   :  { %v1867_v41 = vadd.f32 %v4568_v17, %v1866_v40  ;;  %v3662_v42 = vpop.f32.mrb[130].mxu0 }
 0x3e2   :  { %v1878_v43 = vadd.f32 %v3662_v42, %v4568_v17  ;;  %v1869_v61 = vpop.f32.mrb[131].mxu0 }
 0x3e3   :  { %v1870_v44 = vadd.f32 %v4568_v17, %v1869_v61 }
 0x3e4   :  { %v1962_v45 = vpack.c.bf16 %v1878_v43, %v1875_v39 }
 0x3e5   :  { %v1961_v47 = vpack.c.bf16 %v1870_v44, %v1867_v41 }
 0x3e7   :  { %3723 = vmatprep.mubr.bf16.mxu1 %v1961_v47 }
 0x3e8   :  { %3724 = vmatmul.mubr.bf16.gmra.mrb[128].mxu1 %v1962_v45 }
 0x3ef   :  { %v3665_v3 = vpop.f32.mrb[132].mxu0 }
 0x3f0   :  { %v1891_v30 = vadd.f32 %v3665_v3, %v4568_v17  ;;  %v1882_v49 = vpop.f32.mrb[133].mxu0 }
 0x3f1   :  { %v1883_v50 = vadd.f32 %v4568_v17, %v1882_v49  ;;  %v3666_v51 = vpop.f32.mrb[134].mxu0 }
 0x3f2   :  { %v1894_v54 = vadd.f32 %v3666_v51, %v4568_v17  ;;  %v1885_v37 = vpop.f32.mrb[135].mxu0 }
 0x3f3   :  { %v1886_v55 = vadd.f32 %v4568_v17, %v1885_v37 }
 0x3f4   :  { %v1964_v15 = vpack.c.bf16 %v1894_v54, %v1891_v30 }
 0x3f5   :  { %v1963_v56 = vpack.c.bf16 %v1886_v55, %v1883_v50 }
 0x3f7   :  { %3727 = vmatprep.mubr.bf16.mxu1 %v1963_v56 }
 0x3f8   :  { %3728 = vmatmul.mubr.bf16.gmra.mrb[132].mxu1 %v1964_v15 }
 0x3ff   :  { %v3669_v57 = vpop.f32.mrb[136].mxu0 }
 0x400   :  { %v1907_v58 = vadd.f32 %v3669_v57, %v4568_v17  ;;  %v1898_v20 = vpop.f32.mrb[137].mxu0 }
 0x401   :  { %v1899_v59 = vadd.f32 %v4568_v17, %v1898_v20  ;;  %v3670_v60 = vpop.f32.mrb[138].mxu0 }
 0x402   :  { %v1910_v62 = vadd.f32 %v3670_v60, %v4568_v17  ;;  %v1901_v0 = vpop.f32.mrb[139].mxu0 }
 0x403   :  { %v1902_v1 = vadd.f32 %v4568_v17, %v1901_v0  ;;  %v4051_v0 = vld [vmem:[#allocation2] ss:$12 sps:$4 sm:$0xff]  }
 0x404   :  { %v1966_v12 = vpack.c.bf16 %v1910_v62, %v1907_v58 }
 0x405   :  { %v1965_v2 = vpack.c.bf16 %v1902_v1, %v1899_v59  ;;  %v4052_v1 = vld [vmem:[#allocation2 + $0x1c] ss:$12 sps:$4 sm:$0xff]  }
 0x407   :  { %3731 = vmatprep.mubr.bf16.mxu1 %v1965_v2 }
 0x408   :  { %3732 = vmatmul.mubr.bf16.gmra.mrb[136].mxu1 %v1966_v12 }
 0x40f   :  { %v3673_v5 = vpop.f32.mrb[140].mxu0 }
 0x410   :  { %v1923_v48 = vadd.f32 %v3673_v5, %v4568_v17  ;;  %v1914_v19 = vpop.f32.mrb[141].mxu0 }
 0x411   :  { %v1915_v6 = vadd.f32 %v4568_v17, %v1914_v19  ;;  %v3674_v7 = vpop.f32.mrb[142].mxu0 }
 0x412   :  { %v1926_v53 = vadd.f32 %v3674_v7, %v4568_v17  ;;  %v1917_v8 = vpop.f32.mrb[143].mxu0  ;;  %v4053_v7 = vld [vmem:[#allocation2 + $0x18] ss:$12 sps:$4 sm:$0xff]  }
 0x413   :  { %v1918_v9 = vadd.f32 %v4568_v17, %v1917_v8  ;;  %v4056_v8 = vld [vmem:[#allocation2 + $0x4c] ss:$12 sps:$4 sm:$0xff]  }
 0x414   :  { %v1968_v10 = vpack.c.bf16 %v1926_v53, %v1923_v48  ;;  %v4054_v53 = vld [vmem:[#allocation2 + $0x34] ss:$12 sps:$4 sm:$0xff]  }
 0x415   :  { %v1967_v11 = vpack.c.bf16 %v1918_v9, %v1915_v6 }
 0x417   :  { %3735 = vmatprep.mubr.bf16.mxu1 %v1967_v11 }
 0x418   :  { %3736 = vmatmul.mubr.bf16.gmra.mrb[140].mxu1 %v1968_v10 }
 0x419   :  { %3763 = vmatprep.mubr.bf16.mxu1 %v4050_v31 }
 0x454   :  { %v3693_v14 = vpop.f32.mrb[96].mxu1 }
 0x455   :  { %v2051_v46 = vpop.f32.mrb[97].mxu1 }
 0x456   :  { %v3694_v38 = vpop.f32.mrb[98].mxu1 }
 0x457   :  { %v2243_v16 = vpack.c.bf16 %v3694_v38, %v3693_v14  ;;  %v2054_v18 = vpop.f32.mrb[99].mxu1  ;;  %v4057_v38 = vld [vmem:[#allocation2 + $0x48] ss:$12 sps:$4 sm:$0xff]  }
 0x458   :  { %v2242_v28 = vpack.c.bf16 %v2054_v18, %v2051_v46  ;;  %v4059_v18 = vld [vmem:[#allocation2 + $0x60] ss:$12 sps:$4 sm:$0xff]  }
 0x45a   :  { %2274 = vmatpush1.bf16.msra.mxu0 %v2242_v28  ;;  %v4060_v28 = vld [vmem:[#allocation2 + $0x7c] ss:$12 sps:$4 sm:$0xff]  }
 0x45b   :  { %2275 = vmatprep.subr.bf16.mxu0 %v4295_v32 }
 0x45c   :  { %v3697_v13 = vpop.f32.mrb[100].mxu1 }
 0x45d   :  { %v2067_v21 = vpop.f32.mrb[101].mxu1 }
 0x45e   :  { %v3698_v52 = vpop.f32.mrb[102].mxu1  ;;  %2276 = vmatpush1.bf16.msra.mxu0 %v2243_v16  ;;  %v4058_v16 = vld [vmem:[#allocation2 + $0x64] ss:$12 sps:$4 sm:$0xff]  }
 0x45f   :  { %v2245_v17 = vpack.c.bf16 %v3698_v52, %v3697_v13  ;;  %v2070_v36 = vpop.f32.mrb[103].mxu1  ;;  %2277 = vmatprep.subr.bf16.mxu0 %v4295_v32 }
 0x460   :  { %v2244_v22 = vpack.c.bf16 %v2070_v36, %v2067_v21 }
 0x462   :  { %2278 = vmatpush1.bf16.msra.mxu0 %v2244_v22 }
 0x463   :  { %2279 = vmatprep.subr.bf16.mxu0 %v4295_v32 }
 0x464   :  { %v3701_v23 = vpop.f32.mrb[104].mxu1 }
 0x465   :  { %v2083_v24 = vpop.f32.mrb[105].mxu1 }
 0x466   :  { %2280 = vmatpush1.bf16.msra.mxu0 %v2245_v17  ;;  %v3702_v25 = vpop.f32.mrb[106].mxu1 }
 0x467   :  { %v2247_v26 = vpack.c.bf16 %v3702_v25, %v3701_v23  ;;  %v2086_v27 = vpop.f32.mrb[107].mxu1  ;;  %2281 = vmatprep.subr.bf16.mxu0 %v4295_v32  ;;  %v4061_v23 = vld [vmem:[#allocation2 + $0x78] ss:$12 sps:$4 sm:$0xff]   ;;  %v4063_v25 = vld [vmem:[#allocation2 + $0x90] ss:$12 sps:$4 sm:$0xff]  }
 0x468   :  { %v2246_v29 = vpack.c.bf16 %v2086_v27, %v2083_v24  ;;  %v4062_v24 = vld [vmem:[#allocation2 + $0x94] ss:$12 sps:$4 sm:$0xff]  }
 0x46a   :  { %2282 = vmatpush1.bf16.msra.mxu0 %v2246_v29 }
 0x46b   :  { %2283 = vmatprep.subr.bf16.mxu0 %v4295_v32 }
 0x46c   :  { %v3705_v33 = vpop.f32.mrb[108].mxu1 }
 0x46d   :  { %v2099_v63 = vpop.f32.mrb[109].mxu1 }
 0x46e   :  { %2284 = vmatpush1.bf16.msra.mxu0 %v2247_v26  ;;  %v3706_v34 = vpop.f32.mrb[110].mxu1  ;;  %v4064_v26 = vld [vmem:[#allocation2 + $0xac] ss:$12 sps:$4 sm:$0xff]  }
 0x46f   :  { %v2249_v35 = vpack.c.bf16 %v3706_v34, %v3705_v33  ;;  %v2102_v4 = vpop.f32.mrb[111].mxu1  ;;  %2285 = vmatprep.subr.bf16.mxu0 %v4295_v32 }
 0x470   :  { %v2248_v39 = vpack.c.bf16 %v2102_v4, %v2099_v63  ;;  %v4065_v4 = vld [vmem:[#allocation2 + $0xa8] ss:$12 sps:$4 sm:$0xff]  }
 0x472   :  { %2286 = vmatpush1.bf16.msra.mxu0 %v2248_v39  ;;  %v4066_v39 = vld [vmem:[#allocation2 + $0xc4] ss:$12 sps:$4 sm:$0xff]  }
 0x473   :  { %2287 = vmatprep.subr.bf16.mxu0 %v4295_v32 }
 0x476   :  { %2288 = vmatpush1.bf16.msra.mxu0 %v2249_v35 }
 0x477   :  { %2289 = vmatprep.subr.bf16.mxu0 %v4295_v32 }
 0x47b   :  { %v3709_v40 = vpop.f32.mrb[112].mxu1 }
 0x47c   :  { %v2115_v41 = vpop.f32.mrb[113].mxu1 }
 0x47d   :  { %v3710_v42 = vpop.f32.mrb[114].mxu1 }
 0x47e   :  { %v2251_v43 = vpack.c.bf16 %v3710_v42, %v3709_v40  ;;  %v2118_v61 = vpop.f32.mrb[115].mxu1  ;;  %v4067_v40 = vld [vmem:[#allocation2 + $0xc0] ss:$12 sps:$4 sm:$0xff]   ;;  %v4069_v42 = vld [vmem:[#allocation2 + $0xdc] ss:$12 sps:$4 sm:$0xff]  }
 0x47f   :  { %v2250_v44 = vpack.c.bf16 %v2118_v61, %v2115_v41  ;;  %v4068_v41 = vld [vmem:[#allocation2 + $0x80] ss:$12 sps:$4 sm:$0xff]   ;;  %v4071_v61 = vld [vmem:[#allocation2 + $0xd8] ss:$12 sps:$4 sm:$0xff]  }
 0x481   :  { %2290 = vmatpush1.bf16.msra.mxu0 %v2250_v44  ;;  %v4072_v44 = vld [vmem:[#allocation2 + $0xf4] ss:$12 sps:$4 sm:$0xff]  }
 0x482   :  { %2291 = vmatprep.subr.bf16.mxu0 %v4295_v32 }
 0x485   :  { %2292 = vmatpush1.bf16.msra.mxu0 %v2251_v43  ;;  %v4070_v43 = vld [vmem:[#allocation2 + $0x98] ss:$12 sps:$4 sm:$0xff]  }
 0x486   :  { %2293 = vmatprep.subr.bf16.mxu0 %v4295_v32 }
 0x48b   :  { %v3713_v45 = vpop.f32.mrb[116].mxu1 }
 0x48c   :  { %v2131_v47 = vpop.f32.mrb[117].mxu1 }
 0x48d   :  { %v3714_v3 = vpop.f32.mrb[118].mxu1 }
 0x48e   :  { %v2253_v30 = vpack.c.bf16 %v3714_v3, %v3713_v45  ;;  %v2134_v49 = vpop.f32.mrb[119].mxu1  ;;  %v4073_v45 = vld [vmem:[#allocation2 + $0xb0] ss:$12 sps:$4 sm:$0xff]  }
 0x48f   :  { %v2252_v50 = vpack.c.bf16 %v2134_v49, %v2131_v47  ;;  %v4074_v47 = vld [vmem:[#allocation2 + $0xc8] ss:$12 sps:$4 sm:$0xff]   ;;  %v4075_v3 = vld [vmem:[#allocation2 + $0xf0] ss:$12 sps:$4 sm:$0xff]   ;;  %v4077_v49 = vld [vmem:[#allocation2 + $0xe0] ss:$12 sps:$4 sm:$0xff]  }
 0x491   :  { %2294 = vmatpush1.bf16.msra.mxu0 %v2252_v50  ;;  %v4078_v50 = vld [vmem:[#allocation2 + $0xf8] ss:$12 sps:$4 sm:$0xff]  }
 0x492   :  { %2295 = vmatprep.subr.bf16.mxu0 %v4295_v32 }
 0x495   :  { %2296 = vmatpush1.bf16.msra.mxu0 %v2253_v30  ;;  %v4076_v30 = vld [vmem:[#allocation2 + $0x10c] ss:$12 sps:$4 sm:$0xff]  }
 0x496   :  { %2297 = vmatprep.subr.bf16.mxu0 %v4295_v32 }
 0x49b   :  { %v3717_v51 = vpop.f32.mrb[120].mxu1 }
 0x49c   :  { %v2147_v54 = vpop.f32.mrb[121].mxu1 }
 0x49d   :  { %v3718_v37 = vpop.f32.mrb[122].mxu1 }
 0x49e   :  { %v2255_v55 = vpack.c.bf16 %v3718_v37, %v3717_v51  ;;  %v2150_v15 = vpop.f32.mrb[123].mxu1  ;;  %v4079_v51 = vld [vmem:[#allocation2 + $0x108] ss:$12 sps:$4 sm:$0xff]   ;;  %v4081_v37 = vld [vmem:[#allocation2 + $0x110] ss:$12 sps:$4 sm:$0xff]  }
 0x49f   :  { %v2254_v56 = vpack.c.bf16 %v2150_v15, %v2147_v54  ;;  %v4080_v54 = vld [vmem:[#allocation2 + $0x124] ss:$12 sps:$4 sm:$0xff]   ;;  %v4083_v15 = vld [vmem:[#allocation2 + $0x120] ss:$12 sps:$4 sm:$0xff]  }
 0x4a1   :  { %2298 = vmatpush1.bf16.msra.mxu0 %v2254_v56  ;;  %v4084_v56 = vld [vmem:[#allocation2 + $0x13c] ss:$12 sps:$4 sm:$0xff]  }
 0x4a2   :  { %2299 = vmatprep.subr.bf16.mxu0 %v4295_v32 }
 0x4a5   :  { %2300 = vmatpush1.bf16.msra.mxu0 %v2255_v55  ;;  %v4082_v55 = vld [vmem:[#allocation2 + $0x128] ss:$12 sps:$4 sm:$0xff]  }
 0x4a6   :  { %2301 = vmatprep.subr.bf16.mxu0 %v4295_v32 }
 0x4ab   :  { %v3721_v57 = vpop.f32.mrb[124].mxu1 }
 0x4ac   :  { %v2163_v58 = vpop.f32.mrb[125].mxu1 }
 0x4ad   :  { %v3722_v20 = vpop.f32.mrb[126].mxu1 }
 0x4ae   :  { %v2257_v59 = vpack.c.bf16 %v3722_v20, %v3721_v57  ;;  %v2166_v60 = vpop.f32.mrb[127].mxu1  ;;  %v4085_v57 = vld [vmem:[#allocation2 + $0x140] ss:$12 sps:$4 sm:$0xff]   ;;  %v4087_v20 = vld [vmem:[#allocation2 + $0x138] ss:$12 sps:$4 sm:$0xff]  }
 0x4af   :  { %v2256_v62 = vpack.c.bf16 %v2166_v60, %v2163_v58  ;;  %v4086_v58 = vld [vmem:[#allocation2 + $0x158] ss:$12 sps:$4 sm:$0xff]   ;;  %v4089_v60 = vld [vmem:[#allocation2 + $0x170] ss:$12 sps:$4 sm:$0xff]  }
 0x4b1   :  { %2302 = vmatpush1.bf16.msra.mxu0 %v2256_v62  ;;  %v4090_v62 = vld [vmem:[#allocation2 + $0x188] ss:$12 sps:$4 sm:$0xff]  }
 0x4b2   :  { %2303 = vmatprep.subr.bf16.mxu0 %v4295_v32  ;;  %v4055_v32 = vld [vmem:[#allocation2 + $0x30] ss:$12 sps:$4 sm:$0xff]  }
 0x4b5   :  { %2304 = vmatpush1.bf16.msra.mxu0 %v2257_v59  ;;  %v4088_v59 = vld [vmem:[#allocation2 + $0x154] ss:$12 sps:$4 sm:$0xff]  }
 0x4b8   :  { %2306 = vmatmul.mubr.bf16.vlgmr.msra.gmra.mrb[144].mxu0 %v4051_v0  ;;  %v4091_v0 = vld [vmem:[#allocation2 + $0x150] ss:$12 sps:$4 sm:$0xff]  }
 0x4b9   :  { %2313 = vmatprep.mubr.bf16.mxu0 %v4052_v1  ;;  %v4092_v1 = vld [vmem:[#allocation2 + $0x16c] ss:$12 sps:$4 sm:$0xff]  }
 0x4bb   :  { %v3725_v12 = vpop.f32.mrb[128].mxu1 }
 0x4bc   :  { %v2179_v2 = vpop.f32.mrb[129].mxu1 }
 0x4bd   :  { %v3726_v5 = vpop.f32.mrb[130].mxu1 }
 0x4be   :  { %v2259_v48 = vpack.c.bf16 %v3726_v5, %v3725_v12  ;;  %v2182_v19 = vpop.f32.mrb[131].mxu1  ;;  %v4093_v12 = vld [vmem:[#allocation2 + $0x1a0] ss:$12 sps:$4 sm:$0xff]   ;;  %v4095_v5 = vld [vmem:[#allocation2 + $0x168] ss:$12 sps:$4 sm:$0xff]  }
 0x4bf   :  { %v2258_v6 = vpack.c.bf16 %v2182_v19, %v2179_v2  ;;  %v4094_v2 = vld [vmem:[#allocation2 + $0x1b8] ss:$12 sps:$4 sm:$0xff]   ;;  %v4097_v19 = vld [vmem:[#allocation2 + $0x1d0] ss:$12 sps:$4 sm:$0xff]  }
 0x4c0   :  { %2314 = vmatmul.mubr.bf16.gmra.mrb[148].mxu0 %v4053_v7  ;;  %v4099_v7 = vld [vmem:[#allocation2 + $0x180] ss:$12 sps:$4 sm:$0xff]  }
 0x4c1   :  { %2321 = vmatprep.mubr.bf16.mxu0 %v4054_v53  ;;  %3739 = vmatprep.subr.bf16.mxu0 %v2258_v6  ;;  %v4100_v53 = vld [vmem:[#allocation2 + $0x19c] ss:$12 sps:$4 sm:$0xff]  }
 0x4c2   :  { %3867 = vmatprep.subr.bf16.mxu1 %v2258_v6  ;;  %3740 = vmatpush3.bf16.msra.mxu0 %v2258_v6 }
 0x4c3   :  { %3875 = vmatpush3.bf16.msra.mxu1 %v2258_v6  ;;  %3741 = vmatprep.subr.bf16.mxu0 %v2259_v48  ;;  %v4098_v6 = vld [vmem:[#allocation2 + $0x1e8] ss:$12 sps:$4 sm:$0xff]  }
 0x4c4   :  { %3868 = vmatprep.subr.bf16.mxu1 %v2259_v48 }
 0x4c6   :  { %3742 = vmatpush3.bf16.msra.mxu0 %v2259_v48 }
 0x4c7   :  { %3876 = vmatpush3.bf16.msra.mxu1 %v2259_v48  ;;  %v4096_v48 = vld [vmem:[#allocation2 + $0x184] ss:$12 sps:$4 sm:$0xff]  }
 0x4c8   :  { %2322 = vmatmul.mubr.bf16.gmra.mrb[152].mxu0 %v4055_v32  ;;  %v4101_v32 = vld [vmem:[#allocation2 + $0x200] ss:$12 sps:$4 sm:$0xff]  }
 0x4c9   :  { %2329 = vmatprep.mubr.bf16.mxu0 %v4056_v8  ;;  %v4102_v8 = vld [vmem:[#allocation2 + $0x218] ss:$12 sps:$4 sm:$0xff]  }
 0x4cb   :  { %v3729_v9 = vpop.f32.mrb[132].mxu1 }
 0x4cc   :  { %v2195_v10 = vpop.f32.mrb[133].mxu1 }
 0x4cd   :  { %v3730_v11 = vpop.f32.mrb[134].mxu1 }
 0x4ce   :  { %v2261_v31 = vpack.c.bf16 %v3730_v11, %v3729_v9  ;;  %v2198_v14 = vpop.f32.mrb[135].mxu1  ;;  %v4103_v9 = vld [vmem:[#allocation2 + $0x198] ss:$12 sps:$4 sm:$0xff]   ;;  %v4105_v11 = vld [vmem:[#allocation2 + $0x230] ss:$12 sps:$4 sm:$0xff]  }
 0x4cf   :  { %v2260_v46 = vpack.c.bf16 %v2198_v14, %v2195_v10  ;;  %v4104_v10 = vld [vmem:[#allocation2 + $0x1b4] ss:$12 sps:$4 sm:$0xff]   ;;  %v4107_v14 = vld [vmem:[#allocation2 + $0x1cc] ss:$12 sps:$4 sm:$0xff]  }
 0x4d0   :  { %2330 = vmatmul.mubr.bf16.gmra.mrb[156].mxu0 %v4057_v38  ;;  %v4109_v38 = vld [vmem:[#allocation2 + $0x1e4] ss:$12 sps:$4 sm:$0xff]  }
 0x4d1   :  { %2337 = vmatprep.mubr.bf16.mxu0 %v4058_v16  ;;  %3869 = vmatprep.subr.bf16.mxu1 %v2260_v46  ;;  %v4110_v16 = vld [vmem:[#allocation2 + $0x1e0] ss:$12 sps:$4 sm:$0xff]  }
 0x4d2   :  { %3877 = vmatpush3.bf16.msra.mxu1 %v2260_v46  ;;  %3743 = vmatprep.subr.bf16.mxu0 %v2260_v46 }
 0x4d3   :  { %3870 = vmatprep.subr.bf16.mxu1 %v2261_v31  ;;  %3744 = vmatpush3.bf16.msra.mxu0 %v2260_v46  ;;  %v4108_v46 = vld [vmem:[#allocation2 + $0x1c8] ss:$12 sps:$4 sm:$0xff]  }
 0x4d4   :  { %3745 = vmatprep.subr.bf16.mxu0 %v2261_v31 }
 0x4d6   :  { %3878 = vmatpush3.bf16.msra.mxu1 %v2261_v31 }
 0x4d7   :  { %3746 = vmatpush3.bf16.msra.mxu0 %v2261_v31  ;;  %v4106_v31 = vld [vmem:[#allocation2 + $0x1b0] ss:$12 sps:$4 sm:$0xff]  }
 0x4d8   :  { %2338 = vmatmul.mubr.bf16.gmra.mrb[160].mxu0 %v4059_v18  ;;  %v4111_v18 = vld [vmem:[#allocation2 + $0x1fc] ss:$12 sps:$4 sm:$0xff]  }
 0x4d9   :  { %2345 = vmatprep.mubr.bf16.mxu0 %v4060_v28  ;;  %v4112_v28 = vld [vmem:[#allocation2 + $0x1f8] ss:$12 sps:$4 sm:$0xff]  }
 0x4db   :  { %v3733_v13 = vpop.f32.mrb[136].mxu1 }
 0x4dc   :  { %v2211_v21 = vpop.f32.mrb[137].mxu1 }
 0x4dd   :  { %v3734_v52 = vpop.f32.mrb[138].mxu1 }
 0x4de   :  { %v2263_v17 = vpack.c.bf16 %v3734_v52, %v3733_v13  ;;  %v2214_v36 = vpop.f32.mrb[139].mxu1  ;;  %v4113_v13 = vld [vmem:[#allocation2 + $0x214] ss:$12 sps:$4 sm:$0xff]   ;;  %v4115_v52 = vld [vmem:[#allocation2 + $0x22c] ss:$12 sps:$4 sm:$0xff]  }
 0x4df   :  { %v2262_v22 = vpack.c.bf16 %v2214_v36, %v2211_v21  ;;  %v4114_v21 = vld [vmem:[#allocation2 + $0x210] ss:$12 sps:$4 sm:$0xff]   ;;  %v4117_v36 = vld [vmem:[#allocation2 + $0x8] ss:$12 sps:$4 sm:$0xff]  }
 0x4e0   :  { %2346 = vmatmul.mubr.bf16.gmra.mrb[164].mxu0 %v4061_v23  ;;  %v4119_v23 = vld [vmem:[#allocation2 + $0x38] ss:$12 sps:$4 sm:$0xff]  }
 0x4e1   :  { %2353 = vmatprep.mubr.bf16.mxu0 %v4062_v24  ;;  %3871 = vmatprep.subr.bf16.mxu1 %v2262_v22  ;;  %v4120_v24 = vld [vmem:[#allocation2 + $0x50] ss:$12 sps:$4 sm:$0xff]  }
 0x4e2   :  { %3879 = vmatpush3.bf16.msra.mxu1 %v2262_v22  ;;  %3747 = vmatprep.subr.bf16.mxu0 %v2262_v22 }
 0x4e3   :  { %3872 = vmatprep.subr.bf16.mxu1 %v2263_v17  ;;  %3748 = vmatpush3.bf16.msra.mxu0 %v2262_v22  ;;  %v4118_v22 = vld [vmem:[#allocation2 + $0x20] ss:$12 sps:$4 sm:$0xff]  }
 0x4e4   :  { %3749 = vmatprep.subr.bf16.mxu0 %v2263_v17 }
 0x4e6   :  { %3880 = vmatpush3.bf16.msra.mxu1 %v2263_v17 }
 0x4e7   :  { %3750 = vmatpush3.bf16.msra.mxu0 %v2263_v17  ;;  %v4116_v17 = vld [vmem:[#allocation2 + $0x228] ss:$12 sps:$4 sm:$0xff]  }
 0x4e8   :  { %2354 = vmatmul.mubr.bf16.gmra.mrb[168].mxu0 %v4063_v25  ;;  %v4041_v25 = vld [vmem:[#allocation11] sm:$0xff]  }
 0x4e9   :  { %2361 = vmatprep.mubr.bf16.mxu0 %v4064_v26 }
 0x4eb   :  { %v3737_v27 = vpop.f32.mrb[140].mxu1 }
 0x4ec   :  { %v2227_v29 = vpop.f32.mrb[141].mxu1 }
 0x4ed   :  { %v3738_v33 = vpop.f32.mrb[142].mxu1 }
 0x4ee   :  { %v2265_v63 = vpack.c.bf16 %v3738_v33, %v3737_v27  ;;  %v2230_v34 = vpop.f32.mrb[143].mxu1 }
 0x4ef   :  { %v2264_v35 = vpack.c.bf16 %v2230_v34, %v2227_v29 }
 0x4f0   :  { %2362 = vmatmul.mubr.bf16.gmra.mrb[172].mxu0 %v4065_v4 }
 0x4f1   :  { %3873 = vmatprep.subr.bf16.mxu1 %v2264_v35  ;;  %2369 = vmatprep.mubr.bf16.mxu0 %v4066_v39  ;;  %v4042_v39 = vld [vmem:[#allocation11 + $0x8] sm:$0xff]  }
 0x4f2   :  { %3881 = vmatpush3.bf16.msra.mxu1 %v2264_v35  ;;  %3751 = vmatprep.subr.bf16.mxu0 %v2264_v35 }
 0x4f3   :  { %3874 = vmatprep.subr.bf16.mxu1 %v2265_v63  ;;  %3752 = vmatpush3.bf16.msra.mxu0 %v2264_v35 }
 0x4f4   :  { %3753 = vmatprep.subr.bf16.mxu0 %v2265_v63 }
 0x4f6   :  { %3882 = vmatpush3.bf16.msra.mxu1 %v2265_v63 }
 0x4f7   :  { %3754 = vmatpush3.bf16.msra.mxu0 %v2265_v63  ;;  %3803 = vmatprep.subr.bf16.mxu1 %v4041_v25 }
 0x4f8   :  { %2370 = vmatmul.mubr.bf16.gmra.mrb[176].mxu0 %v4067_v40 }
 0x4f9   :  { %3764 = vmatmul.mubr.bf16.vlgmr.msra.gmra.mrb[144].mxu1 %v4068_v41  ;;  %2377 = vmatprep.mubr.bf16.mxu0 %v4069_v42 }
 0x4fa   :  { %3767 = vmatprep.mubr.bf16.mxu1 %v4070_v43  ;;  %3804 = vmatpush3.bf16.msra.mxu1 %v4041_v25 }
 0x4fb   :  { %3805 = vmatprep.subr.bf16.mxu1 %v4042_v39 }
 0x4fe   :  { %3806 = vmatpush3.bf16.msra.mxu1 %v4042_v39 }
 0x500   :  { %2378 = vmatmul.mubr.bf16.gmra.mrb[180].mxu0 %v4071_v61 }
 0x501   :  { %2385 = vmatprep.mubr.bf16.mxu0 %v4072_v44  ;;  %3768 = vmatmul.mubr.bf16.gmra.mrb[148].mxu1 %v4073_v45 }
 0x502   :  { %3771 = vmatprep.mubr.bf16.mxu1 %v4074_v47 }
 0x508   :  { %2386 = vmatmul.mubr.bf16.gmra.mrb[184].mxu0 %v4075_v3 }
 0x509   :  { %2393 = vmatprep.mubr.bf16.mxu0 %v4076_v30  ;;  %3772 = vmatmul.mubr.bf16.gmra.mrb[152].mxu1 %v4077_v49  ;;  %v4043_v49 = vld [vmem:[#allocation11 + $0x10] sm:$0xff]  }
 0x50a   :  { %3775 = vmatprep.mubr.bf16.mxu1 %v4078_v50  ;;  %3807 = vmatprep.subr.bf16.mxu1 %v4043_v49 }
 0x50b   :  { %3808 = vmatpush3.bf16.msra.mxu1 %v4043_v49 }
 0x510   :  { %2394 = vmatmul.mubr.bf16.gmra.mrb[188].mxu0 %v4079_v51 }
 0x511   :  { %2401 = vmatprep.mubr.bf16.mxu0 %v4080_v54  ;;  %3776 = vmatmul.mubr.bf16.gmra.mrb[156].mxu1 %v4081_v37 }
 0x512   :  { %3779 = vmatprep.mubr.bf16.mxu1 %v4082_v55 }
 0x518   :  { %2402 = vmatmul.mubr.bf16.gmra.mrb[192].mxu0 %v4083_v15 }
 0x519   :  { %2409 = vmatprep.mubr.bf16.mxu0 %v4084_v56  ;;  %3780 = vmatmul.mubr.bf16.gmra.mrb[160].mxu1 %v4085_v57  ;;  %v4044_v56 = vld [vmem:[#allocation11 + $0x18] sm:$0xff]  }
 0x51a   :  { %3783 = vmatprep.mubr.bf16.mxu1 %v4086_v58  ;;  %3809 = vmatprep.subr.bf16.mxu1 %v4044_v56 }
 0x51b   :  { %3810 = vmatpush3.bf16.msra.mxu1 %v4044_v56 }
 0x520   :  { %2410 = vmatmul.mubr.bf16.gmra.mrb[196].mxu0 %v4087_v20 }
 0x521   :  { %2417 = vmatprep.mubr.bf16.mxu0 %v4088_v59  ;;  %3784 = vmatmul.mubr.bf16.gmra.mrb[164].mxu1 %v4089_v60  ;;  %v4045_v60 = vld [vmem:[#allocation11 + $0x20] sm:$0xff]  }
 0x522   :  { %3787 = vmatprep.mubr.bf16.mxu1 %v4090_v62  ;;  %3811 = vmatprep.subr.bf16.mxu1 %v4045_v60 }
 0x523   :  { %3812 = vmatpush3.bf16.msra.mxu1 %v4045_v60 }
 0x528   :  { %2418 = vmatmul.mubr.bf16.gmra.mrb[200].mxu0 %v4091_v0 }
 0x529   :  { %2425 = vmatprep.mubr.bf16.mxu0 %v4092_v1  ;;  %3788 = vmatmul.mubr.bf16.gmra.mrb[168].mxu1 %v4093_v12 }
 0x52a   :  { %3791 = vmatprep.mubr.bf16.mxu1 %v4094_v2  ;;  %v4046_v2 = vld [vmem:[#allocation11 + $0x28] sm:$0xff]  }
 0x52b   :  { %3813 = vmatprep.subr.bf16.mxu1 %v4046_v2 }
 0x52c   :  { %3814 = vmatpush3.bf16.msra.mxu1 %v4046_v2 }
 0x530   :  { %2426 = vmatmul.mubr.bf16.gmra.mrb[204].mxu0 %v4095_v5  ;;  %v4652_v5 = vld [vmem:[%s4848_s7] ss:$0 sm:$0xff] }
 0x531   :  { %2433 = vmatprep.mubr.bf16.mxu0 %v4096_v48  ;;  %3792 = vmatmul.mubr.bf16.gmra.mrb[172].mxu1 %v4097_v19 }
 0x532   :  { %3795 = vmatprep.mubr.bf16.mxu1 %v4098_v6 }
 0x538   :  { %2434 = vmatmul.mubr.bf16.gmra.mrb[208].mxu0 %v4099_v7 }
 0x539   :  { %2441 = vmatprep.mubr.bf16.mxu0 %v4100_v53  ;;  %3796 = vmatmul.mubr.bf16.gmra.mrb[176].mxu1 %v4101_v32  ;;  %v4047_v32 = vld [vmem:[#allocation11 + $0x30] sm:$0xff]  }
 0x53a   :  { %3799 = vmatprep.mubr.bf16.mxu1 %v4102_v8  ;;  %3815 = vmatprep.subr.bf16.mxu1 %v4047_v32 }
 0x53b   :  { %3816 = vmatpush3.bf16.msra.mxu1 %v4047_v32 }
 0x540   :  { %2442 = vmatmul.mubr.bf16.gmra.mrb[212].mxu0 %v4103_v9 }
 0x541   :  { %2449 = vmatprep.mubr.bf16.mxu0 %v4104_v10  ;;  %3800 = vmatmul.mubr.bf16.gmra.mrb[180].mxu1 %v4105_v11 }
 0x548   :  { %2450 = vmatmul.mubr.bf16.gmra.mrb[216].mxu0 %v4106_v31 }
 0x549   :  { %2457 = vmatprep.mubr.bf16.mxu0 %v4107_v14 }
 0x550   :  { %2458 = vmatmul.mubr.bf16.gmra.mrb[220].mxu0 %v4108_v46 }
 0x551   :  { %2465 = vmatprep.mubr.bf16.mxu0 %v4109_v38 }
 0x558   :  { %2466 = vmatmul.mubr.bf16.gmra.mrb[224].mxu0 %v4110_v16 }
 0x559   :  { %2473 = vmatprep.mubr.bf16.mxu0 %v4111_v18 }
 0x560   :  { %2474 = vmatmul.mubr.bf16.gmra.mrb[228].mxu0 %v4112_v28 }
 0x561   :  { %2481 = vmatprep.mubr.bf16.mxu0 %v4113_v13  ;;  %v4048_v13 = vld [vmem:[#allocation11 + $0x38] sm:$0xff]  }
 0x562   :  { %3817 = vmatprep.subr.bf16.mxu1 %v4048_v13 }
 0x563   :  { %3818 = vmatpush3.bf16.msra.mxu1 %v4048_v13 }
 0x568   :  { %2482 = vmatmul.mubr.bf16.gmra.mrb[232].mxu0 %v4114_v21 }
 0x569   :  { %2489 = vmatprep.mubr.bf16.mxu0 %v4115_v52 }
 0x570   :  { %2490 = vmatmul.mubr.bf16.gmra.mrb[236].mxu0 %v4116_v17 }
 0x571   :  { %3755 = vmatprep.mubr.bf16.mxu0 %v4117_v36 }
 0x578   :  { %3756 = vmatmul.mubr.bf16.vlgmr.msra.gmra.mrb[240].mxu0 %v4118_v22 }
 0x579   :  { %3759 = vmatprep.mubr.bf16.mxu0 %v4119_v23 }
 0x580   :  { %3760 = vmatmul.mubr.bf16.gmra.mrb[244].mxu0 %v4120_v24 }
 0x58b   :  { %v4633_v26 = vpop.f32.mrb[144].mxu0 }
 0x58c   :  { %v2309_v27 = vpop.f32.mrb[145].mxu0 }
 0x58d   :  { %v4635_v29 = vpop.f32.mrb[146].mxu0 }
 0x58e   :  { %v2312_v33 = vpop.f32.mrb[147].mxu0 }
 0x593   :  { %v4637_v63 = vpop.f32.mrb[148].mxu0 }
 0x594   :  { %v2317_v34 = vpop.f32.mrb[149].mxu0 }
 0x595   :  { %v4639_v35 = vpop.f32.mrb[150].mxu0 }
 0x596   :  { %v2320_v4 = vpop.f32.mrb[151].mxu0 }
 0x59b   :  { %v4641_v40 = vpop.f32.mrb[152].mxu0 }
 0x59c   :  { %v2325_v41 = vpop.f32.mrb[153].mxu0 }
 0x59d   :  { %v4643_v42 = vpop.f32.mrb[154].mxu0 }
 0x59e   :  { %v2328_v43 = vpop.f32.mrb[155].mxu0 }
 0x5a3   :  { %v4645_v61 = vpop.f32.mrb[156].mxu0 }
 0x5a4   :  { %v2333_v44 = vpop.f32.mrb[157].mxu0 }
 0x5a5   :  { %v4647_v45 = vpop.f32.mrb[158].mxu0 }
 0x5a6   :  { %v2336_v47 = vpop.f32.mrb[159].mxu0 }
 0x5ab   :  { %v2339_v3 = vpop.f32.mrb[160].mxu0 }
 0x5ac   :  { %v2341_v30 = vpop.f32.mrb[161].mxu0  ;;  %v2340_v6 = vadd.f32 %v4652_v5, %v2339_v3 }
 0x5ad   :  { %v2342_v50 = vpop.f32.mrb[162].mxu0 }
 0x5ae   :  { %v2344_v51 = vpop.f32.mrb[163].mxu0  ;;  %v2343_v31 = vadd.f32 %v4652_v5, %v2342_v50 }
 0x5b3   :  { %v2347_v54 = vpop.f32.mrb[164].mxu0 }
 0x5b4   :  { %v2349_v37 = vpop.f32.mrb[165].mxu0  ;;  %v2348_v48 = vadd.f32 %v4652_v5, %v2347_v54 }
 0x5b5   :  { %v2350_v55 = vpop.f32.mrb[166].mxu0 }
 0x5b6   :  { %v2352_v15 = vpop.f32.mrb[167].mxu0  ;;  %v2351_v10 = vadd.f32 %v4652_v5, %v2350_v55 }
 0x5bb   :  { %v2355_v57 = vpop.f32.mrb[168].mxu0 }
 0x5bc   :  { %v2357_v58 = vpop.f32.mrb[169].mxu0  ;;  %v2356_v27 = vadd.f32 %v4652_v5, %v2355_v57 }
 0x5bd   :  { %v2358_v20 = vpop.f32.mrb[170].mxu0 }
 0x5be   :  { %v2360_v59 = vpop.f32.mrb[171].mxu0  ;;  %v2359_v44 = vadd.f32 %v4652_v5, %v2358_v20 }
 0x5c3   :  { %v2363_v62 = vpop.f32.mrb[172].mxu0 }
 0x5c4   :  { %v2365_v0 = vpop.f32.mrb[173].mxu0  ;;  %v2364_v22 = vadd.f32 %v4652_v5, %v2363_v62 }
 0x5c5   :  { %v2366_v1 = vpop.f32.mrb[174].mxu0 }
 0x5c6   :  { %v2368_v12 = vpop.f32.mrb[175].mxu0  ;;  %v2367_v41 = vadd.f32 %v4652_v5, %v2366_v1 }
 0x5cb   :  { %v2371_v19 = vpop.f32.mrb[176].mxu0 }
 0x5cc   :  { %v3765_v7 = vpop.f32.mrb[144].mxu1  ;;  %v2373_v53 = vpop.f32.mrb[177].mxu0  ;;  %v2372_v60 = vadd.f32 %v4652_v5, %v2371_v19 }
 0x5cd   :  { %v2564_v8 = vpop.f32.mrb[145].mxu1  ;;  %v2573_v9 = vadd.f32 %v3765_v7, %v2348_v48  ;;  %v2374_v11 = vpop.f32.mrb[178].mxu0 }
 0x5ce   :  { %v2565_v14 = vadd.f32 %v2564_v8, %v2340_v6  ;;  %v3766_v46 = vpop.f32.mrb[146].mxu1  ;;  %v2376_v38 = vpop.f32.mrb[179].mxu0  ;;  %v2375_v48 = vadd.f32 %v4652_v5, %v2374_v11 }
 0x5cf   :  { %v2567_v16 = vpop.f32.mrb[147].mxu1  ;;  %v2576_v18 = vadd.f32 %v3766_v46, %v2351_v10  ;;  %v2733_v21 = vmax.f32 %v2573_v9, 0.0 }
 0x5d0   :  { %v2568_v28 = vadd.f32 %v2567_v16, %v2343_v31  ;;  %v2731_v17 = vmax.f32 %v2565_v14, 0.0 }
 0x5d1   :  { %v2734_v52 = vmax.f32 %v2576_v18, 0.0 }
 0x5d2   :  { %v2732_v36 = vmax.f32 %v2568_v28, 0.0 }
 0x5d3   :  { %v2379_v23 = vpop.f32.mrb[180].mxu0  ;;  %v4659_v24 = vpack.c.bf16 %v2734_v52, %v2733_v21 }
 0x5d4   :  { %v4661_v25 = vpack.c.bf16 %v2732_v36, %v2731_v17  ;;  %v3769_v33 = vpop.f32.mrb[148].mxu1  ;;  %v2381_v34 = vpop.f32.mrb[181].mxu0  ;;  %v2380_v56 = vadd.f32 %v4652_v5, %v2379_v23 }
 0x5d5   :  { %v2580_v4 = vpop.f32.mrb[149].mxu1  ;;  %v2589_v39 = vadd.f32 %v3769_v33, %v2364_v22  ;;  %v2382_v43 = vpop.f32.mrb[182].mxu0 }
 0x5d6   :  { %v2581_v47 = vadd.f32 %v2580_v4, %v2356_v27  ;;  %v3770_v3 = vpop.f32.mrb[150].mxu1  ;;  %v2384_v30 = vpop.f32.mrb[183].mxu0  ;;  %v2383_v12 = vadd.f32 %v4652_v5, %v2382_v43 }
 0x5d7   :  { %v2583_v49 = vpop.f32.mrb[151].mxu1  ;;  %v2592_v50 = vadd.f32 %v3770_v3, %v2367_v41  ;;  %v2737_v54 = vmax.f32 %v2589_v39, 0.0 }
 0x5d8   :  { %v2584_v51 = vadd.f32 %v2583_v49, %v2359_v44  ;;  %v2735_v55 = vmax.f32 %v2581_v47, 0.0 }
 0x5d9   :  { %v2738_v37 = vmax.f32 %v2592_v50, 0.0 }
 0x5da   :  { %v2736_v15 = vmax.f32 %v2584_v51, 0.0 }
 0x5db   :  { %v2387_v57 = vpop.f32.mrb[184].mxu0  ;;  %v4667_v58 = vpack.c.bf16 %v2738_v37, %v2737_v54 }
 0x5dc   :  { %v4669_v59 = vpack.c.bf16 %v2736_v15, %v2735_v55  ;;  %v3773_v20 = vpop.f32.mrb[152].mxu1  ;;  %v2389_v62 = vpop.f32.mrb[185].mxu0  ;;  %v2388_v18 = vadd.f32 %v4652_v5, %v2387_v57 }
 0x5dd   :  { %v2596_v0 = vpop.f32.mrb[153].mxu1  ;;  %v2605_v1 = vadd.f32 %v3773_v20, %v2380_v56  ;;  %v2390_v2 = vpop.f32.mrb[186].mxu0 }
 0x5de   :  { %v2597_v6 = vadd.f32 %v2596_v0, %v2372_v60  ;;  %v3774_v7 = vpop.f32.mrb[154].mxu1  ;;  %v2392_v53 = vpop.f32.mrb[187].mxu0  ;;  %v2391_v17 = vadd.f32 %v4652_v5, %v2390_v2 }
 0x5df   :  { %v2599_v32 = vpop.f32.mrb[155].mxu1  ;;  %v2608_v8 = vadd.f32 %v3774_v7, %v2383_v12  ;;  %v2741_v10 = vmax.f32 %v2605_v1, 0.0 }
 0x5e0   :  { %v2600_v9 = vadd.f32 %v2599_v32, %v2375_v48  ;;  %v2739_v14 = vmax.f32 %v2597_v6, 0.0 }
 0x5e1   :  { %v2742_v31 = vmax.f32 %v2608_v8, 0.0 }
 0x5e2   :  { %v2740_v46 = vmax.f32 %v2600_v9, 0.0 }
 0x5e3   :  { %v2395_v19 = vpop.f32.mrb[188].mxu0  ;;  %v4674_v38 = vpack.c.bf16 %v2742_v31, %v2741_v10 }
 0x5e4   :  { %v4676_v16 = vpack.c.bf16 %v2740_v46, %v2739_v14  ;;  %v3777_v28 = vpop.f32.mrb[156].mxu1  ;;  %v2396_v11 = vadd.f32 %v4652_v5, %v2395_v19  ;;  %v2397_v13 = vpop.f32.mrb[189].mxu0 }
 0x5e5   :  { %v2612_v21 = vpop.f32.mrb[157].mxu1  ;;  %v2398_v52 = vpop.f32.mrb[190].mxu0 }
 0x5e6   :  { %v2613_v36 = vadd.f32 %v2612_v21, %v2388_v18  ;;  %v3778_v22 = vpop.f32.mrb[158].mxu1  ;;  %v2621_v23 = vadd.f32 %v3777_v28, %v2396_v11  ;;  %v2399_v27 = vadd.f32 %v4652_v5, %v2398_v52  ;;  %v2400_v33 = vpop.f32.mrb[191].mxu0 }
 0x5e7   :  { %v2615_v34 = vpop.f32.mrb[159].mxu1 }
 0x5e8   :  { %v2616_v4 = vadd.f32 %v2615_v34, %v2391_v17  ;;  %v2624_v39 = vadd.f32 %v3778_v22, %v2399_v27  ;;  %v2743_v41 = vmax.f32 %v2613_v36, 0.0  ;;  %v2745_v44 = vmax.f32 %v2621_v23, 0.0 }
 0x5ea   :  { %v2744_v43 = vmax.f32 %v2616_v4, 0.0  ;;  %v2746_v47 = vmax.f32 %v2624_v39, 0.0 }
 0x5eb   :  { %v2403_v3 = vpop.f32.mrb[192].mxu0 }
 0x5ec   :  { %v4682_v30 = vpack.c.bf16 %v2744_v43, %v2743_v41  ;;  %v2404_v49 = vadd.f32 %v4652_v5, %v2403_v3  ;;  %v2405_v50 = vpop.f32.mrb[193].mxu0  ;;  %v3781_v51 = vpop.f32.mrb[160].mxu1  ;;  %v4685_v54 = vpack.c.bf16 %v2746_v47, %v2745_v44 }
 0x5ed   :  { %v2406_v37 = vpop.f32.mrb[194].mxu0  ;;  %v2628_v55 = vpop.f32.mrb[161].mxu1 }
 0x5ee   :  { %v2407_v15 = vadd.f32 %v4652_v5, %v2406_v37  ;;  %v2408_v56 = vpop.f32.mrb[195].mxu0  ;;  %v2629_v57 = vadd.f32 %v2628_v55, %v2404_v49  ;;  %v3782_v60 = vpop.f32.mrb[162].mxu1 }
 0x5ef   :  { %v2631_v20 = vpop.f32.mrb[163].mxu1 }
 0x5f0   :  { %v2632_v62 = vadd.f32 %v2631_v20, %v2407_v15  ;;  %v2747_v0 = vmax.f32 %v2629_v57, 0.0 }
 0x5f2   :  { %v2748_v1 = vmax.f32 %v2632_v62, 0.0 }
 0x5f3   :  { %v2411_v12 = vpop.f32.mrb[196].mxu0 }
 0x5f4   :  { %v4688_v2 = vpack.c.bf16 %v2748_v1, %v2747_v0  ;;  %v2412_v48 = vadd.f32 %v4652_v5, %v2411_v12  ;;  %v2413_v6 = vpop.f32.mrb[197].mxu0  ;;  %v3785_v7 = vpop.f32.mrb[164].mxu1 }
 0x5f5   :  { %v2414_v53 = vpop.f32.mrb[198].mxu0  ;;  %v2644_v32 = vpop.f32.mrb[165].mxu1 }
 0x5f6   :  { %v2637_v8 = vadd.f32 %v3781_v51, %v2412_v48  ;;  %v2415_v9 = vadd.f32 %v4652_v5, %v2414_v53  ;;  %v2416_v10 = vpop.f32.mrb[199].mxu0  ;;  %v3786_v31 = vpop.f32.mrb[166].mxu1 }
 0x5f7   :  { %v2647_v14 = vpop.f32.mrb[167].mxu1 }
 0x5f8   :  { %v2640_v46 = vadd.f32 %v3782_v60, %v2415_v9  ;;  %v2749_v19 = vmax.f32 %v2637_v8, 0.0 }
 0x5fa   :  { %v2750_v18 = vmax.f32 %v2640_v46, 0.0 }
 0x5fb   :  { %v2419_v28 = vpop.f32.mrb[200].mxu0 }
 0x5fc   :  { %v2420_v11 = vadd.f32 %v4652_v5, %v2419_v28  ;;  %v2421_v13 = vpop.f32.mrb[201].mxu0  ;;  %v3789_v21 = vpop.f32.mrb[168].mxu1  ;;  %v4693_v52 = vpack.c.bf16 %v2750_v18, %v2749_v19 }
 0x5fd   :  { %v2422_v17 = vpop.f32.mrb[202].mxu0  ;;  %v2660_v36 = vpop.f32.mrb[169].mxu1 }
 0x5fe   :  { %v2423_v22 = vadd.f32 %v4652_v5, %v2422_v17  ;;  %v2424_v23 = vpop.f32.mrb[203].mxu0  ;;  %v2645_v27 = vadd.f32 %v2644_v32, %v2420_v11  ;;  %v3790_v33 = vpop.f32.mrb[170].mxu1 }
 0x5ff   :  { %v2663_v34 = vpop.f32.mrb[171].mxu1 }
 0x600   :  { %v2648_v4 = vadd.f32 %v2647_v14, %v2423_v22  ;;  %v2751_v39 = vmax.f32 %v2645_v27, 0.0 }
 0x602   :  { %v2752_v41 = vmax.f32 %v2648_v4, 0.0 }
 0x603   :  { %v2427_v43 = vpop.f32.mrb[204].mxu0 }
 0x604   :  { %v4696_v44 = vpack.c.bf16 %v2752_v41, %v2751_v39  ;;  %v2428_v47 = vadd.f32 %v4652_v5, %v2427_v43  ;;  %v2429_v3 = vpop.f32.mrb[205].mxu0  ;;  %v3793_v49 = vpop.f32.mrb[172].mxu1 }
 0x605   :  { %v2430_v50 = vpop.f32.mrb[206].mxu0  ;;  %v2676_v51 = vpop.f32.mrb[173].mxu1 }
 0x606   :  { %v2653_v37 = vadd.f32 %v3785_v7, %v2428_v47  ;;  %v2431_v55 = vadd.f32 %v4652_v5, %v2430_v50  ;;  %v2432_v15 = vpop.f32.mrb[207].mxu0  ;;  %v3794_v56 = vpop.f32.mrb[174].mxu1 }
 0x607   :  { %v2679_v57 = vpop.f32.mrb[175].mxu1 }
 0x608   :  { %v2656_v60 = vadd.f32 %v3786_v31, %v2431_v55  ;;  %v2753_v20 = vmax.f32 %v2653_v37, 0.0 }
 0x60a   :  { %v2754_v62 = vmax.f32 %v2656_v60, 0.0 }
 0x60b   :  { %v2435_v0 = vpop.f32.mrb[208].mxu0 }
 0x60c   :  { %v2436_v1 = vadd.f32 %v4652_v5, %v2435_v0  ;;  %v2437_v12 = vpop.f32.mrb[209].mxu0  ;;  %v4701_v48 = vpop.f32.mrb[176].mxu1  ;;  %v4703_v6 = vpack.c.bf16 %v2754_v62, %v2753_v20 }
 0x60d   :  { %v2438_v53 = vpop.f32.mrb[210].mxu0  ;;  %v2692_v32 = vpop.f32.mrb[177].mxu1 }
 0x60e   :  { %v2439_v7 = vadd.f32 %v4652_v5, %v2438_v53  ;;  %v2440_v8 = vpop.f32.mrb[211].mxu0  ;;  %v2661_v9 = vadd.f32 %v2660_v36, %v2436_v1  ;;  %v3798_v10 = vpop.f32.mrb[178].mxu1 }
 0x60f   :  { %v2695_v14 = vpop.f32.mrb[179].mxu1 }
 0x610   :  { %v2664_v46 = vadd.f32 %v2663_v34, %v2439_v7  ;;  %v2755_v31 = vmax.f32 %v2661_v9, 0.0 }
 0x612   :  { %v2756_v19 = vmax.f32 %v2664_v46, 0.0 }
 0x613   :  { %v2443_v18 = vpop.f32.mrb[212].mxu0 }
 0x614   :  { %v2444_v28 = vadd.f32 %v4652_v5, %v2443_v18  ;;  %v4707_v11 = vpack.c.bf16 %v2756_v19, %v2755_v31  ;;  %v2445_v13 = vpop.f32.mrb[213].mxu0  ;;  %v4709_v17 = vpop.f32.mrb[180].mxu1 }
 0x615   :  { %v2446_v22 = vpop.f32.mrb[214].mxu0  ;;  %v2708_v23 = vpop.f32.mrb[181].mxu1 }
 0x616   :  { %v2669_v27 = vadd.f32 %v3789_v21, %v2444_v28  ;;  %v2447_v4 = vadd.f32 %v4652_v5, %v2446_v22  ;;  %v2448_v39 = vpop.f32.mrb[215].mxu0  ;;  %v4712_v36 = vpop.f32.mrb[182].mxu1 }
 0x617   :  { %v2711_v41 = vpop.f32.mrb[183].mxu1 }
 0x618   :  { %v2672_v34 = vadd.f32 %v3790_v33, %v2447_v4  ;;  %v2757_v43 = vmax.f32 %v2669_v27, 0.0 }
 0x61a   :  { %v2758_v47 = vmax.f32 %v2672_v34, 0.0 }
 0x61b   :  { %v2451_v3 = vpop.f32.mrb[216].mxu0 }
 0x61c   :  { %v2452_v50 = vadd.f32 %v4652_v5, %v2451_v3  ;;  %v2453_v37 = vpop.f32.mrb[217].mxu0  ;;  %v4715_v55 = vpack.c.bf16 %v2758_v47, %v2757_v43 }
 0x61d   :  { %v2454_v15 = vpop.f32.mrb[218].mxu0 }
 0x61e   :  { %v2455_v60 = vadd.f32 %v4652_v5, %v2454_v15  ;;  %v2456_v20 = vpop.f32.mrb[219].mxu0  ;;  %v2677_v21 = vadd.f32 %v2676_v51, %v2452_v50 }
 0x620   :  { %v2680_v62 = vadd.f32 %v2679_v57, %v2455_v60  ;;  %v2759_v0 = vmax.f32 %v2677_v21, 0.0 }
 0x622   :  { %v2760_v1 = vmax.f32 %v2680_v62, 0.0 }
 0x623   :  { %v2459_v12 = vpop.f32.mrb[220].mxu0 }
 0x624   :  { %v2460_v53 = vadd.f32 %v4652_v5, %v2459_v12  ;;  %v2461_v33 = vpop.f32.mrb[221].mxu0  ;;  %v4719_v7 = vpack.c.bf16 %v2760_v1, %v2759_v0 }
 0x625   :  { %v2462_v8 = vpop.f32.mrb[222].mxu0 }
 0x626   :  { %v2463_v9 = vadd.f32 %v4652_v5, %v2462_v8  ;;  %v2464_v46 = vpop.f32.mrb[223].mxu0  ;;  %v2685_v31 = vadd.f32 %v3793_v49, %v2460_v53 }
 0x628   :  { %v2688_v19 = vadd.f32 %v3794_v56, %v2463_v9  ;;  %v2761_v18 = vmax.f32 %v2685_v31, 0.0 }
 0x62a   :  { %v2762_v28 = vmax.f32 %v2688_v19, 0.0 }
 0x62b   :  { %v2467_v13 = vpop.f32.mrb[224].mxu0 }
 0x62c   :  { %v2468_v51 = vadd.f32 %v4652_v5, %v2467_v13  ;;  %v2469_v57 = vpop.f32.mrb[225].mxu0  ;;  %v4723_v22 = vpack.c.bf16 %v2762_v28, %v2761_v18 }
 0x62d   :  { %v2470_v27 = vpop.f32.mrb[226].mxu0 }
 0x62e   :  { %v2471_v4 = vadd.f32 %v4652_v5, %v2470_v27  ;;  %v2472_v39 = vpop.f32.mrb[227].mxu0  ;;  %v2693_v34 = vadd.f32 %v2692_v32, %v2468_v51 }
 0x630   :  { %v2696_v43 = vadd.f32 %v2695_v14, %v2471_v4  ;;  %v2763_v47 = vmax.f32 %v2693_v34, 0.0 }
 0x632   :  { %v2764_v3 = vmax.f32 %v2696_v43, 0.0  ;;  %v2308_v43 = vadd.f32 %v4652_v5, %v4633_v26  ;;  %v2332_v26 = vadd.f32 %v4652_v5, %v4645_v61 }
 0x633   :  { %v2475_v50 = vpop.f32.mrb[228].mxu0 }
 0x634   :  { %v2476_v49 = vadd.f32 %v4652_v5, %v2475_v50  ;;  %v2477_v56 = vpop.f32.mrb[229].mxu0  ;;  %v4727_v37 = vpack.c.bf16 %v2764_v3, %v2763_v47  ;;  %v2319_v3 = vadd.f32 %v4652_v5, %v4639_v35  ;;  %v2324_v35 = vadd.f32 %v4652_v5, %v4641_v40 }
 0x635   :  { %v2478_v15 = vpop.f32.mrb[230].mxu0 }
 0x636   :  { %v2479_v60 = vadd.f32 %v4652_v5, %v2478_v15  ;;  %v2480_v20 = vpop.f32.mrb[231].mxu0  ;;  %v2701_v21 = vadd.f32 %v4701_v48, %v2476_v49 }
 0x638   :  { %v2704_v62 = vadd.f32 %v3798_v10, %v2479_v60  ;;  %v2765_v0 = vmax.f32 %v2701_v21, 0.0 }
 0x63a   :  { %v2766_v1 = vmax.f32 %v2704_v62, 0.0 }
 0x63b   :  { %v2483_v12 = vpop.f32.mrb[232].mxu0 }
 0x63c   :  { %v2484_v32 = vadd.f32 %v4652_v5, %v2483_v12  ;;  %v2485_v14 = vpop.f32.mrb[233].mxu0  ;;  %v4732_v53 = vpack.c.bf16 %v2766_v1, %v2765_v0 }
 0x63d   :  { %v2486_v33 = vpop.f32.mrb[234].mxu0 }
 0x63e   :  { %v2487_v8 = vadd.f32 %v4652_v5, %v2486_v33  ;;  %v2488_v9 = vpop.f32.mrb[235].mxu0  ;;  %v2709_v46 = vadd.f32 %v2708_v23, %v2484_v32  ;;  %v2316_v23 = vadd.f32 %v4652_v5, %v4637_v63 }
 0x63f   :  { %v2327_v9 = vadd.f32 %v4652_v5, %v4643_v42  ;;  %v4779_v42 = vld [vmem:[%s4850_s9] ss:$0 sm:$0xff]  ;;  %s4296_s9 = smov [#allocation13]  }
 0x640   :  { %v2712_v31 = vadd.f32 %v2711_v41, %v2487_v8  ;;  %v2767_v19 = vmax.f32 %v2709_v46, 0.0  ;;  %s3144_s29 = sshll.u32 %s4296_s9, 4  ;;  %s3145_s29 = int_to_ptr.vmem [resolvable:$true] %s3144_s29 }
 0x641   :  { %s4253_s11 = scalar_lea.vmem %s3145_s29, 6144  ;;  %p4258_p7 = scmp.lt.s32.totalorder %s3145_s29, %s3145_s29 }
 0x642   :  { %v2768_v18 = vmax.f32 %v2712_v31, 0.0  ;;  %p4254_p6 = scmp.ne.s32.totalorder %s3145_s29, %s4253_s11  ;;  %p4259_p8 = scmp.lt.s32.totalorder %s4253_s11, %s4253_s11 }
 0x643   :  { %v2491_v28 = vpop.f32.mrb[236].mxu0 }
 0x644   :  { %v2492_v48 = vadd.f32 %v4652_v5, %v2491_v28  ;;  %v2493_v10 = vpop.f32.mrb[237].mxu0  ;;  %v4736_v13 = vpack.c.bf16 %v2768_v18, %v2767_v19  ;;  %p4260_p9 = por %p4259_p8, %p4258_p7 }
 0x645   :  { %v2494_v51 = vpop.f32.mrb[238].mxu0 }
 0x646   :  { %v2495_v57 = vadd.f32 %v4652_v5, %v2494_v51  ;;  %v2496_v27 = vpop.f32.mrb[239].mxu0  ;;  %v2717_v4 = vadd.f32 %v4709_v17, %v2492_v48  ;;  %v2311_v17 = vadd.f32 %v4652_v5, %v4635_v29  ;;  %v2335_v29 = vadd.f32 %v4652_v5, %v4647_v45  ;;  %p4261_p10 = pnand %p4260_p9, %p4254_p6 }
 0x648   :  { %v2720_v39 = vadd.f32 %v4712_v36, %v2495_v57  ;;  %v2769_v41 = vmax.f32 %v2717_v4, 0.0 }
 0x64a   :  { %v2770_v34 = vmax.f32 %v2720_v39, 0.0 }
 0x64b   :  { %v3757_v47 = vpop.f32.mrb[240].mxu0 }
 0x64c   :  { %v2541_v50 = vadd.f32 %v3757_v47, %v2316_v23  ;;  %v2532_v49 = vpop.f32.mrb[241].mxu0  ;;  %v2810_v56 = vpack.c.bf16 %v2770_v34, %v2769_v41 }
 0x64d   :  { %v2533_v15 = vadd.f32 %v2532_v49, %v2308_v43  ;;  %v3758_v36 = vpop.f32.mrb[242].mxu0 }
 0x64e   :  { %v2544_v60 = vadd.f32 %v3758_v36, %v2319_v3  ;;  %v2535_v20 = vpop.f32.mrb[243].mxu0  ;;  %v2725_v21 = vmax.f32 %v2541_v50, 0.0 }
 0x64f   :  { %v2536_v63 = vadd.f32 %v2535_v20, %v2311_v17  ;;  %v2723_v0 = vmax.f32 %v2533_v15, 0.0 }
 0x650   :  { %v2726_v62 = vmax.f32 %v2544_v60, 0.0 }
 0x651   :  { %v2724_v1 = vmax.f32 %v2536_v63, 0.0 }
 0x652   :  { %v2788_v12 = vpack.c.bf16 %v2726_v62, %v2725_v21 }
 0x653   :  { %v2787_v32 = vpack.c.bf16 %v2724_v1, %v2723_v0  ;;  %v3761_v14 = vpop.f32.mrb[244].mxu0 }
 0x654   :  { %v2557_v33 = vadd.f32 %v3761_v14, %v2332_v26  ;;  %v2548_v8 = vpop.f32.mrb[245].mxu0 }
 0x655   :  { %v2549_v46 = vadd.f32 %v2548_v8, %v2324_v35  ;;  %v3762_v31 = vpop.f32.mrb[246].mxu0  ;;  %3819 = vmatprep.mubr.bf16.mxu1 %v2787_v32 }
 0x656   :  { %v2560_v19 = vadd.f32 %v3762_v31, %v2335_v29  ;;  %v2551_v18 = vpop.f32.mrb[247].mxu0  ;;  %3820 = vmatmul.mubr.bf16.vlgmr.msra.gmra.mrb[184].mxu1 %v2788_v12  ;;  %v2729_v28 = vmax.f32 %v2557_v33, 0.0 }
 0x657   :  { %v2552_v61 = vadd.f32 %v2551_v18, %v2327_v9  ;;  %v2727_v40 = vmax.f32 %v2549_v46, 0.0 }
 0x658   :  { %v2730_v48 = vmax.f32 %v2560_v19, 0.0 }
 0x659   :  { %v2728_v10 = vmax.f32 %v2552_v61, 0.0 }
 0x65a   :  { %v2790_v51 = vpack.c.bf16 %v2730_v48, %v2729_v28 }
 0x65b   :  { %v2789_v57 = vpack.c.bf16 %v2728_v10, %v2727_v40 }
 0x65d   :  { %3823 = vmatprep.mubr.bf16.mxu1 %v2789_v57 }
 0x65e   :  { %3824 = vmatmul.mubr.bf16.gmra.mrb[188].mxu1 %v2790_v51 }
 0x65f   :  { %3827 = vmatprep.mubr.bf16.mxu1 %v4661_v25 }
 0x666   :  { %3828 = vmatmul.mubr.bf16.gmra.mrb[192].mxu1 %v4659_v24 }
 0x667   :  { %3831 = vmatprep.mubr.bf16.mxu1 %v4669_v59 }
 0x66e   :  { %3832 = vmatmul.mubr.bf16.gmra.mrb[196].mxu1 %v4667_v58 }
 0x66f   :  { %3835 = vmatprep.mubr.bf16.mxu1 %v4676_v16 }
 0x676   :  { %3836 = vmatmul.mubr.bf16.gmra.mrb[200].mxu1 %v4674_v38 }
 0x677   :  { %3839 = vmatprep.mubr.bf16.mxu1 %v4682_v30 }
 0x67e   :  { %3840 = vmatmul.mubr.bf16.gmra.mrb[204].mxu1 %v4685_v54 }
 0x67f   :  { %3843 = vmatprep.mubr.bf16.mxu1 %v4688_v2 }
 0x686   :  { %3844 = vmatmul.mubr.bf16.gmra.mrb[208].mxu1 %v4693_v52 }
 0x687   :  { %3847 = vmatprep.mubr.bf16.mxu1 %v4696_v44 }
 0x68e   :  { %3848 = vmatmul.mubr.bf16.gmra.mrb[212].mxu1 %v4703_v6 }
 0x68f   :  { %3851 = vmatprep.mubr.bf16.mxu1 %v4707_v11 }
 0x696   :  { %3852 = vmatmul.mubr.bf16.gmra.mrb[216].mxu1 %v4715_v55 }
 0x697   :  { %3855 = vmatprep.mubr.bf16.mxu1 %v4719_v7 }
 0x69e   :  { %3856 = vmatmul.mubr.bf16.gmra.mrb[220].mxu1 %v4723_v22 }
 0x69f   :  { %3859 = vmatprep.mubr.bf16.mxu1 %v4727_v37 }
 0x6a6   :  { %3860 = vmatmul.mubr.bf16.gmra.mrb[224].mxu1 %v4732_v53 }
 0x6a7   :  { %3863 = vmatprep.mubr.bf16.mxu1 %v4736_v13 }
 0x6ae   :  { %3864 = vmatmul.mubr.bf16.gmra.mrb[228].mxu1 %v2810_v56 }
 0x729   :  { %v3821_v45 = vpop.f32.mrb[184].mxu1 }
 0x72a   :  { %v2909_v5 = vadd.f32 %v3821_v45, %v4779_v42  ;;  %v2900_v24 = vpop.f32.mrb[185].mxu1 }
 0x72b   :  { %v2901_v25 = vadd.f32 %v4779_v42, %v2900_v24  ;;  %v3822_v58 = vpop.f32.mrb[186].mxu1 }
 0x72c   :  { %3093 = vst [vmem:[#allocation13 + $0x10] sm:$0xff] %v2909_v5  ;;  %v2912_v59 = vadd.f32 %v3822_v58, %v4779_v42  ;;  %v2903_v38 = vpop.f32.mrb[187].mxu1 }
 0x72d   :  { %3091 = vst [vmem:[#allocation13] sm:$0xff] %v2901_v25  ;;  %v2904_v16 = vadd.f32 %v4779_v42, %v2903_v38 }
 0x72e   :  { %3094 = vst [vmem:[#allocation13 + $0x18] sm:$0xff] %v2912_v59 }
 0x72f   :  { %3092 = vst [vmem:[#allocation13 + $0x8] sm:$0xff] %v2904_v16 }
 0x731   :  { %v3825_v30 = vpop.f32.mrb[188].mxu1 }
 0x732   :  { %v2925_v54 = vadd.f32 %v3825_v30, %v4779_v42  ;;  %v2916_v2 = vpop.f32.mrb[189].mxu1 }
 0x733   :  { %v2917_v52 = vadd.f32 %v4779_v42, %v2916_v2  ;;  %v3826_v44 = vpop.f32.mrb[190].mxu1 }
 0x734   :  { %3097 = vst [vmem:[#allocation13 + $0x30] sm:$0xff] %v2925_v54  ;;  %v2928_v6 = vadd.f32 %v3826_v44, %v4779_v42  ;;  %v2919_v11 = vpop.f32.mrb[191].mxu1 }
 0x735   :  { %3095 = vst [vmem:[#allocation13 + $0x20] sm:$0xff] %v2917_v52  ;;  %v2920_v55 = vadd.f32 %v4779_v42, %v2919_v11 }
 0x736   :  { %3098 = vst [vmem:[#allocation13 + $0x38] sm:$0xff] %v2928_v6 }
 0x737   :  { %3096 = vst [vmem:[#allocation13 + $0x28] sm:$0xff] %v2920_v55 }
 0x739   :  { %v3829_v7 = vpop.f32.mrb[192].mxu1 }
 0x73a   :  { %v2941_v22 = vadd.f32 %v3829_v7, %v4779_v42  ;;  %v2932_v37 = vpop.f32.mrb[193].mxu1 }
 0x73b   :  { %v2933_v53 = vadd.f32 %v4779_v42, %v2932_v37  ;;  %v3830_v13 = vpop.f32.mrb[194].mxu1 }
 0x73c   :  { %3101 = vst [vmem:[#allocation13 + $0x50] sm:$0xff] %v2941_v22  ;;  %v2944_v27 = vadd.f32 %v3830_v13, %v4779_v42  ;;  %v2935_v4 = vpop.f32.mrb[195].mxu1 }
 0x73d   :  { %3099 = vst [vmem:[#allocation13 + $0x40] sm:$0xff] %v2933_v53  ;;  %v2936_v39 = vadd.f32 %v4779_v42, %v2935_v4 }
 0x73e   :  { %3102 = vst [vmem:[#allocation13 + $0x58] sm:$0xff] %v2944_v27 }
 0x73f   :  { %3100 = vst [vmem:[#allocation13 + $0x48] sm:$0xff] %v2936_v39 }
 0x741   :  { %v3833_v23 = vpop.f32.mrb[196].mxu1 }
 0x742   :  { %v2957_v41 = vadd.f32 %v3833_v23, %v4779_v42  ;;  %v2948_v34 = vpop.f32.mrb[197].mxu1 }
 0x743   :  { %v2949_v43 = vadd.f32 %v4779_v42, %v2948_v34  ;;  %v3834_v47 = vpop.f32.mrb[198].mxu1 }
 0x744   :  { %3105 = vst [vmem:[#allocation13 + $0x70] sm:$0xff] %v2957_v41  ;;  %v2960_v3 = vadd.f32 %v3834_v47, %v4779_v42  ;;  %v2951_v50 = vpop.f32.mrb[199].mxu1 }
 0x745   :  { %3103 = vst [vmem:[#allocation13 + $0x60] sm:$0xff] %v2949_v43  ;;  %v2952_v49 = vadd.f32 %v4779_v42, %v2951_v50 }
 0x746   :  { %3106 = vst [vmem:[#allocation13 + $0x78] sm:$0xff] %v2960_v3 }
 0x747   :  { %3104 = vst [vmem:[#allocation13 + $0x68] sm:$0xff] %v2952_v49 }
 0x749   :  { %v3837_v56 = vpop.f32.mrb[200].mxu1 }
 0x74a   :  { %v2973_v17 = vadd.f32 %v3837_v56, %v4779_v42  ;;  %v2964_v15 = vpop.f32.mrb[201].mxu1 }
 0x74b   :  { %v2965_v36 = vadd.f32 %v4779_v42, %v2964_v15  ;;  %v3838_v60 = vpop.f32.mrb[202].mxu1 }
 0x74c   :  { %3109 = vst [vmem:[#allocation13 + $0x90] sm:$0xff] %v2973_v17  ;;  %v2976_v20 = vadd.f32 %v3838_v60, %v4779_v42  ;;  %v2967_v63 = vpop.f32.mrb[203].mxu1 }
 0x74d   :  { %3107 = vst [vmem:[#allocation13 + $0x80] sm:$0xff] %v2965_v36  ;;  %v2968_v21 = vadd.f32 %v4779_v42, %v2967_v63 }
 0x74e   :  { %3110 = vst [vmem:[#allocation13 + $0x98] sm:$0xff] %v2976_v20 }
 0x74f   :  { %3108 = vst [vmem:[#allocation13 + $0x88] sm:$0xff] %v2968_v21 }
 0x751   :  { %v3841_v62 = vpop.f32.mrb[204].mxu1 }
 0x752   :  { %v2989_v0 = vadd.f32 %v3841_v62, %v4779_v42  ;;  %v2980_v1 = vpop.f32.mrb[205].mxu1 }
 0x753   :  { %v2981_v26 = vadd.f32 %v4779_v42, %v2980_v1  ;;  %v3842_v12 = vpop.f32.mrb[206].mxu1 }
 0x754   :  { %3113 = vst [vmem:[#allocation13 + $0xb0] sm:$0xff] %v2989_v0  ;;  %v2992_v35 = vadd.f32 %v3842_v12, %v4779_v42  ;;  %v2983_v32 = vpop.f32.mrb[207].mxu1 }
 0x755   :  { %3111 = vst [vmem:[#allocation13 + $0xa0] sm:$0xff] %v2981_v26  ;;  %v2984_v14 = vadd.f32 %v4779_v42, %v2983_v32 }
 0x756   :  { %3114 = vst [vmem:[#allocation13 + $0xb8] sm:$0xff] %v2992_v35 }
 0x757   :  { %3112 = vst [vmem:[#allocation13 + $0xa8] sm:$0xff] %v2984_v14 }
 0x759   :  { %v3845_v29 = vpop.f32.mrb[208].mxu1 }
 0x75a   :  { %v3005_v33 = vadd.f32 %v3845_v29, %v4779_v42  ;;  %v2996_v8 = vpop.f32.mrb[209].mxu1 }
 0x75b   :  { %v2997_v9 = vadd.f32 %v4779_v42, %v2996_v8  ;;  %v3846_v46 = vpop.f32.mrb[210].mxu1 }
 0x75c   :  { %3117 = vst [vmem:[#allocation13 + $0xd0] sm:$0xff] %v3005_v33  ;;  %v3008_v31 = vadd.f32 %v3846_v46, %v4779_v42  ;;  %v2999_v19 = vpop.f32.mrb[211].mxu1 }
 0x75d   :  { %3115 = vst [vmem:[#allocation13 + $0xc0] sm:$0xff] %v2997_v9  ;;  %v3000_v18 = vadd.f32 %v4779_v42, %v2999_v19 }
 0x75e   :  { %3118 = vst [vmem:[#allocation13 + $0xd8] sm:$0xff] %v3008_v31 }
 0x75f   :  { %3116 = vst [vmem:[#allocation13 + $0xc8] sm:$0xff] %v3000_v18 }
 0x761   :  { %v3849_v61 = vpop.f32.mrb[212].mxu1 }
 0x762   :  { %v3021_v28 = vadd.f32 %v3849_v61, %v4779_v42  ;;  %v3012_v48 = vpop.f32.mrb[213].mxu1 }
 0x763   :  { %v3013_v40 = vadd.f32 %v4779_v42, %v3012_v48  ;;  %v3850_v10 = vpop.f32.mrb[214].mxu1 }
 0x764   :  { %3121 = vst [vmem:[#allocation13 + $0xf0] sm:$0xff] %v3021_v28  ;;  %v3024_v51 = vadd.f32 %v3850_v10, %v4779_v42  ;;  %v3015_v57 = vpop.f32.mrb[215].mxu1 }
 0x765   :  { %3119 = vst [vmem:[#allocation13 + $0xe0] sm:$0xff] %v3013_v40  ;;  %v3016_v45 = vadd.f32 %v4779_v42, %v3015_v57 }
 0x766   :  { %3122 = vst [vmem:[#allocation13 + $0xf8] sm:$0xff] %v3024_v51 }
 0x767   :  { %3120 = vst [vmem:[#allocation13 + $0xe8] sm:$0xff] %v3016_v45 }
 0x769   :  { %v3853_v5 = vpop.f32.mrb[216].mxu1 }
 0x76a   :  { %v3037_v24 = vadd.f32 %v3853_v5, %v4779_v42  ;;  %v3028_v25 = vpop.f32.mrb[217].mxu1 }
 0x76b   :  { %v3029_v58 = vadd.f32 %v4779_v42, %v3028_v25  ;;  %v3854_v59 = vpop.f32.mrb[218].mxu1 }
 0x76c   :  { %3125 = vst [vmem:[#allocation13 + $0x110] sm:$0xff] %v3037_v24  ;;  %v3040_v38 = vadd.f32 %v3854_v59, %v4779_v42  ;;  %v3031_v16 = vpop.f32.mrb[219].mxu1 }
 0x76d   :  { %3123 = vst [vmem:[#allocation13 + $0x100] sm:$0xff] %v3029_v58  ;;  %v3032_v30 = vadd.f32 %v4779_v42, %v3031_v16 }
 0x76e   :  { %3126 = vst [vmem:[#allocation13 + $0x118] sm:$0xff] %v3040_v38 }
 0x76f   :  { %3124 = vst [vmem:[#allocation13 + $0x108] sm:$0xff] %v3032_v30 }
 0x771   :  { %v3857_v54 = vpop.f32.mrb[220].mxu1 }
 0x772   :  { %v3053_v2 = vadd.f32 %v3857_v54, %v4779_v42  ;;  %v3044_v52 = vpop.f32.mrb[221].mxu1 }
 0x773   :  { %v3045_v44 = vadd.f32 %v4779_v42, %v3044_v52  ;;  %v3858_v6 = vpop.f32.mrb[222].mxu1 }
 0x774   :  { %3129 = vst [vmem:[#allocation13 + $0x130] sm:$0xff] %v3053_v2  ;;  %v3056_v11 = vadd.f32 %v3858_v6, %v4779_v42  ;;  %v3047_v55 = vpop.f32.mrb[223].mxu1 }
 0x775   :  { %3127 = vst [vmem:[#allocation13 + $0x120] sm:$0xff] %v3045_v44  ;;  %v3048_v7 = vadd.f32 %v4779_v42, %v3047_v55 }
 0x776   :  { %3130 = vst [vmem:[#allocation13 + $0x138] sm:$0xff] %v3056_v11 }
 0x777   :  { %3128 = vst [vmem:[#allocation13 + $0x128] sm:$0xff] %v3048_v7 }
 0x779   :  { %v3861_v22 = vpop.f32.mrb[224].mxu1 }
 0x77a   :  { %v3069_v37 = vadd.f32 %v3861_v22, %v4779_v42  ;;  %v3060_v53 = vpop.f32.mrb[225].mxu1 }
 0x77b   :  { %v3061_v13 = vadd.f32 %v4779_v42, %v3060_v53  ;;  %v3862_v27 = vpop.f32.mrb[226].mxu1 }
 0x77c   :  { %3133 = vst [vmem:[#allocation13 + $0x150] sm:$0xff] %v3069_v37  ;;  %v3072_v4 = vadd.f32 %v3862_v27, %v4779_v42  ;;  %v3063_v39 = vpop.f32.mrb[227].mxu1 }
 0x77d   :  { %3131 = vst [vmem:[#allocation13 + $0x140] sm:$0xff] %v3061_v13  ;;  %v3064_v23 = vadd.f32 %v4779_v42, %v3063_v39 }
 0x77e   :  { %3134 = vst [vmem:[#allocation13 + $0x158] sm:$0xff] %v3072_v4 }
 0x77f   :  { %3132 = vst [vmem:[#allocation13 + $0x148] sm:$0xff] %v3064_v23 }
 0x781   :  { %v3865_v41 = vpop.f32.mrb[228].mxu1 }
 0x782   :  { %v3085_v34 = vadd.f32 %v3865_v41, %v4779_v42  ;;  %v3076_v43 = vpop.f32.mrb[229].mxu1 }
 0x783   :  { %v3077_v47 = vadd.f32 %v4779_v42, %v3076_v43  ;;  %v3866_v3 = vpop.f32.mrb[230].mxu1 }
 0x784   :  { %3137 = vst [vmem:[#allocation13 + $0x170] sm:$0xff] %v3085_v34  ;;  %v3088_v50 = vadd.f32 %v3866_v3, %v4779_v42  ;;  %v3079_v49 = vpop.f32.mrb[231].mxu1 }
 0x785   :  { %3135 = vst [vmem:[#allocation13 + $0x160] sm:$0xff] %v3077_v47  ;;  %v3080_v56 = vadd.f32 %v4779_v42, %v3079_v49 }
 0x786   :  { %3138 = vst [vmem:[#allocation13 + $0x178] sm:$0xff] %v3088_v50 }
 0x787   :  { %3136 = vst [vmem:[#allocation13 + $0x168] sm:$0xff] %v3080_v56 }
 0x788   :  { %4264 = shalt.err (!%p4261_p10)
}
 0x789   :  { %s4265_s12 = scalar_lea.hbm %s4851_s10, 6144 }
 0x78a   :  { %p4266_p11 = scmp.ne.s32.totalorder %s4851_s10, %s4265_s12  ;;  %p4269_p12 = scmp.lt.u32.totalorder %s4265_s12, %s4851_s10 }
 0x78c   :  { %p4271_p13 = pnand %p4269_p12, %p4266_p11 }
 0x78e   :  { %4274 = shalt.err (!%p4271_p13)
}
 0x78f   :  { %s4297_s17 = smov 128   ;;  %s4298_s1 = smov 8  }
 0x790   :  { %3150 = dma.vmem_to_hbm [thread:$0]  %s3145_s29, 6144, %s4851_s10, [#allocation4], %s4297_s17, %s4297_s17, %s4298_s1  }
 0x791   :  { %4283 = dma.done.wait [#allocation4], 6144  }
 0x792   :  { %4284 = vsyncadd [#allocation4], 4294961152 }
 0x793   :  { %3154 = vsyncpa [#allocation3], 1 }
 0x794   :  { %3155 = vsyncpa [#allocation6], 1 }
 0x795   :  { %3156 = vsyncpa [#allocation9], 1 }
 0x796   :  { %3157 = vsyncpa [#allocation12], 1 }
 0x797   :  { %3158 = vsyncpa [#allocation4], 1 }

</bundles_post_ra>
